<compile_context>
chip_gen: v7x
topology: tpu7x:2x2x1
jax: 0.10.0
libtpu: 0.0.40
codegen_flags: <defaults>
</compile_context>

<pallas_src>
import math
import functools

import jax
import jax.numpy as jnp
from jax.experimental import pallas as pl
from jax.experimental.pallas import tpu as pltpu


# ---------------------------------------------------------------------------
# Per-generation VMEM budget / tiling targets
# ---------------------------------------------------------------------------

def _tpu_vmem_capacity():
    try:
        info = pltpu.get_tpu_info()
        for attr in ("vmem_capacity_bytes", "vmem_size_bytes", "vmem_bytes"):
            v = getattr(info, attr, None)
            if v:
                return int(v)
    except Exception:
        pass
    return 64 * 1024 * 1024  # conservative default (v7x per-TensorCore)


_VMEM_CAP = _tpu_vmem_capacity()
# Scoped VMEM budget per kernel: ~3/4 of physical, capped at 96 MiB (v5e/v6e: 96, v7x: 48).
_VMEM_LIMIT = min((_VMEM_CAP * 3) // 4, 96 * 1024 * 1024)
# Bigger row tiles where there is VMEM headroom (v5e/v6e 128 MiB vs v7x 64 MiB).
_ROW_TILE_TARGET = 512 if _VMEM_CAP >= 96 * 1024 * 1024 else 256


def _cparams(n_axes, semantics=None):
    return pltpu.CompilerParams(
        dimension_semantics=semantics or ("parallel",) * n_axes,
        vmem_limit_bytes=_VMEM_LIMIT,
    )


def _round_up(x, m):
    return ((x + m - 1) // m) * m


def _row_tiling(m, row_bytes=None):
    """Row tile (multiple of 8) and padded row count; padding keeps pipelining for any M."""
    target = _ROW_TILE_TARGET
    if row_bytes:
        cap = max(8, (_VMEM_LIMIT // 4) // max(int(row_bytes), 1))
        target = min(target, cap)
    tm = max(8, (min(target, m) // 8) * 8)
    return tm, _round_up(m, tm)


def _pad_rows(x, rows):
    return x if x.shape[0] == rows else jnp.pad(x, ((0, rows - x.shape[0]), (0, 0)))


# ---------------------------------------------------------------------------
# Capability probes (run eagerly; cached).  Keep everything running cleanly even
# if a given lowering feature is unavailable on this backend/version.
# ---------------------------------------------------------------------------

@functools.lru_cache(maxsize=None)
def _buffered_ok():
    """True if pl.Buffered(1) single-buffering of constant-index blocks works here."""
    try:
        def k(x_ref, w_ref, o_ref):
            o_ref[...] = x_ref[...] + w_ref[...]

        f = pl.pallas_call(
            k,
            grid=(2,),
            in_specs=[pl.BlockSpec((8, 128), lambda i: (i, 0)),
                      pl.BlockSpec((8, 128), lambda i: (0, 0),
                                   pipeline_mode=pl.Buffered(1))],
            out_specs=pl.BlockSpec((8, 128), lambda i: (i, 0)),
            out_shape=jax.ShapeDtypeStruct((16, 128), jnp.float32),
        )
        r = f(jnp.ones((16, 128), jnp.float32), jnp.ones((8, 128), jnp.float32))
        return bool(jnp.allclose(jax.block_until_ready(r), 2.0))
    except Exception:
        return False


@functools.lru_cache(maxsize=None)
def _batched_heads_ok(sq, sk, d, h):
    """True if the in-kernel (S,D)->(H,S,Dh) reshape/transpose + batched dots lower."""
    dh = d // h
    try:
        def k(q_ref, kv_ref, o_ref):
            kv = kv_ref[...]
            q = q_ref[...].reshape(sq, h, dh).transpose(1, 0, 2)
            kk = kv[:, :d].reshape(sk, h, dh).transpose(1, 0, 2)
            v = kv[:, d:].reshape(sk, h, dh).transpose(1, 0, 2)
            s = jnp.einsum("hqd,hkd->hqk", q, kk, preferred_element_type=jnp.float32)
            p = jnp.exp(s - jnp.max(s, axis=-1, keepdims=True))
            o = jnp.einsum("hqk,hkd->hqd", p.astype(jnp.bfloat16), v,
                           preferred_element_type=jnp.float32)
            o_ref[...] = o.transpose(1, 0, 2).reshape(sq, d).astype(o_ref.dtype)

        r = pl.pallas_call(k, out_shape=jax.ShapeDtypeStruct((sq, d), jnp.bfloat16))(
            jnp.ones((sq, d), jnp.bfloat16), jnp.ones((sk, 2 * d), jnp.bfloat16))
        jax.block_until_ready(r)
        return True
    except Exception:
        return False


def _const_spec(shape):
    """BlockSpec for a grid-invariant (resident) operand; single-buffered when supported."""
    index_map = lambda *_: (0,) * len(shape)
    if _buffered_ok():
        return pl.BlockSpec(shape, index_map, pipeline_mode=pl.Buffered(1))
    return pl.BlockSpec(shape, index_map)


# ---------------------------------------------------------------------------
# Row-tiled fused kernels (bf16 activations / weights, f32 accumulation + norm math)
# ---------------------------------------------------------------------------

def _proj_res_ln_kernel(a_ref, w_ref, b_ref, r_ref, g_ref, bt_ref, o_ref):
    # out = LayerNorm(residual + a @ w + b)
    y = jnp.dot(a_ref[...], w_ref[...], preferred_element_type=jnp.float32)
    y = y + b_ref[...] + r_ref[...].astype(jnp.float32)
    mu = jnp.mean(y, axis=-1, keepdims=True)
    yc = y - mu
    var = jnp.mean(yc * yc, axis=-1, keepdims=True)
    o_ref[...] = (yc * jax.lax.rsqrt(var + 1e-5) * g_ref[...] + bt_ref[...]).astype(o_ref.dtype)


def proj_res_ln_op(a, w, b, res, gamma, beta):
    m, k = a.shape
    n = w.shape[1]
    tm, mp = _row_tiling(m, row_bytes=2 * k + 10 * n)
    out = pl.pallas_call(
        _proj_res_ln_kernel,
        grid=(mp // tm,),
        in_specs=[pl.BlockSpec((tm, k), lambda i: (i, 0)),
                  _const_spec((k, n)),
                  _const_spec((1, n)),
                  pl.BlockSpec((tm, n), lambda i: (i, 0)),
                  _const_spec((1, n)),
                  _const_spec((1, n))],
        out_specs=pl.BlockSpec((tm, n), lambda i: (i, 0)),
        out_shape=jax.ShapeDtypeStruct((mp, n), jnp.bfloat16),
        compiler_params=_cparams(1),
    )(_pad_rows(a, mp), w, b, _pad_rows(res, mp), gamma, beta)
    return out[:m]


def _ffn_res_ln_kernel(x_ref, w1_ref, b1_ref, w2_ref, b2_ref, g_ref, bt_ref, o_ref):
    # out = LayerNorm(x + relu(x @ w1 + b1) @ w2 + b2)
    x = x_ref[...]
    hid = jnp.dot(x, w1_ref[...], preferred_element_type=jnp.float32) + b1_ref[...]
    hid = jnp.maximum(hid, 0.0).astype(jnp.bfloat16)
    y = jnp.dot(hid, w2_ref[...], preferred_element_type=jnp.float32) + b2_ref[...]
    y = y + x.astype(jnp.float32)
    mu = jnp.mean(y, axis=-1, keepdims=True)
    yc = y - mu
    var = jnp.mean(yc * yc, axis=-1, keepdims=True)
    o_ref[...] = (yc * jax.lax.rsqrt(var + 1e-5) * g_ref[...] + bt_ref[...]).astype(o_ref.dtype)


def ffn_res_ln_op(x, w1, b1, w2, b2, gamma, beta):
    m, d = x.shape
    f = w1.shape[1]
    # TODO(synk): for very large d_ff on v7x, also tile the F contraction with an "arbitrary"
    # grid axis + (TM, D) f32 accumulator instead of keeping both weights resident.
    tm, mp = _row_tiling(m, row_bytes=8 * d + 6 * f)
    out = pl.pallas_call(
        _ffn_res_ln_kernel,
        grid=(mp // tm,),
        in_specs=[pl.BlockSpec((tm, d), lambda i: (i, 0)),
                  _const_spec((d, f)),
                  _const_spec((1, f)),
                  _const_spec((f, d)),
                  _const_spec((1, d)),
                  _const_spec((1, d)),
                  _const_spec((1, d))],
        out_specs=pl.BlockSpec((tm, d), lambda i: (i, 0)),
        out_shape=jax.ShapeDtypeStruct((mp, d), jnp.bfloat16),
        compiler_params=_cparams(1),
    )(_pad_rows(x, mp), w1, b1, w2, b2, gamma, beta)
    return out[:m]


# ---------------------------------------------------------------------------
# Final Linear + log_softmax (fused for small V, vocab-tiled two-pass for large V)
# ---------------------------------------------------------------------------

def _fc_logsoftmax_kernel(x_ref, w_ref, b_ref, o_ref):
    logits = jnp.dot(x_ref[...], w_ref[...], preferred_element_type=jnp.float32) + b_ref[...]
    z = logits - jnp.max(logits, axis=-1, keepdims=True)
    o_ref[...] = z - jnp.log(jnp.sum(jnp.exp(z), axis=-1, keepdims=True))


def _fc_logits_lse_kernel(x_ref, w_ref, b_ref, logits_ref, lse_ref, m_sc, l_sc):
    j = pl.program_id(1)

    @pl.when(j == 0)
    def _():
        m_sc[...] = jnp.full(m_sc.shape, -jnp.inf, jnp.float32)
        l_sc[...] = jnp.zeros(l_sc.shape, jnp.float32)

    logits = jnp.dot(x_ref[...], w_ref[...], preferred_element_type=jnp.float32) + b_ref[...]
    logits_ref[...] = logits
    m_prev = m_sc[...]
    m_new = jnp.maximum(m_prev, jnp.max(logits, axis=-1, keepdims=True))
    l_sc[...] = (l_sc[...] * jnp.exp(m_prev - m_new)
                 + jnp.sum(jnp.exp(logits - m_new), axis=-1, keepdims=True))
    m_sc[...] = m_new

    @pl.when(j == pl.num_programs(1) - 1)
    def _():
        lse_ref[...] = m_sc[...] + jnp.log(l_sc[...])


def _sub_lse_kernel(logits_ref, lse_ref, o_ref):
    o_ref[...] = logits_ref[...] - lse_ref[...]


def fc_logsoftmax_op(x, w, b, force_tiled=False, tv=512):
    """Fused final Linear + log_softmax(dim=-1); vocab-tiled online-LSE path for large V."""
    m, d = x.shape
    v = w.shape[1]
    tm, mp = _row_tiling(m, row_bytes=2 * d + 8 * min(v, tv))
    x_p = _pad_rows(x, mp)

    w_bufs = 1 if _buffered_ok() else 2
    fused_bytes = w_bufs * (d * v * 2 + v * 4) + 2 * (tm * d * 2) + 2 * (tm * v * 4)
    if not force_tiled and fused_bytes <= (_VMEM_LIMIT * 2) // 3:
        out = pl.pallas_call(
            _fc_logsoftmax_kernel,
            grid=(mp // tm,),
            in_specs=[pl.BlockSpec((tm, d), lambda i: (i, 0)),
                      _const_spec((d, v)),
                      _const_spec((1, v))],
            out_specs=pl.BlockSpec((tm, v), lambda i: (i, 0)),
            out_shape=jax.ShapeDtypeStruct((mp, v), jnp.float32),
            compiler_params=_cparams(1),
        )(x_p, w, b)
        return out[:m]

    # --- vocab-tiled two-pass path: (1) logits + online logsumexp, (2) normalize ---
    tvv = _round_up(min(tv, _round_up(v, 128)), 128)
    vp = _round_up(v, tvv)
    if vp != v:
        w = jnp.pad(w, ((0, 0), (0, vp - v)))
        b = jnp.pad(b, ((0, 0), (0, vp - v)), constant_values=-1e30)
    nm, nv = mp // tm, vp // tvv

    logits, lse = pl.pallas_call(
        _fc_logits_lse_kernel,
        grid=(nm, nv),
        in_specs=[pl.BlockSpec((tm, d), lambda i, j: (i, 0)),
                  pl.BlockSpec((d, tvv), lambda i, j: (0, j)),
                  pl.BlockSpec((1, tvv), lambda i, j: (0, j))],
        out_specs=[pl.BlockSpec((tm, tvv), lambda i, j: (i, j)),
                   pl.BlockSpec((tm, 1), lambda i, j: (i, 0))],
        out_shape=[jax.ShapeDtypeStruct((mp, vp), jnp.float32),
                   jax.ShapeDtypeStruct((mp, 1), jnp.float32)],
        scratch_shapes=[pltpu.VMEM((tm, 1), jnp.float32),
                        pltpu.VMEM((tm, 1), jnp.float32)],
        compiler_params=_cparams(2, semantics=("parallel", "arbitrary")),
    )(x_p, w, b)

    out = pl.pallas_call(
        _sub_lse_kernel,
        grid=(nm, nv),
        in_specs=[pl.BlockSpec((tm, tvv), lambda i, j: (i, j)),
                  pl.BlockSpec((tm, 1), lambda i, j: (i, 0))],
        out_specs=pl.BlockSpec((tm, tvv), lambda i, j: (i, j)),
        out_shape=jax.ShapeDtypeStruct((mp, vp), jnp.float32),
        compiler_params=_cparams(2),
    )(logits, lse)
    return out[:m, :v]


# ---------------------------------------------------------------------------
# Attention: fused projection + multi-head attention, one batch element per grid step
# ---------------------------------------------------------------------------

def _multihead_attention(q2d, k2d, v2d, mask2d, H, scale, exact_softmax, batched, need_probs):
    """q2d (Sq,D) / k2d,v2d (Sk,D) bf16; mask2d (1|Sq, Sk) f32 additive.
    Returns (out (Sq,D) f32, probs (H,Sq,Sk) f32 or None)."""
    sq, d = q2d.shape
    sk = k2d.shape[0]
    dh = d // H

    def _softmax(s):
        s = s - jnp.max(s, axis=-1, keepdims=True)
        p = jnp.exp(s)
        den = jnp.sum(p, axis=-1, keepdims=True)
        return p / den if exact_softmax else p * pl.reciprocal(den, approx=True)

    if batched:
        q = q2d.reshape(sq, H, dh).transpose(1, 0, 2)      # (H, Sq, Dh)
        k = k2d.reshape(sk, H, dh).transpose(1, 0, 2)
        v = v2d.reshape(sk, H, dh).transpose(1, 0, 2)
        s = jnp.einsum("hqd,hkd->hqk", q, k, preferred_element_type=jnp.float32)
        p = _softmax(s * scale + mask2d[None, :, :])
        o = jnp.einsum("hqk,hkd->hqd", p.astype(jnp.bfloat16), v,
                       preferred_element_type=jnp.float32)
        return o.transpose(1, 0, 2).reshape(sq, d), (p if need_probs else None)

    # Fallback (if the batched form does not lower here): per-head loop, but still a single
    # lane-dense output store via one concatenate.
    outs, probs = [], []
    for i in range(H):
        sl = slice(i * dh, (i + 1) * dh)
        s = jax.lax.dot_general(q2d[:, sl], k2d[:, sl], (((1,), (1,)), ((), ())),
                                preferred_element_type=jnp.float32)
        p = _softmax(s * scale + mask2d)
        outs.append(jnp.dot(p.astype(jnp.bfloat16), v2d[:, sl],
                            preferred_element_type=jnp.float32))
        if need_probs:
            probs.append(p[None])
    o = jnp.concatenate(outs, axis=-1)
    return o, (jnp.concatenate(probs, axis=0) if need_probs else None)


def _self_attn_kernel(x_ref, w_ref, b_ref, m_ref, o_ref, *, H, scale, batched):
    d = x_ref.shape[-1]
    qkv = (jnp.dot(x_ref[0], w_ref[...], preferred_element_type=jnp.float32)
           + b_ref[...]).astype(jnp.bfloat16)
    o, _ = _multihead_attention(qkv[:, :d], qkv[:, d:2 * d], qkv[:, 2 * d:],
                                m_ref[0], H, scale,
                                exact_softmax=False, batched=batched, need_probs=False)
    o_ref[0] = o.astype(o_ref.dtype)


def _cross_attn_kernel(y_ref, e_ref, wq_ref, bq_ref, wkv_ref, bkv_ref, m_ref,
                       o_ref, a_ref=None, *, H, scale, batched):
    d = y_ref.shape[-1]
    q = (jnp.dot(y_ref[0], wq_ref[...], preferred_element_type=jnp.float32)
         + bq_ref[...]).astype(jnp.bfloat16)
    kv = (jnp.dot(e_ref[0], wkv_ref[...], preferred_element_type=jnp.float32)
          + bkv_ref[...]).astype(jnp.bfloat16)
    need_probs = a_ref is not None
    o, p = _multihead_attention(q, kv[:, :d], kv[:, d:], m_ref[0], H, scale,
                                exact_softmax=need_probs, batched=batched,
                                need_probs=need_probs)
    o_ref[0] = o.astype(o_ref.dtype)
    if need_probs:
        a_ref[0] = p


def _mask_spec(mask):
    # Un-expanded additive mask (B or 1, Sq or 1, Sk); broadcast over heads/rows in-kernel.
    mb, mq, mk = mask.shape
    if mb == 1:
        return pl.BlockSpec((1, mq, mk), lambda b: (0, 0, 0))
    return pl.BlockSpec((1, mq, mk), lambda b: (b, 0, 0))


def self_attention_op(x, w_qkv, b_qkv, mask, h):
    """x: (B,S,D) bf16. Fused QKV projection + MHA. mask broadcastable to (B,S,S)."""
    b, s, d = x.shape
    # TODO(synk): for long sequences, also tile queries flash-style ((B, q_blocks) grid).
    batched = _batched_heads_ok(s, s, d, h)
    kern = functools.partial(_self_attn_kernel, H=h, scale=1.0 / math.sqrt(d // h),
                             batched=batched)
    return pl.pallas_call(
        kern,
        grid=(b,),
        in_specs=[pl.BlockSpec((1, s, d), lambda i: (i, 0, 0)),
                  _const_spec((d, 3 * d)),
                  _const_spec((1, 3 * d)),
                  _mask_spec(mask)],
        out_specs=pl.BlockSpec((1, s, d), lambda i: (i, 0, 0)),
        out_shape=jax.ShapeDtypeStruct((b, s, d), jnp.bfloat16),
        compiler_params=_cparams(1),
    )(x, w_qkv, b_qkv, mask)


def cross_attention_op(y, enc, wq, bq, wkv, bkv, mask, h, need_att):
    """y: (B,Sq,D) bf16, enc: (B,Sk,D) bf16. Fused q / kv projections + MHA."""
    b, sq, d = y.shape
    sk = enc.shape[1]
    batched = _batched_heads_ok(sq, sk, d, h)
    kern = functools.partial(_cross_attn_kernel, H=h, scale=1.0 / math.sqrt(d // h),
                             batched=batched)
    in_specs = [pl.BlockSpec((1, sq, d), lambda i: (i, 0, 0)),
                pl.BlockSpec((1, sk, d), lambda i: (i, 0, 0)),
                _const_spec((d, d)),
                _const_spec((1, d)),
                _const_spec((d, 2 * d)),
                _const_spec((1, 2 * d)),
                _mask_spec(mask)]
    out_specs = [pl.BlockSpec((1, sq, d), lambda i: (i, 0, 0))]
    out_shape = [jax.ShapeDtypeStruct((b, sq, d), jnp.bfloat16)]
    if need_att:
        out_specs.append(pl.BlockSpec((1, h, sq, sk), lambda i: (i, 0, 0, 0)))
        out_shape.append(jax.ShapeDtypeStruct((b, h, sq, sk), jnp.float32))
    res = pl.pallas_call(
        kern,
        grid=(b,),
        in_specs=in_specs,
        out_specs=out_specs,
        out_shape=out_shape,
        compiler_params=_cparams(1),
    )(y, enc, wq, bq, wkv, bkv, mask)
    return (res[0], res[1]) if need_att else (res[0], None)


# ---------------------------------------------------------------------------
# Layers (plain-JAX glue is only free reshapes between 2-D row slabs and (B,S,*))
# ---------------------------------------------------------------------------

def encoder_layer(p, x2d, mask, B, S, h):
    d = x2d.shape[1]
    attn = self_attention_op(x2d.reshape(B, S, d), p["w_qkv"], p["b_qkv"], mask, h)
    x2d = proj_res_ln_op(attn.reshape(B * S, d), p["wo"], p["bo"], x2d,
                         p["ln1_g"], p["ln1_b"])
    x2d = ffn_res_ln_op(x2d, p["w1"], p["b1"], p["w2"], p["b2"], p["ln2_g"], p["ln2_b"])
    return x2d


def decoder_layer(p, y2d, enc3d, self_mask, cross_mask, B, Sd, h, need_att):
    d = y2d.shape[1]
    attn = self_attention_op(y2d.reshape(B, Sd, d), p["w_qkv"], p["b_qkv"], self_mask, h)
    y2d = proj_res_ln_op(attn.reshape(B * Sd, d), p["wo_self"], p["bo_self"], y2d,
                         p["ln1_g"], p["ln1_b"])
    cross, att = cross_attention_op(y2d.reshape(B, Sd, d), enc3d,
                                    p["wq"], p["bq"], p["w_kv"], p["b_kv"],
                                    cross_mask, h, need_att)
    y2d = proj_res_ln_op(cross.reshape(B * Sd, d), p["wo_cross"], p["bo_cross"], y2d,
                         p["ln2_g"], p["ln2_b"])
    y2d = ffn_res_ln_op(y2d, p["w1"], p["b1"], p["w2"], p["b2"], p["ln3_g"], p["ln3_b"])
    return y2d, att


def transformer_forward(params, enc_inp, dec_inp, enc_mask, dec_mask, *, h):
    """Mirrors Transformer.forward: returns (log_softmax(fc(decoder_out)), att)."""
    B, Se, D = enc_inp.shape
    Sd = dec_inp.shape[1]

    x2d = enc_inp.astype(jnp.bfloat16).reshape(B * Se, D)
    for lp in params["encoder"]:
        x2d = encoder_layer(lp, x2d, enc_mask, B, Se, h)
    enc3d = x2d.reshape(B, Se, D)

    y2d = dec_inp.astype(jnp.bfloat16).reshape(B * Sd, D)
    att = None
    n_dec = len(params["decoder"])
    for li, lp in enumerate(params["decoder"]):
        y2d, a = decoder_layer(lp, y2d, enc3d, dec_mask, enc_mask, B, Sd, h,
                               need_att=(li == n_dec - 1))
        if a is not None:
            att = a

    logp = fc_logsoftmax_op(y2d, params["fc_w"], params["fc_b"])
    return logp.reshape(B, Sd, -1), att


# ---------------------------------------------------------------------------
# Pure-JAX (f32) reference of the same forward pass (for validation)
# ---------------------------------------------------------------------------

def _reference_forward(params, enc_inp, dec_inp, enc_mask, dec_mask, *, h):
    f32 = lambda t: t.astype(jnp.float32)

    def ln(x, g, b):
        mu = x.mean(-1, keepdims=True)
        xc = x - mu
        return xc * jax.lax.rsqrt((xc * xc).mean(-1, keepdims=True) + 1e-5) * g + b

    def attn(q, k, v, mask, nh):
        B, sq, d = q.shape
        sk = k.shape[1]
        dh = d // nh
        qh = q.reshape(B, sq, nh, dh).transpose(0, 2, 1, 3)
        kh = k.reshape(B, sk, nh, dh).transpose(0, 2, 1, 3)
        vh = v.reshape(B, sk, nh, dh).transpose(0, 2, 1, 3)
        s = jnp.einsum("bhqd,bhkd->bhqk", qh, kh) / math.sqrt(dh) + mask[:, None]
        p = jax.nn.softmax(s, axis=-1)
        o = jnp.einsum("bhqk,bhkd->bhqd", p, vh).transpose(0, 2, 1, 3).reshape(B, sq, d)
        return o, p

    x = enc_inp
    D = x.shape[-1]
    for lp in params["encoder"]:
        qkv = x @ f32(lp["w_qkv"]) + lp["b_qkv"]
        o, _ = attn(qkv[..., :D], qkv[..., D:2 * D], qkv[..., 2 * D:], enc_mask, h)
        x = ln(x + o @ f32(lp["wo"]) + lp["bo"], lp["ln1_g"], lp["ln1_b"])
        hid = jnp.maximum(x @ f32(lp["w1"]) + lp["b1"], 0.0)
        x = ln(x + hid @ f32(lp["w2"]) + lp["b2"], lp["ln2_g"], lp["ln2_b"])
    enc = x

    y = dec_inp
    att = None
    for lp in params["decoder"]:
        qkv = y @ f32(lp["w_qkv"]) + lp["b_qkv"]
        o, _ = attn(qkv[..., :D], qkv[..., D:2 * D], qkv[..., 2 * D:], dec_mask, h)
        y = ln(y + o @ f32(lp["wo_self"]) + lp["bo_self"], lp["ln1_g"], lp["ln1_b"])
        q = y @ f32(lp["wq"]) + lp["bq"]
        kv = enc @ f32(lp["w_kv"]) + lp["b_kv"]
        o, att = attn(q, kv[..., :D], kv[..., D:], enc_mask, h)
        y = ln(y + o @ f32(lp["wo_cross"]) + lp["bo_cross"], lp["ln2_g"], lp["ln2_b"])
        hid = jnp.maximum(y @ f32(lp["w1"]) + lp["b1"], 0.0)
        y = ln(y + hid @ f32(lp["w2"]) + lp["b2"], lp["ln3_g"], lp["ln3_b"])

    logits = y @ f32(params["fc_w"]) + params["fc_b"]
    return jax.nn.log_softmax(logits, axis=-1), att


# ---------------------------------------------------------------------------
# Deterministic parameter init (matmul weights bf16, biases / LN params f32)
# ---------------------------------------------------------------------------

def _init_w(key, d_in, d_out):
    return (jax.random.normal(key, (d_in, d_out), jnp.float32) * 0.02).astype(jnp.bfloat16)


def init_params(key, n_enc, n_dec, d_model, d_ff, voc_size):
    keys = jax.random.split(key, n_enc + n_dec + 1)

    def ln_pair():
        return jnp.ones((1, d_model), jnp.float32), jnp.zeros((1, d_model), jnp.float32)

    enc = []
    for i in range(n_enc):
        k = jax.random.split(keys[i], 4)
        lg1, lb1 = ln_pair()
        lg2, lb2 = ln_pair()
        enc.append(dict(
            w_qkv=_init_w(k[0], d_model, 3 * d_model),
            b_qkv=jnp.zeros((1, 3 * d_model), jnp.float32),
            wo=_init_w(k[1], d_model, d_model), bo=jnp.zeros((1, d_model), jnp.float32),
            ln1_g=lg1, ln1_b=lb1,
            w1=_init_w(k[2], d_model, d_ff), b1=jnp.zeros((1, d_ff), jnp.float32),
            w2=_init_w(k[3], d_ff, d_model), b2=jnp.zeros((1, d_model), jnp.float32),
            ln2_g=lg2, ln2_b=lb2,
        ))
    dec = []
    for i in range(n_dec):
        k = jax.random.split(keys[n_enc + i], 7)
        lg1, lb1 = ln_pair()
        lg2, lb2 = ln_pair()
        lg3, lb3 = ln_pair()
        dec.append(dict(
            w_qkv=_init_w(k[0], d_model, 3 * d_model),
            b_qkv=jnp.zeros((1, 3 * d_model), jnp.float32),
            wo_self=_init_w(k[1], d_model, d_model),
            bo_self=jnp.zeros((1, d_model), jnp.float32),
            ln1_g=lg1, ln1_b=lb1,
            wq=_init_w(k[2], d_model, d_model), bq=jnp.zeros((1, d_model), jnp.float32),
            w_kv=_init_w(k[3], d_model, 2 * d_model),
            b_kv=jnp.zeros((1, 2 * d_model), jnp.float32),
            wo_cross=_init_w(k[4], d_model, d_model),
            bo_cross=jnp.zeros((1, d_model), jnp.float32),
            ln2_g=lg2, ln2_b=lb2,
            w1=_init_w(k[5], d_model, d_ff), b1=jnp.zeros((1, d_ff), jnp.float32),
            w2=_init_w(k[6], d_ff, d_model), b2=jnp.zeros((1, d_model), jnp.float32),
            ln3_g=lg3, ln3_b=lb3,
        ))
    fc_w = _init_w(keys[-1], d_model, voc_size)
    fc_b = jnp.zeros((1, voc_size), jnp.float32)
    return dict(encoder=enc, decoder=dec, fc_w=fc_w, fc_b=fc_b)


# ---------------------------------------------------------------------------
# Main
# ---------------------------------------------------------------------------

if __name__ == "__main__":
    B, S_ENC, S_DEC = 2, 8, 8
    D_MODEL, H, D_FF = 32, 4, 64
    N_ENC, N_DEC = 2, 2
    VOC = 64

    key = jax.random.PRNGKey(0)
    kp, ke, kd = jax.random.split(key, 3)
    params = init_params(kp, N_ENC, N_DEC, D_MODEL, D_FF, VOC)

    enc_inp = jax.random.normal(ke, (B, S_ENC, D_MODEL), jnp.float32)
    dec_inp = jax.random.normal(kd, (B, S_DEC, D_MODEL), jnp.float32)

    # Encoder padding mask: last two positions of batch 1 masked. Additive (B, 1, S_enc).
    valid = jnp.ones((B, S_ENC), jnp.float32).at[1, -2:].set(0.0)
    enc_mask_add = jnp.where(valid[:, None, :] > 0, 0.0, -1e9).astype(jnp.float32)
    # Decoder causal mask, additive (1, S_dec, S_dec); broadcast over batch in-kernel.
    causal = jnp.tril(jnp.ones((S_DEC, S_DEC), jnp.float32))
    dec_mask_add = jnp.where(causal[None, :, :] > 0, 0.0, -1e9).astype(jnp.float32)

    # Warm capability probes eagerly (outside jit) so spec construction is deterministic.
    _buffered_ok()
    for (sq, sk) in {(S_ENC, S_ENC), (S_DEC, S_DEC), (S_DEC, S_ENC)}:
        _batched_heads_ok(sq, sk, D_MODEL, H)

    fwd = jax.jit(functools.partial(transformer_forward, h=H))
    log_probs, att = fwd(params, enc_inp, dec_inp, enc_mask_add, dec_mask_add)
    jax.block_until_ready((log_probs, att))

    assert log_probs.shape == (B, S_DEC, VOC)
    assert att.shape == (B, H, S_DEC, S_ENC)
    assert jnp.allclose(jnp.exp(log_probs).sum(-1), 1.0, atol=1e-4)
    assert jnp.allclose(att.sum(-1), 1.0, atol=1e-3)

    # Cross-check against a pure-JAX f32 reference of the same forward (bf16 tolerance).
    ref_lp, ref_att = jax.jit(functools.partial(_reference_forward, h=H))(
        params, enc_inp, dec_inp, enc_mask_add, dec_mask_add)
    assert jnp.allclose(log_probs, ref_lp, atol=0.15), float(jnp.max(jnp.abs(log_probs - ref_lp)))
    assert jnp.allclose(att, ref_att, atol=0.05), float(jnp.max(jnp.abs(att - ref_att)))

    # Exercise the vocab-tiled two-pass log-softmax path (used at production vocab sizes).
    kx, kw = jax.random.split(jax.random.PRNGKey(1))
    xt = jax.random.normal(kx, (16, D_MODEL), jnp.float32).astype(jnp.bfloat16)
    wt = (jax.random.normal(kw, (D_MODEL, 256), jnp.float32) * 0.02).astype(jnp.bfloat16)
    bt = jnp.zeros((1, 256), jnp.float32)
    tiled = fc_logsoftmax_op(xt, wt, bt, force_tiled=True, tv=128)
    ref_t = jax.nn.log_softmax(
        jnp.dot(xt.astype(jnp.float32), wt.astype(jnp.float32)) + bt, axis=-1)
    assert tiled.shape == (16, 256)
    assert jnp.allclose(tiled, ref_t, atol=3e-2)
    assert jnp.allclose(jnp.exp(tiled).sum(-1), 1.0, atol=1e-4)

    print("KERNEL_OK")
</pallas_src>

<mosaic_0001>
module attributes {stable_mosaic.version = 11 : i64} {
  func.func @k(%arg0: i32, %arg1: memref<8x128xf32, #tpu.memory_space<vmem>>, %arg2: memref<8x128xf32, #tpu.memory_space<vmem>>, %arg3: memref<8x128xf32, #tpu.memory_space<vmem>>) attributes {dimension_semantics = [#tpu.dimension_semantics<arbitrary>], iteration_bounds = array<i64: 2>, scalar_prefetch = 0 : i64, scratch_operands = 0 : i64, tpu.core_type = #tpu.core_type<tc>, window_params = [{transform_indices = @transform_0, window_bounds = array<i64: 8, 128>}, {pipeline_mode = #tpu.pipeline_mode<synchronous>, transform_indices = @transform_1, window_bounds = array<i64: 8, 128>}, {transform_indices = @transform_2, window_bounds = array<i64: 8, 128>}]} {
    %c0 = arith.constant 0 : index
    %c0_0 = arith.constant 0 : index
    %0 = vector.load %arg1[%c0, %c0_0] : memref<8x128xf32, #tpu.memory_space<vmem>>, vector<8x128xf32>
    %c0_1 = arith.constant 0 : index
    %c0_2 = arith.constant 0 : index
    %1 = vector.load %arg2[%c0_1, %c0_2] : memref<8x128xf32, #tpu.memory_space<vmem>>, vector<8x128xf32>
    %2 = arith.addf %0, %1 : vector<8x128xf32>
    %c0_3 = arith.constant 0 : index
    %c0_4 = arith.constant 0 : index
    %3 = vector.load %arg3[%c0_3, %c0_4] : memref<8x128xf32, #tpu.memory_space<vmem>>, vector<8x128xf32>
    tpu.vector_store %arg3[%c0_3, %c0_4], %2 {strides = array<i32>} : memref<8x128xf32, #tpu.memory_space<vmem>>, vector<8x128xf32>,
    return
  }
  func.func @transform_0(%arg0: i32) -> (i32, i32) {
    %c0_i32 = arith.constant 0 : i32
    %c0_i32_0 = arith.constant 0 : i32
    return %arg0, %c0_i32 : i32, i32
  }
  func.func @transform_1(%arg0: i32) -> (i32, i32) {
    %c0_i32 = arith.constant 0 : i32
    %c0_i32_0 = arith.constant 0 : i32
    %c0_i32_1 = arith.constant 0 : i32
    return %c0_i32, %c0_i32_0 : i32, i32
  }
  func.func @transform_2(%arg0: i32) -> (i32, i32) {
    %c0_i32 = arith.constant 0 : i32
    %c0_i32_0 = arith.constant 0 : i32
    return %arg0, %c0_i32 : i32, i32
  }
}

module attributes {stable_mosaic.version = 11 : i64} {
  func.func @k(%arg0: memref<8x32xbf16, #tpu.memory_space<vmem>>, %arg1: memref<8x64xbf16, #tpu.memory_space<vmem>>, %arg2: memref<8x32xbf16, #tpu.memory_space<vmem>>) attributes {dimension_semantics = [], scalar_prefetch = 0 : i64, scratch_operands = 0 : i64, tpu.core_type = #tpu.core_type<tc>} {
    %c0 = arith.constant 0 : index
    %c0_0 = arith.constant 0 : index
    %0 = vector.load %arg1[%c0, %c0_0] : memref<8x64xbf16, #tpu.memory_space<vmem>>, vector<8x64xbf16>
    %c0_1 = arith.constant 0 : index
    %c0_2 = arith.constant 0 : index
    %1 = vector.load %arg0[%c0_1, %c0_2] : memref<8x32xbf16, #tpu.memory_space<vmem>>, vector<8x32xbf16>
    %2 = vector.shape_cast %1 : vector<8x32xbf16> to vector<8x4x8xbf16>
    %3 = tpu.transpose %2, [1, 0, 2] : vector<8x4x8xbf16> -> vector<4x8x8xbf16>
    %4 = vector.extract_strided_slice %0 {offsets = [0, 0], sizes = [8, 32], strides = [1, 1]} : vector<8x64xbf16> to vector<8x32xbf16>
    %5 = vector.shape_cast %4 : vector<8x32xbf16> to vector<8x4x8xbf16>
    %6 = tpu.transpose %5, [1, 0, 2] : vector<8x4x8xbf16> -> vector<4x8x8xbf16>
    %7 = vector.extract_strided_slice %0 {offsets = [0, 32], sizes = [8, 32], strides = [1, 1]} : vector<8x64xbf16> to vector<8x32xbf16>
    %8 = vector.shape_cast %7 : vector<8x32xbf16> to vector<8x4x8xbf16>
    %9 = tpu.transpose %8, [1, 0, 2] : vector<8x4x8xbf16> -> vector<4x8x8xbf16>
    "tpu.trace_start"() <{level = 10 : i32, message = "hqd,hkd->hqk"}> : () -> ()
    %cst = arith.constant dense<0.000000e+00> : vector<4x8x8xf32>
    %10 = tpu.matmul %3, %6, %cst {dimension_numbers = #tpu.dot_dimension_numbers<[2], [2], [1], [1], [0, 0, 0, 1, 1, 1], [0], [0]>} : vector<4x8x8xbf16>, vector<4x8x8xbf16>, vector<4x8x8xf32> -> vector<4x8x8xf32>
    "tpu.trace_stop"() : () -> ()
    %cst_3 = arith.constant dense<0xFF800000> : vector<4x8xf32>
    %11 = vector.multi_reduction <maximumf>, %10, %cst_3 [2] : vector<4x8x8xf32> to vector<4x8xf32>
    %12 = vector.shape_cast %11 : vector<4x8xf32> to vector<4x8x1xf32>
    %13 = vector.broadcast %12 : vector<4x8x1xf32> to vector<4x8x8xf32>
    %14 = arith.subf %10, %13 : vector<4x8x8xf32>
    %15 = math.exp %14 : vector<4x8x8xf32>
    %16 = arith.truncf %15 : vector<4x8x8xf32> to vector<4x8x8xbf16>
    "tpu.trace_start"() <{level = 10 : i32, message = "hqk,hkd->hqd"}> : () -> ()
    %cst_4 = arith.constant dense<0.000000e+00> : vector<4x8x8xf32>
    %17 = tpu.matmul %16, %9, %cst_4 {dimension_numbers = #tpu.dot_dimension_numbers<[2], [1], [1], [2], [0, 0, 0, 1, 1, 2], [0], [0]>} : vector<4x8x8xbf16>, vector<4x8x8xbf16>, vector<4x8x8xf32> -> vector<4x8x8xf32>
    "tpu.trace_stop"() : () -> ()
    %18 = tpu.transpose %17, [1, 0, 2] : vector<4x8x8xf32> -> vector<8x4x8xf32>
    %19 = vector.shape_cast %18 : vector<8x4x8xf32> to vector<8x32xf32>
    %20 = arith.truncf %19 : vector<8x32xf32> to vector<8x32xbf16>
    %c0_5 = arith.constant 0 : index
    %c0_6 = arith.constant 0 : index
    %21 = vector.load %arg2[%c0_5, %c0_6] : memref<8x32xbf16, #tpu.memory_space<vmem>>, vector<8x32xbf16>
    tpu.vector_store %arg2[%c0_5, %c0_6], %20 {strides = array<i32>} : memref<8x32xbf16, #tpu.memory_space<vmem>>, vector<8x32xbf16>,
    return
  }
}

module attributes {stable_mosaic.version = 11 : i64} {
  func.func @_self_attn_kernel(%arg0: i32, %arg1: memref<1x8x32xbf16, #tpu.memory_space<vmem>>, %arg2: memref<32x96xbf16, #tpu.memory_space<vmem>>, %arg3: memref<1x96xf32, #tpu.memory_space<vmem>>, %arg4: memref<1x1x8xf32, #tpu.memory_space<vmem>>, %arg5: memref<1x8x32xbf16, #tpu.memory_space<vmem>>) attributes {dimension_semantics = [#tpu.dimension_semantics<parallel>], iteration_bounds = array<i64: 2>, scalar_prefetch = 0 : i64, scratch_operands = 0 : i64, tpu.core_type = #tpu.core_type<tc>, window_params = [{transform_indices = @transform_0, window_bounds = array<i64: 1, 8, 32>}, {pipeline_mode = #tpu.pipeline_mode<synchronous>, transform_indices = @transform_1, window_bounds = array<i64: 32, 96>}, {pipeline_mode = #tpu.pipeline_mode<synchronous>, transform_indices = @transform_2, window_bounds = array<i64: 1, 96>}, {transform_indices = @transform_3, window_bounds = array<i64: 1, 1, 8>}, {transform_indices = @transform_4, window_bounds = array<i64: 1, 8, 32>}]} {
    %c0 = arith.constant 0 : index
    %c0_0 = arith.constant 0 : index
    %c0_1 = arith.constant 0 : index
    %0 = vector.load %arg1[%c0, %c0_0, %c0_1] : memref<1x8x32xbf16, #tpu.memory_space<vmem>>, vector<1x8x32xbf16>
    %1 = vector.shape_cast %0 : vector<1x8x32xbf16> to vector<8x32xbf16>
    %c0_2 = arith.constant 0 : index
    %c0_3 = arith.constant 0 : index
    %2 = vector.load %arg2[%c0_2, %c0_3] : memref<32x96xbf16, #tpu.memory_space<vmem>>, vector<32x96xbf16>
    %cst = arith.constant dense<0.000000e+00> : vector<8x96xf32>
    %3 = tpu.matmul %1, %2, %cst {dimension_numbers = #tpu.dot_dimension_numbers<[1], [0], [0], [1], [0, 0, 1, 1], [], []>} : vector<8x32xbf16>, vector<32x96xbf16>, vector<8x96xf32> -> vector<8x96xf32>
    %c0_4 = arith.constant 0 : index
    %c0_5 = arith.constant 0 : index
    %4 = vector.load %arg3[%c0_4, %c0_5] : memref<1x96xf32, #tpu.memory_space<vmem>>, vector<1x96xf32>
    %5 = vector.broadcast %4 : vector<1x96xf32> to vector<8x96xf32>
    %6 = arith.addf %3, %5 : vector<8x96xf32>
    %7 = arith.truncf %6 : vector<8x96xf32> to vector<8x96xbf16>
    %8 = vector.extract_strided_slice %7 {offsets = [0, 0], sizes = [8, 32], strides = [1, 1]} : vector<8x96xbf16> to vector<8x32xbf16>
    %9 = vector.extract_strided_slice %7 {offsets = [0, 32], sizes = [8, 32], strides = [1, 1]} : vector<8x96xbf16> to vector<8x32xbf16>
    %10 = vector.extract_strided_slice %7 {offsets = [0, 64], sizes = [8, 32], strides = [1, 1]} : vector<8x96xbf16> to vector<8x32xbf16>
    %c0_6 = arith.constant 0 : index
    %c0_7 = arith.constant 0 : index
    %c0_8 = arith.constant 0 : index
    %11 = vector.load %arg4[%c0_6, %c0_7, %c0_8] : memref<1x1x8xf32, #tpu.memory_space<vmem>>, vector<1x1x8xf32>
    %12 = vector.shape_cast %11 : vector<1x1x8xf32> to vector<1x8xf32>
    %13 = vector.extract_strided_slice %8 {offsets = [0, 0], sizes = [8, 8], strides = [1, 1]} : vector<8x32xbf16> to vector<8x8xbf16>
    %14 = vector.extract_strided_slice %9 {offsets = [0, 0], sizes = [8, 8], strides = [1, 1]} : vector<8x32xbf16> to vector<8x8xbf16>
    %cst_9 = arith.constant dense<0.000000e+00> : vector<8x8xf32>
    %15 = tpu.matmul %13, %14, %cst_9 {dimension_numbers = #tpu.dot_dimension_numbers<[1], [1], [0], [0], [0, 0, 1, 0], [], []>} : vector<8x8xbf16>, vector<8x8xbf16>, vector<8x8xf32> -> vector<8x8xf32>
    %cst_10 = arith.constant 0.353553385 : f32
    %16 = vector.broadcast %cst_10 : f32 to vector<8x8xf32>
    %17 = arith.mulf %15, %16 : vector<8x8xf32>
    %18 = vector.broadcast %12 : vector<1x8xf32> to vector<8x8xf32>
    %19 = arith.addf %17, %18 : vector<8x8xf32>
    %cst_11 = arith.constant dense<0xFF800000> : vector<8xf32>
    %20 = vector.multi_reduction <maximumf>, %19, %cst_11 [1] : vector<8x8xf32> to vector<8xf32>
    %21 = vector.shape_cast %20 : vector<8xf32> to vector<8x1xf32>
    %22 = vector.broadcast %21 : vector<8x1xf32> to vector<8x8xf32>
    %23 = arith.subf %19, %22 : vector<8x8xf32>
    %24 = math.exp %23 : vector<8x8xf32>
    %cst_12 = arith.constant dense<0.000000e+00> : vector<8xf32>
    %25 = vector.multi_reduction <add>, %24, %cst_12 [1] : vector<8x8xf32> to vector<8xf32>
    %26 = vector.shape_cast %25 : vector<8xf32> to vector<8x1xf32>
    %27 = tpu.reciprocal %26 {approx = true} : vector<8x1xf32> -> vector<8x1xf32>
    %28 = vector.broadcast %27 : vector<8x1xf32> to vector<8x8xf32>
    %29 = arith.mulf %24, %28 : vector<8x8xf32>
    %30 = arith.truncf %29 : vector<8x8xf32> to vector<8x8xbf16>
    %31 = vector.extract_strided_slice %10 {offsets = [0, 0], sizes = [8, 8], strides = [1, 1]} : vector<8x32xbf16> to vector<8x8xbf16>
    %cst_13 = arith.constant dense<0.000000e+00> : vector<8x8xf32>
    %32 = tpu.matmul %30, %31, %cst_13 {dimension_numbers = #tpu.dot_dimension_numbers<[1], [0], [0], [1], [0, 0, 1, 1], [], []>} : vector<8x8xbf16>, vector<8x8xbf16>, vector<8x8xf32> -> vector<8x8xf32>
    %33 = vector.extract_strided_slice %8 {offsets = [0, 8], sizes = [8, 8], strides = [1, 1]} : vector<8x32xbf16> to vector<8x8xbf16>
    %34 = vector.extract_strided_slice %9 {offsets = [0, 8], sizes = [8, 8], strides = [1, 1]} : vector<8x32xbf16> to vector<8x8xbf16>
    %cst_14 = arith.constant dense<0.000000e+00> : vector<8x8xf32>
    %35 = tpu.matmul %33, %34, %cst_14 {dimension_numbers = #tpu.dot_dimension_numbers<[1], [1], [0], [0], [0, 0, 1, 0], [], []>} : vector<8x8xbf16>, vector<8x8xbf16>, vector<8x8xf32> -> vector<8x8xf32>
    %cst_15 = arith.constant 0.353553385 : f32
    %36 = vector.broadcast %cst_15 : f32 to vector<8x8xf32>
    %37 = arith.mulf %35, %36 : vector<8x8xf32>
    %38 = vector.broadcast %12 : vector<1x8xf32> to vector<8x8xf32>
    %39 = arith.addf %37, %38 : vector<8x8xf32>
    %cst_16 = arith.constant dense<0xFF800000> : vector<8xf32>
    %40 = vector.multi_reduction <maximumf>, %39, %cst_16 [1] : vector<8x8xf32> to vector<8xf32>
    %41 = vector.shape_cast %40 : vector<8xf32> to vector<8x1xf32>
    %42 = vector.broadcast %41 : vector<8x1xf32> to vector<8x8xf32>
    %43 = arith.subf %39, %42 : vector<8x8xf32>
    %44 = math.exp %43 : vector<8x8xf32>
    %cst_17 = arith.constant dense<0.000000e+00> : vector<8xf32>
    %45 = vector.multi_reduction <add>, %44, %cst_17 [1] : vector<8x8xf32> to vector<8xf32>
    %46 = vector.shape_cast %45 : vector<8xf32> to vector<8x1xf32>
    %47 = tpu.reciprocal %46 {approx = true} : vector<8x1xf32> -> vector<8x1xf32>
    %48 = vector.broadcast %47 : vector<8x1xf32> to vector<8x8xf32>
    %49 = arith.mulf %44, %48 : vector<8x8xf32>
    %50 = arith.truncf %49 : vector<8x8xf32> to vector<8x8xbf16>
    %51 = vector.extract_strided_slice %10 {offsets = [0, 8], sizes = [8, 8], strides = [1, 1]} : vector<8x32xbf16> to vector<8x8xbf16>
    %cst_18 = arith.constant dense<0.000000e+00> : vector<8x8xf32>
    %52 = tpu.matmul %50, %51, %cst_18 {dimension_numbers = #tpu.dot_dimension_numbers<[1], [0], [0], [1], [0, 0, 1, 1], [], []>} : vector<8x8xbf16>, vector<8x8xbf16>, vector<8x8xf32> -> vector<8x8xf32>
    %53 = vector.extract_strided_slice %8 {offsets = [0, 16], sizes = [8, 8], strides = [1, 1]} : vector<8x32xbf16> to vector<8x8xbf16>
    %54 = vector.extract_strided_slice %9 {offsets = [0, 16], sizes = [8, 8], strides = [1, 1]} : vector<8x32xbf16> to vector<8x8xbf16>
    %cst_19 = arith.constant dense<0.000000e+00> : vector<8x8xf32>
    %55 = tpu.matmul %53, %54, %cst_19 {dimension_numbers = #tpu.dot_dimension_numbers<[1], [1], [0], [0], [0, 0, 1, 0], [], []>} : vector<8x8xbf16>, vector<8x8xbf16>, vector<8x8xf32> -> vector<8x8xf32>
    %cst_20 = arith.constant 0.353553385 : f32
    %56 = vector.broadcast %cst_20 : f32 to vector<8x8xf32>
    %57 = arith.mulf %55, %56 : vector<8x8xf32>
    %58 = vector.broadcast %12 : vector<1x8xf32> to vector<8x8xf32>
    %59 = arith.addf %57, %58 : vector<8x8xf32>
    %cst_21 = arith.constant dense<0xFF800000> : vector<8xf32>
    %60 = vector.multi_reduction <maximumf>, %59, %cst_21 [1] : vector<8x8xf32> to vector<8xf32>
    %61 = vector.shape_cast %60 : vector<8xf32> to vector<8x1xf32>
    %62 = vector.broadcast %61 : vector<8x1xf32> to vector<8x8xf32>
    %63 = arith.subf %59, %62 : vector<8x8xf32>
    %64 = math.exp %63 : vector<8x8xf32>
    %cst_22 = arith.constant dense<0.000000e+00> : vector<8xf32>
    %65 = vector.multi_reduction <add>, %64, %cst_22 [1] : vector<8x8xf32> to vector<8xf32>
    %66 = vector.shape_cast %65 : vector<8xf32> to vector<8x1xf32>
    %67 = tpu.reciprocal %66 {approx = true} : vector<8x1xf32> -> vector<8x1xf32>
    %68 = vector.broadcast %67 : vector<8x1xf32> to vector<8x8xf32>
    %69 = arith.mulf %64, %68 : vector<8x8xf32>
    %70 = arith.truncf %69 : vector<8x8xf32> to vector<8x8xbf16>
    %71 = vector.extract_strided_slice %10 {offsets = [0, 16], sizes = [8, 8], strides = [1, 1]} : vector<8x32xbf16> to vector<8x8xbf16>
    %cst_23 = arith.constant dense<0.000000e+00> : vector<8x8xf32>
    %72 = tpu.matmul %70, %71, %cst_23 {dimension_numbers = #tpu.dot_dimension_numbers<[1], [0], [0], [1], [0, 0, 1, 1], [], []>} : vector<8x8xbf16>, vector<8x8xbf16>, vector<8x8xf32> -> vector<8x8xf32>
    %73 = vector.extract_strided_slice %8 {offsets = [0, 24], sizes = [8, 8], strides = [1, 1]} : vector<8x32xbf16> to vector<8x8xbf16>
    %74 = vector.extract_strided_slice %9 {offsets = [0, 24], sizes = [8, 8], strides = [1, 1]} : vector<8x32xbf16> to vector<8x8xbf16>
    %cst_24 = arith.constant dense<0.000000e+00> : vector<8x8xf32>
    %75 = tpu.matmul %73, %74, %cst_24 {dimension_numbers = #tpu.dot_dimension_numbers<[1], [1], [0], [0], [0, 0, 1, 0], [], []>} : vector<8x8xbf16>, vector<8x8xbf16>, vector<8x8xf32> -> vector<8x8xf32>
    %cst_25 = arith.constant 0.353553385 : f32
    %76 = vector.broadcast %cst_25 : f32 to vector<8x8xf32>
    %77 = arith.mulf %75, %76 : vector<8x8xf32>
    %78 = vector.broadcast %12 : vector<1x8xf32> to vector<8x8xf32>
    %79 = arith.addf %77, %78 : vector<8x8xf32>
    %cst_26 = arith.constant dense<0xFF800000> : vector<8xf32>
    %80 = vector.multi_reduction <maximumf>, %79, %cst_26 [1] : vector<8x8xf32> to vector<8xf32>
    %81 = vector.shape_cast %80 : vector<8xf32> to vector<8x1xf32>
    %82 = vector.broadcast %81 : vector<8x1xf32> to vector<8x8xf32>
    %83 = arith.subf %79, %82 : vector<8x8xf32>
    %84 = math.exp %83 : vector<8x8xf32>
    %cst_27 = arith.constant dense<0.000000e+00> : vector<8xf32>
    %85 = vector.multi_reduction <add>, %84, %cst_27 [1] : vector<8x8xf32> to vector<8xf32>
    %86 = vector.shape_cast %85 : vector<8xf32> to vector<8x1xf32>
    %87 = tpu.reciprocal %86 {approx = true} : vector<8x1xf32> -> vector<8x1xf32>
    %88 = vector.broadcast %87 : vector<8x1xf32> to vector<8x8xf32>
    %89 = arith.mulf %84, %88 : vector<8x8xf32>
    %90 = arith.truncf %89 : vector<8x8xf32> to vector<8x8xbf16>
    %91 = vector.extract_strided_slice %10 {offsets = [0, 24], sizes = [8, 8], strides = [1, 1]} : vector<8x32xbf16> to vector<8x8xbf16>
    %cst_28 = arith.constant dense<0.000000e+00> : vector<8x8xf32>
    %92 = tpu.matmul %90, %91, %cst_28 {dimension_numbers = #tpu.dot_dimension_numbers<[1], [0], [0], [1], [0, 0, 1, 1], [], []>} : vector<8x8xbf16>, vector<8x8xbf16>, vector<8x8xf32> -> vector<8x8xf32>
    %93 = tpu.concatenate %32, %52, %72, %92 in 1 : vector<8x8xf32>, vector<8x8xf32>, vector<8x8xf32>, vector<8x8xf32> -> vector<8x32xf32>
    %94 = arith.truncf %93 : vector<8x32xf32> to vector<8x32xbf16>
    %c0_29 = arith.constant 0 : index
    %c0_30 = arith.constant 0 : index
    %c0_31 = arith.constant 0 : index
    %95 = vector.load %arg5[%c0_29, %c0_30, %c0_31] : memref<1x8x32xbf16, #tpu.memory_space<vmem>>, vector<1x8x32xbf16>
    %96 = vector.shape_cast %95 : vector<1x8x32xbf16> to vector<8x32xbf16>
    %97 = vector.shape_cast %94 : vector<8x32xbf16> to vector<1x8x32xbf16>
    tpu.vector_store %arg5[%c0_29, %c0_30, %c0_31], %97 {strides = array<i32>} : memref<1x8x32xbf16, #tpu.memory_space<vmem>>, vector<1x8x32xbf16>,
    return
  }
  func.func @transform_0(%arg0: i32) -> (i32, i32, i32) {
    %c0_i32 = arith.constant 0 : i32
    %c0_i32_0 = arith.constant 0 : i32
    %c0_i32_1 = arith.constant 0 : i32
    return %arg0, %c0_i32, %c0_i32_0 : i32, i32, i32
  }
  func.func @transform_1(%arg0: i32) -> (i32, i32) {
    %c0_i32 = arith.constant 0 : i32
    %c0_i32_0 = arith.constant 0 : i32
    %c0_i32_1 = arith.constant 0 : i32
    return %c0_i32, %c0_i32_0 : i32, i32
  }
  func.func @transform_2(%arg0: i32) -> (i32, i32) {
    %c0_i32 = arith.constant 0 : i32
    %c0_i32_0 = arith.constant 0 : i32
    %c0_i32_1 = arith.constant 0 : i32
    return %c0_i32, %c0_i32_0 : i32, i32
  }
  func.func @transform_3(%arg0: i32) -> (i32, i32, i32) {
    %c0_i32 = arith.constant 0 : i32
    %c0_i32_0 = arith.constant 0 : i32
    %c0_i32_1 = arith.constant 0 : i32
    return %arg0, %c0_i32, %c0_i32_0 : i32, i32, i32
  }
  func.func @transform_4(%arg0: i32) -> (i32, i32, i32) {
    %c0_i32 = arith.constant 0 : i32
    %c0_i32_0 = arith.constant 0 : i32
    %c0_i32_1 = arith.constant 0 : i32
    return %arg0, %c0_i32, %c0_i32_0 : i32, i32, i32
  }
}

module attributes {stable_mosaic.version = 11 : i64} {
  func.func @_proj_res_ln_kernel(%arg0: i32, %arg1: memref<16x32xbf16, #tpu.memory_space<vmem>>, %arg2: memref<32x32xbf16, #tpu.memory_space<vmem>>, %arg3: memref<1x32xf32, #tpu.memory_space<vmem>>, %arg4: memref<16x32xbf16, #tpu.memory_space<vmem>>, %arg5: memref<1x32xf32, #tpu.memory_space<vmem>>, %arg6: memref<1x32xf32, #tpu.memory_space<vmem>>, %arg7: memref<16x32xbf16, #tpu.memory_space<vmem>>) attributes {dimension_semantics = [#tpu.dimension_semantics<parallel>], iteration_bounds = array<i64: 1>, scalar_prefetch = 0 : i64, scratch_operands = 0 : i64, tpu.core_type = #tpu.core_type<tc>, window_params = [{transform_indices = @transform_0, window_bounds = array<i64: 16, 32>}, {pipeline_mode = #tpu.pipeline_mode<synchronous>, transform_indices = @transform_1, window_bounds = array<i64: 32, 32>}, {pipeline_mode = #tpu.pipeline_mode<synchronous>, transform_indices = @transform_2, window_bounds = array<i64: 1, 32>}, {transform_indices = @transform_3, window_bounds = array<i64: 16, 32>}, {pipeline_mode = #tpu.pipeline_mode<synchronous>, transform_indices = @transform_4, window_bounds = array<i64: 1, 32>}, {pipeline_mode = #tpu.pipeline_mode<synchronous>, transform_indices = @transform_5, window_bounds = array<i64: 1, 32>}, {transform_indices = @transform_6, window_bounds = array<i64: 16, 32>}]} {
    %c0 = arith.constant 0 : index
    %c0_0 = arith.constant 0 : index
    %0 = vector.load %arg1[%c0, %c0_0] : memref<16x32xbf16, #tpu.memory_space<vmem>>, vector<16x32xbf16>
    %c0_1 = arith.constant 0 : index
    %c0_2 = arith.constant 0 : index
    %1 = vector.load %arg2[%c0_1, %c0_2] : memref<32x32xbf16, #tpu.memory_space<vmem>>, vector<32x32xbf16>
    %cst = arith.constant dense<0.000000e+00> : vector<16x32xf32>
    %2 = tpu.matmul %0, %1, %cst {dimension_numbers = #tpu.dot_dimension_numbers<[1], [0], [0], [1], [0, 0, 1, 1], [], []>} : vector<16x32xbf16>, vector<32x32xbf16>, vector<16x32xf32> -> vector<16x32xf32>
    %c0_3 = arith.constant 0 : index
    %c0_4 = arith.constant 0 : index
    %3 = vector.load %arg3[%c0_3, %c0_4] : memref<1x32xf32, #tpu.memory_space<vmem>>, vector<1x32xf32>
    %4 = vector.broadcast %3 : vector<1x32xf32> to vector<16x32xf32>
    %5 = arith.addf %2, %4 : vector<16x32xf32>
    %c0_5 = arith.constant 0 : index
    %c0_6 = arith.constant 0 : index
    %6 = vector.load %arg4[%c0_5, %c0_6] : memref<16x32xbf16, #tpu.memory_space<vmem>>, vector<16x32xbf16>
    %7 = arith.extf %6 : vector<16x32xbf16> to vector<16x32xf32>
    %8 = arith.addf %5, %7 : vector<16x32xf32>
    %cst_7 = arith.constant dense<0.000000e+00> : vector<16xf32>
    %9 = vector.multi_reduction <add>, %8, %cst_7 [1] : vector<16x32xf32> to vector<16xf32>
    %10 = vector.shape_cast %9 : vector<16xf32> to vector<16x1xf32>
    %cst_8 = arith.constant 3.200000e+01 : f32
    %11 = vector.broadcast %cst_8 : f32 to vector<16x1xf32>
    %12 = arith.divf %10, %11 : vector<16x1xf32>
    %13 = vector.broadcast %12 : vector<16x1xf32> to vector<16x32xf32>
    %14 = arith.subf %8, %13 : vector<16x32xf32>
    %15 = arith.mulf %14, %14 : vector<16x32xf32>
    %cst_9 = arith.constant dense<0.000000e+00> : vector<16xf32>
    %16 = vector.multi_reduction <add>, %15, %cst_9 [1] : vector<16x32xf32> to vector<16xf32>
    %17 = vector.shape_cast %16 : vector<16xf32> to vector<16x1xf32>
    %cst_10 = arith.constant 3.200000e+01 : f32
    %18 = vector.broadcast %cst_10 : f32 to vector<16x1xf32>
    %19 = arith.divf %17, %18 : vector<16x1xf32>
    %cst_11 = arith.constant 9.99999974E-6 : f32
    %20 = vector.broadcast %cst_11 : f32 to vector<16x1xf32>
    %21 = arith.addf %19, %20 : vector<16x1xf32>
    %22 = math.rsqrt %21 : vector<16x1xf32>
    %23 = vector.broadcast %22 : vector<16x1xf32> to vector<16x32xf32>
    %24 = arith.mulf %14, %23 : vector<16x32xf32>
    %c0_12 = arith.constant 0 : index
    %c0_13 = arith.constant 0 : index
    %25 = vector.load %arg5[%c0_12, %c0_13] : memref<1x32xf32, #tpu.memory_space<vmem>>, vector<1x32xf32>
    %26 = vector.broadcast %25 : vector<1x32xf32> to vector<16x32xf32>
    %27 = arith.mulf %24, %26 : vector<16x32xf32>
    %c0_14 = arith.constant 0 : index
    %c0_15 = arith.constant 0 : index
    %28 = vector.load %arg6[%c0_14, %c0_15] : memref<1x32xf32, #tpu.memory_space<vmem>>, vector<1x32xf32>
    %29 = vector.broadcast %28 : vector<1x32xf32> to vector<16x32xf32>
    %30 = arith.addf %27, %29 : vector<16x32xf32>
    %31 = arith.truncf %30 : vector<16x32xf32> to vector<16x32xbf16>
    %c0_16 = arith.constant 0 : index
    %c0_17 = arith.constant 0 : index
    %32 = vector.load %arg7[%c0_16, %c0_17] : memref<16x32xbf16, #tpu.memory_space<vmem>>, vector<16x32xbf16>
    tpu.vector_store %arg7[%c0_16, %c0_17], %31 {strides = array<i32>} : memref<16x32xbf16, #tpu.memory_space<vmem>>, vector<16x32xbf16>,
    return
  }
  func.func @transform_0(%arg0: i32) -> (i32, i32) {
    %c0_i32 = arith.constant 0 : i32
    %c0_i32_0 = arith.constant 0 : i32
    return %arg0, %c0_i32 : i32, i32
  }
  func.func @transform_1(%arg0: i32) -> (i32, i32) {
    %c0_i32 = arith.constant 0 : i32
    %c0_i32_0 = arith.constant 0 : i32
    %c0_i32_1 = arith.constant 0 : i32
    return %c0_i32, %c0_i32_0 : i32, i32
  }
  func.func @transform_2(%arg0: i32) -> (i32, i32) {
    %c0_i32 = arith.constant 0 : i32
    %c0_i32_0 = arith.constant 0 : i32
    %c0_i32_1 = arith.constant 0 : i32
    return %c0_i32, %c0_i32_0 : i32, i32
  }
  func.func @transform_3(%arg0: i32) -> (i32, i32) {
    %c0_i32 = arith.constant 0 : i32
    %c0_i32_0 = arith.constant 0 : i32
    return %arg0, %c0_i32 : i32, i32
  }
  func.func @transform_4(%arg0: i32) -> (i32, i32) {
    %c0_i32 = arith.constant 0 : i32
    %c0_i32_0 = arith.constant 0 : i32
    %c0_i32_1 = arith.constant 0 : i32
    return %c0_i32, %c0_i32_0 : i32, i32
  }
  func.func @transform_5(%arg0: i32) -> (i32, i32) {
    %c0_i32 = arith.constant 0 : i32
    %c0_i32_0 = arith.constant 0 : i32
    %c0_i32_1 = arith.constant 0 : i32
    return %c0_i32, %c0_i32_0 : i32, i32
  }
  func.func @transform_6(%arg0: i32) -> (i32, i32) {
    %c0_i32 = arith.constant 0 : i32
    %c0_i32_0 = arith.constant 0 : i32
    return %arg0, %c0_i32 : i32, i32
  }
}

module attributes {stable_mosaic.version = 11 : i64} {
  func.func @_ffn_res_ln_kernel(%arg0: i32, %arg1: memref<16x32xbf16, #tpu.memory_space<vmem>>, %arg2: memref<32x64xbf16, #tpu.memory_space<vmem>>, %arg3: memref<1x64xf32, #tpu.memory_space<vmem>>, %arg4: memref<64x32xbf16, #tpu.memory_space<vmem>>, %arg5: memref<1x32xf32, #tpu.memory_space<vmem>>, %arg6: memref<1x32xf32, #tpu.memory_space<vmem>>, %arg7: memref<1x32xf32, #tpu.memory_space<vmem>>, %arg8: memref<16x32xbf16, #tpu.memory_space<vmem>>) attributes {dimension_semantics = [#tpu.dimension_semantics<parallel>], iteration_bounds = array<i64: 1>, scalar_prefetch = 0 : i64, scratch_operands = 0 : i64, tpu.core_type = #tpu.core_type<tc>, window_params = [{transform_indices = @transform_0, window_bounds = array<i64: 16, 32>}, {pipeline_mode = #tpu.pipeline_mode<synchronous>, transform_indices = @transform_1, window_bounds = array<i64: 32, 64>}, {pipeline_mode = #tpu.pipeline_mode<synchronous>, transform_indices = @transform_2, window_bounds = array<i64: 1, 64>}, {pipeline_mode = #tpu.pipeline_mode<synchronous>, transform_indices = @transform_3, window_bounds = array<i64: 64, 32>}, {pipeline_mode = #tpu.pipeline_mode<synchronous>, transform_indices = @transform_4, window_bounds = array<i64: 1, 32>}, {pipeline_mode = #tpu.pipeline_mode<synchronous>, transform_indices = @transform_5, window_bounds = array<i64: 1, 32>}, {pipeline_mode = #tpu.pipeline_mode<synchronous>, transform_indices = @transform_6, window_bounds = array<i64: 1, 32>}, {transform_indices = @transform_7, window_bounds = array<i64: 16, 32>}]} {
    %c0 = arith.constant 0 : index
    %c0_0 = arith.constant 0 : index
    %0 = vector.load %arg1[%c0, %c0_0] : memref<16x32xbf16, #tpu.memory_space<vmem>>, vector<16x32xbf16>
    %c0_1 = arith.constant 0 : index
    %c0_2 = arith.constant 0 : index
    %1 = vector.load %arg2[%c0_1, %c0_2] : memref<32x64xbf16, #tpu.memory_space<vmem>>, vector<32x64xbf16>
    %cst = arith.constant dense<0.000000e+00> : vector<16x64xf32>
    %2 = tpu.matmul %0, %1, %cst {dimension_numbers = #tpu.dot_dimension_numbers<[1], [0], [0], [1], [0, 0, 1, 1], [], []>} : vector<16x32xbf16>, vector<32x64xbf16>, vector<16x64xf32> -> vector<16x64xf32>
    %c0_3 = arith.constant 0 : index
    %c0_4 = arith.constant 0 : index
    %3 = vector.load %arg3[%c0_3, %c0_4] : memref<1x64xf32, #tpu.memory_space<vmem>>, vector<1x64xf32>
    %4 = vector.broadcast %3 : vector<1x64xf32> to vector<16x64xf32>
    %5 = arith.addf %2, %4 : vector<16x64xf32>
    %cst_5 = arith.constant 0.000000e+00 : f32
    %6 = vector.broadcast %cst_5 : f32 to vector<16x64xf32>
    %7 = arith.maximumf %5, %6 : vector<16x64xf32>
    %8 = arith.truncf %7 : vector<16x64xf32> to vector<16x64xbf16>
    %c0_6 = arith.constant 0 : index
    %c0_7 = arith.constant 0 : index
    %9 = vector.load %arg4[%c0_6, %c0_7] : memref<64x32xbf16, #tpu.memory_space<vmem>>, vector<64x32xbf16>
    %cst_8 = arith.constant dense<0.000000e+00> : vector<16x32xf32>
    %10 = tpu.matmul %8, %9, %cst_8 {dimension_numbers = #tpu.dot_dimension_numbers<[1], [0], [0], [1], [0, 0, 1, 1], [], []>} : vector<16x64xbf16>, vector<64x32xbf16>, vector<16x32xf32> -> vector<16x32xf32>
    %c0_9 = arith.constant 0 : index
    %c0_10 = arith.constant 0 : index
    %11 = vector.load %arg5[%c0_9, %c0_10] : memref<1x32xf32, #tpu.memory_space<vmem>>, vector<1x32xf32>
    %12 = vector.broadcast %11 : vector<1x32xf32> to vector<16x32xf32>
    %13 = arith.addf %10, %12 : vector<16x32xf32>
    %14 = arith.extf %0 : vector<16x32xbf16> to vector<16x32xf32>
    %15 = arith.addf %13, %14 : vector<16x32xf32>
    %cst_11 = arith.constant dense<0.000000e+00> : vector<16xf32>
    %16 = vector.multi_reduction <add>, %15, %cst_11 [1] : vector<16x32xf32> to vector<16xf32>
    %17 = vector.shape_cast %16 : vector<16xf32> to vector<16x1xf32>
    %cst_12 = arith.constant 3.200000e+01 : f32
    %18 = vector.broadcast %cst_12 : f32 to vector<16x1xf32>
    %19 = arith.divf %17, %18 : vector<16x1xf32>
    %20 = vector.broadcast %19 : vector<16x1xf32> to vector<16x32xf32>
    %21 = arith.subf %15, %20 : vector<16x32xf32>
    %22 = arith.mulf %21, %21 : vector<16x32xf32>
    %cst_13 = arith.constant dense<0.000000e+00> : vector<16xf32>
    %23 = vector.multi_reduction <add>, %22, %cst_13 [1] : vector<16x32xf32> to vector<16xf32>
    %24 = vector.shape_cast %23 : vector<16xf32> to vector<16x1xf32>
    %cst_14 = arith.constant 3.200000e+01 : f32
    %25 = vector.broadcast %cst_14 : f32 to vector<16x1xf32>
    %26 = arith.divf %24, %25 : vector<16x1xf32>
    %cst_15 = arith.constant 9.99999974E-6 : f32
    %27 = vector.broadcast %cst_15 : f32 to vector<16x1xf32>
    %28 = arith.addf %26, %27 : vector<16x1xf32>
    %29 = math.rsqrt %28 : vector<16x1xf32>
    %30 = vector.broadcast %29 : vector<16x1xf32> to vector<16x32xf32>
    %31 = arith.mulf %21, %30 : vector<16x32xf32>
    %c0_16 = arith.constant 0 : index
    %c0_17 = arith.constant 0 : index
    %32 = vector.load %arg6[%c0_16, %c0_17] : memref<1x32xf32, #tpu.memory_space<vmem>>, vector<1x32xf32>
    %33 = vector.broadcast %32 : vector<1x32xf32> to vector<16x32xf32>
    %34 = arith.mulf %31, %33 : vector<16x32xf32>
    %c0_18 = arith.constant 0 : index
    %c0_19 = arith.constant 0 : index
    %35 = vector.load %arg7[%c0_18, %c0_19] : memref<1x32xf32, #tpu.memory_space<vmem>>, vector<1x32xf32>
    %36 = vector.broadcast %35 : vector<1x32xf32> to vector<16x32xf32>
    %37 = arith.addf %34, %36 : vector<16x32xf32>
    %38 = arith.truncf %37 : vector<16x32xf32> to vector<16x32xbf16>
    %c0_20 = arith.constant 0 : index
    %c0_21 = arith.constant 0 : index
    %39 = vector.load %arg8[%c0_20, %c0_21] : memref<16x32xbf16, #tpu.memory_space<vmem>>, vector<16x32xbf16>
    tpu.vector_store %arg8[%c0_20, %c0_21], %38 {strides = array<i32>} : memref<16x32xbf16, #tpu.memory_space<vmem>>, vector<16x32xbf16>,
    return
  }
  func.func @transform_0(%arg0: i32) -> (i32, i32) {
    %c0_i32 = arith.constant 0 : i32
    %c0_i32_0 = arith.constant 0 : i32
    return %arg0, %c0_i32 : i32, i32
  }
  func.func @transform_1(%arg0: i32) -> (i32, i32) {
    %c0_i32 = arith.constant 0 : i32
    %c0_i32_0 = arith.constant 0 : i32
    %c0_i32_1 = arith.constant 0 : i32
    return %c0_i32, %c0_i32_0 : i32, i32
  }
  func.func @transform_2(%arg0: i32) -> (i32, i32) {
    %c0_i32 = arith.constant 0 : i32
    %c0_i32_0 = arith.constant 0 : i32
    %c0_i32_1 = arith.constant 0 : i32
    return %c0_i32, %c0_i32_0 : i32, i32
  }
  func.func @transform_3(%arg0: i32) -> (i32, i32) {
    %c0_i32 = arith.constant 0 : i32
    %c0_i32_0 = arith.constant 0 : i32
    %c0_i32_1 = arith.constant 0 : i32
    return %c0_i32, %c0_i32_0 : i32, i32
  }
  func.func @transform_4(%arg0: i32) -> (i32, i32) {
    %c0_i32 = arith.constant 0 : i32
    %c0_i32_0 = arith.constant 0 : i32
    %c0_i32_1 = arith.constant 0 : i32
    return %c0_i32, %c0_i32_0 : i32, i32
  }
  func.func @transform_5(%arg0: i32) -> (i32, i32) {
    %c0_i32 = arith.constant 0 : i32
    %c0_i32_0 = arith.constant 0 : i32
    %c0_i32_1 = arith.constant 0 : i32
    return %c0_i32, %c0_i32_0 : i32, i32
  }
  func.func @transform_6(%arg0: i32) -> (i32, i32) {
    %c0_i32 = arith.constant 0 : i32
    %c0_i32_0 = arith.constant 0 : i32
    %c0_i32_1 = arith.constant 0 : i32
    return %c0_i32, %c0_i32_0 : i32, i32
  }
  func.func @transform_7(%arg0: i32) -> (i32, i32) {
    %c0_i32 = arith.constant 0 : i32
    %c0_i32_0 = arith.constant 0 : i32
    return %arg0, %c0_i32 : i32, i32
  }
}

module attributes {stable_mosaic.version = 11 : i64} {
  func.func @_self_attn_kernel(%arg0: i32, %arg1: memref<1x8x32xbf16, #tpu.memory_space<vmem>>, %arg2: memref<32x96xbf16, #tpu.memory_space<vmem>>, %arg3: memref<1x96xf32, #tpu.memory_space<vmem>>, %arg4: memref<1x8x8xf32, #tpu.memory_space<vmem>>, %arg5: memref<1x8x32xbf16, #tpu.memory_space<vmem>>) attributes {dimension_semantics = [#tpu.dimension_semantics<parallel>], iteration_bounds = array<i64: 2>, scalar_prefetch = 0 : i64, scratch_operands = 0 : i64, tpu.core_type = #tpu.core_type<tc>, window_params = [{transform_indices = @transform_0, window_bounds = array<i64: 1, 8, 32>}, {pipeline_mode = #tpu.pipeline_mode<synchronous>, transform_indices = @transform_1, window_bounds = array<i64: 32, 96>}, {pipeline_mode = #tpu.pipeline_mode<synchronous>, transform_indices = @transform_2, window_bounds = array<i64: 1, 96>}, {pipeline_mode = #tpu.pipeline_mode<synchronous>, transform_indices = @transform_3, window_bounds = array<i64: 1, 8, 8>}, {transform_indices = @transform_4, window_bounds = array<i64: 1, 8, 32>}]} {
    %c0 = arith.constant 0 : index
    %c0_0 = arith.constant 0 : index
    %c0_1 = arith.constant 0 : index
    %0 = vector.load %arg1[%c0, %c0_0, %c0_1] : memref<1x8x32xbf16, #tpu.memory_space<vmem>>, vector<1x8x32xbf16>
    %1 = vector.shape_cast %0 : vector<1x8x32xbf16> to vector<8x32xbf16>
    %c0_2 = arith.constant 0 : index
    %c0_3 = arith.constant 0 : index
    %2 = vector.load %arg2[%c0_2, %c0_3] : memref<32x96xbf16, #tpu.memory_space<vmem>>, vector<32x96xbf16>
    %cst = arith.constant dense<0.000000e+00> : vector<8x96xf32>
    %3 = tpu.matmul %1, %2, %cst {dimension_numbers = #tpu.dot_dimension_numbers<[1], [0], [0], [1], [0, 0, 1, 1], [], []>} : vector<8x32xbf16>, vector<32x96xbf16>, vector<8x96xf32> -> vector<8x96xf32>
    %c0_4 = arith.constant 0 : index
    %c0_5 = arith.constant 0 : index
    %4 = vector.load %arg3[%c0_4, %c0_5] : memref<1x96xf32, #tpu.memory_space<vmem>>, vector<1x96xf32>
    %5 = vector.broadcast %4 : vector<1x96xf32> to vector<8x96xf32>
    %6 = arith.addf %3, %5 : vector<8x96xf32>
    %7 = arith.truncf %6 : vector<8x96xf32> to vector<8x96xbf16>
    %8 = vector.extract_strided_slice %7 {offsets = [0, 0], sizes = [8, 32], strides = [1, 1]} : vector<8x96xbf16> to vector<8x32xbf16>
    %9 = vector.extract_strided_slice %7 {offsets = [0, 32], sizes = [8, 32], strides = [1, 1]} : vector<8x96xbf16> to vector<8x32xbf16>
    %10 = vector.extract_strided_slice %7 {offsets = [0, 64], sizes = [8, 32], strides = [1, 1]} : vector<8x96xbf16> to vector<8x32xbf16>
    %c0_6 = arith.constant 0 : index
    %c0_7 = arith.constant 0 : index
    %c0_8 = arith.constant 0 : index
    %11 = vector.load %arg4[%c0_6, %c0_7, %c0_8] : memref<1x8x8xf32, #tpu.memory_space<vmem>>, vector<1x8x8xf32>
    %12 = vector.shape_cast %11 : vector<1x8x8xf32> to vector<8x8xf32>
    %13 = vector.extract_strided_slice %8 {offsets = [0, 0], sizes = [8, 8], strides = [1, 1]} : vector<8x32xbf16> to vector<8x8xbf16>
    %14 = vector.extract_strided_slice %9 {offsets = [0, 0], sizes = [8, 8], strides = [1, 1]} : vector<8x32xbf16> to vector<8x8xbf16>
    %cst_9 = arith.constant dense<0.000000e+00> : vector<8x8xf32>
    %15 = tpu.matmul %13, %14, %cst_9 {dimension_numbers = #tpu.dot_dimension_numbers<[1], [1], [0], [0], [0, 0, 1, 0], [], []>} : vector<8x8xbf16>, vector<8x8xbf16>, vector<8x8xf32> -> vector<8x8xf32>
    %cst_10 = arith.constant 0.353553385 : f32
    %16 = vector.broadcast %cst_10 : f32 to vector<8x8xf32>
    %17 = arith.mulf %15, %16 : vector<8x8xf32>
    %18 = arith.addf %17, %12 : vector<8x8xf32>
    %cst_11 = arith.constant dense<0xFF800000> : vector<8xf32>
    %19 = vector.multi_reduction <maximumf>, %18, %cst_11 [1] : vector<8x8xf32> to vector<8xf32>
    %20 = vector.shape_cast %19 : vector<8xf32> to vector<8x1xf32>
    %21 = vector.broadcast %20 : vector<8x1xf32> to vector<8x8xf32>
    %22 = arith.subf %18, %21 : vector<8x8xf32>
    %23 = math.exp %22 : vector<8x8xf32>
    %cst_12 = arith.constant dense<0.000000e+00> : vector<8xf32>
    %24 = vector.multi_reduction <add>, %23, %cst_12 [1] : vector<8x8xf32> to vector<8xf32>
    %25 = vector.shape_cast %24 : vector<8xf32> to vector<8x1xf32>
    %26 = tpu.reciprocal %25 {approx = true} : vector<8x1xf32> -> vector<8x1xf32>
    %27 = vector.broadcast %26 : vector<8x1xf32> to vector<8x8xf32>
    %28 = arith.mulf %23, %27 : vector<8x8xf32>
    %29 = arith.truncf %28 : vector<8x8xf32> to vector<8x8xbf16>
    %30 = vector.extract_strided_slice %10 {offsets = [0, 0], sizes = [8, 8], strides = [1, 1]} : vector<8x32xbf16> to vector<8x8xbf16>
    %cst_13 = arith.constant dense<0.000000e+00> : vector<8x8xf32>
    %31 = tpu.matmul %29, %30, %cst_13 {dimension_numbers = #tpu.dot_dimension_numbers<[1], [0], [0], [1], [0, 0, 1, 1], [], []>} : vector<8x8xbf16>, vector<8x8xbf16>, vector<8x8xf32> -> vector<8x8xf32>
    %32 = vector.extract_strided_slice %8 {offsets = [0, 8], sizes = [8, 8], strides = [1, 1]} : vector<8x32xbf16> to vector<8x8xbf16>
    %33 = vector.extract_strided_slice %9 {offsets = [0, 8], sizes = [8, 8], strides = [1, 1]} : vector<8x32xbf16> to vector<8x8xbf16>
    %cst_14 = arith.constant dense<0.000000e+00> : vector<8x8xf32>
    %34 = tpu.matmul %32, %33, %cst_14 {dimension_numbers = #tpu.dot_dimension_numbers<[1], [1], [0], [0], [0, 0, 1, 0], [], []>} : vector<8x8xbf16>, vector<8x8xbf16>, vector<8x8xf32> -> vector<8x8xf32>
    %cst_15 = arith.constant 0.353553385 : f32
    %35 = vector.broadcast %cst_15 : f32 to vector<8x8xf32>
    %36 = arith.mulf %34, %35 : vector<8x8xf32>
    %37 = arith.addf %36, %12 : vector<8x8xf32>
    %cst_16 = arith.constant dense<0xFF800000> : vector<8xf32>
    %38 = vector.multi_reduction <maximumf>, %37, %cst_16 [1] : vector<8x8xf32> to vector<8xf32>
    %39 = vector.shape_cast %38 : vector<8xf32> to vector<8x1xf32>
    %40 = vector.broadcast %39 : vector<8x1xf32> to vector<8x8xf32>
    %41 = arith.subf %37, %40 : vector<8x8xf32>
    %42 = math.exp %41 : vector<8x8xf32>
    %cst_17 = arith.constant dense<0.000000e+00> : vector<8xf32>
    %43 = vector.multi_reduction <add>, %42, %cst_17 [1] : vector<8x8xf32> to vector<8xf32>
    %44 = vector.shape_cast %43 : vector<8xf32> to vector<8x1xf32>
    %45 = tpu.reciprocal %44 {approx = true} : vector<8x1xf32> -> vector<8x1xf32>
    %46 = vector.broadcast %45 : vector<8x1xf32> to vector<8x8xf32>
    %47 = arith.mulf %42, %46 : vector<8x8xf32>
    %48 = arith.truncf %47 : vector<8x8xf32> to vector<8x8xbf16>
    %49 = vector.extract_strided_slice %10 {offsets = [0, 8], sizes = [8, 8], strides = [1, 1]} : vector<8x32xbf16> to vector<8x8xbf16>
    %cst_18 = arith.constant dense<0.000000e+00> : vector<8x8xf32>
    %50 = tpu.matmul %48, %49, %cst_18 {dimension_numbers = #tpu.dot_dimension_numbers<[1], [0], [0], [1], [0, 0, 1, 1], [], []>} : vector<8x8xbf16>, vector<8x8xbf16>, vector<8x8xf32> -> vector<8x8xf32>
    %51 = vector.extract_strided_slice %8 {offsets = [0, 16], sizes = [8, 8], strides = [1, 1]} : vector<8x32xbf16> to vector<8x8xbf16>
    %52 = vector.extract_strided_slice %9 {offsets = [0, 16], sizes = [8, 8], strides = [1, 1]} : vector<8x32xbf16> to vector<8x8xbf16>
    %cst_19 = arith.constant dense<0.000000e+00> : vector<8x8xf32>
    %53 = tpu.matmul %51, %52, %cst_19 {dimension_numbers = #tpu.dot_dimension_numbers<[1], [1], [0], [0], [0, 0, 1, 0], [], []>} : vector<8x8xbf16>, vector<8x8xbf16>, vector<8x8xf32> -> vector<8x8xf32>
    %cst_20 = arith.constant 0.353553385 : f32
    %54 = vector.broadcast %cst_20 : f32 to vector<8x8xf32>
    %55 = arith.mulf %53, %54 : vector<8x8xf32>
    %56 = arith.addf %55, %12 : vector<8x8xf32>
    %cst_21 = arith.constant dense<0xFF800000> : vector<8xf32>
    %57 = vector.multi_reduction <maximumf>, %56, %cst_21 [1] : vector<8x8xf32> to vector<8xf32>
    %58 = vector.shape_cast %57 : vector<8xf32> to vector<8x1xf32>
    %59 = vector.broadcast %58 : vector<8x1xf32> to vector<8x8xf32>
    %60 = arith.subf %56, %59 : vector<8x8xf32>
    %61 = math.exp %60 : vector<8x8xf32>
    %cst_22 = arith.constant dense<0.000000e+00> : vector<8xf32>
    %62 = vector.multi_reduction <add>, %61, %cst_22 [1] : vector<8x8xf32> to vector<8xf32>
    %63 = vector.shape_cast %62 : vector<8xf32> to vector<8x1xf32>
    %64 = tpu.reciprocal %63 {approx = true} : vector<8x1xf32> -> vector<8x1xf32>
    %65 = vector.broadcast %64 : vector<8x1xf32> to vector<8x8xf32>
    %66 = arith.mulf %61, %65 : vector<8x8xf32>
    %67 = arith.truncf %66 : vector<8x8xf32> to vector<8x8xbf16>
    %68 = vector.extract_strided_slice %10 {offsets = [0, 16], sizes = [8, 8], strides = [1, 1]} : vector<8x32xbf16> to vector<8x8xbf16>
    %cst_23 = arith.constant dense<0.000000e+00> : vector<8x8xf32>
    %69 = tpu.matmul %67, %68, %cst_23 {dimension_numbers = #tpu.dot_dimension_numbers<[1], [0], [0], [1], [0, 0, 1, 1], [], []>} : vector<8x8xbf16>, vector<8x8xbf16>, vector<8x8xf32> -> vector<8x8xf32>
    %70 = vector.extract_strided_slice %8 {offsets = [0, 24], sizes = [8, 8], strides = [1, 1]} : vector<8x32xbf16> to vector<8x8xbf16>
    %71 = vector.extract_strided_slice %9 {offsets = [0, 24], sizes = [8, 8], strides = [1, 1]} : vector<8x32xbf16> to vector<8x8xbf16>
    %cst_24 = arith.constant dense<0.000000e+00> : vector<8x8xf32>
    %72 = tpu.matmul %70, %71, %cst_24 {dimension_numbers = #tpu.dot_dimension_numbers<[1], [1], [0], [0], [0, 0, 1, 0], [], []>} : vector<8x8xbf16>, vector<8x8xbf16>, vector<8x8xf32> -> vector<8x8xf32>
    %cst_25 = arith.constant 0.353553385 : f32
    %73 = vector.broadcast %cst_25 : f32 to vector<8x8xf32>
    %74 = arith.mulf %72, %73 : vector<8x8xf32>
    %75 = arith.addf %74, %12 : vector<8x8xf32>
    %cst_26 = arith.constant dense<0xFF800000> : vector<8xf32>
    %76 = vector.multi_reduction <maximumf>, %75, %cst_26 [1] : vector<8x8xf32> to vector<8xf32>
    %77 = vector.shape_cast %76 : vector<8xf32> to vector<8x1xf32>
    %78 = vector.broadcast %77 : vector<8x1xf32> to vector<8x8xf32>
    %79 = arith.subf %75, %78 : vector<8x8xf32>
    %80 = math.exp %79 : vector<8x8xf32>
    %cst_27 = arith.constant dense<0.000000e+00> : vector<8xf32>
    %81 = vector.multi_reduction <add>, %80, %cst_27 [1] : vector<8x8xf32> to vector<8xf32>
    %82 = vector.shape_cast %81 : vector<8xf32> to vector<8x1xf32>
    %83 = tpu.reciprocal %82 {approx = true} : vector<8x1xf32> -> vector<8x1xf32>
    %84 = vector.broadcast %83 : vector<8x1xf32> to vector<8x8xf32>
    %85 = arith.mulf %80, %84 : vector<8x8xf32>
    %86 = arith.truncf %85 : vector<8x8xf32> to vector<8x8xbf16>
    %87 = vector.extract_strided_slice %10 {offsets = [0, 24], sizes = [8, 8], strides = [1, 1]} : vector<8x32xbf16> to vector<8x8xbf16>
    %cst_28 = arith.constant dense<0.000000e+00> : vector<8x8xf32>
    %88 = tpu.matmul %86, %87, %cst_28 {dimension_numbers = #tpu.dot_dimension_numbers<[1], [0], [0], [1], [0, 0, 1, 1], [], []>} : vector<8x8xbf16>, vector<8x8xbf16>, vector<8x8xf32> -> vector<8x8xf32>
    %89 = tpu.concatenate %31, %50, %69, %88 in 1 : vector<8x8xf32>, vector<8x8xf32>, vector<8x8xf32>, vector<8x8xf32> -> vector<8x32xf32>
    %90 = arith.truncf %89 : vector<8x32xf32> to vector<8x32xbf16>
    %c0_29 = arith.constant 0 : index
    %c0_30 = arith.constant 0 : index
    %c0_31 = arith.constant 0 : index
    %91 = vector.load %arg5[%c0_29, %c0_30, %c0_31] : memref<1x8x32xbf16, #tpu.memory_space<vmem>>, vector<1x8x32xbf16>
    %92 = vector.shape_cast %91 : vector<1x8x32xbf16> to vector<8x32xbf16>
    %93 = vector.shape_cast %90 : vector<8x32xbf16> to vector<1x8x32xbf16>
    tpu.vector_store %arg5[%c0_29, %c0_30, %c0_31], %93 {strides = array<i32>} : memref<1x8x32xbf16, #tpu.memory_space<vmem>>, vector<1x8x32xbf16>,
    return
  }
  func.func @transform_0(%arg0: i32) -> (i32, i32, i32) {
    %c0_i32 = arith.constant 0 : i32
    %c0_i32_0 = arith.constant 0 : i32
    %c0_i32_1 = arith.constant 0 : i32
    return %arg0, %c0_i32, %c0_i32_0 : i32, i32, i32
  }
  func.func @transform_1(%arg0: i32) -> (i32, i32) {
    %c0_i32 = arith.constant 0 : i32
    %c0_i32_0 = arith.constant 0 : i32
    %c0_i32_1 = arith.constant 0 : i32
    return %c0_i32, %c0_i32_0 : i32, i32
  }
  func.func @transform_2(%arg0: i32) -> (i32, i32) {
    %c0_i32 = arith.constant 0 : i32
    %c0_i32_0 = arith.constant 0 : i32
    %c0_i32_1 = arith.constant 0 : i32
    return %c0_i32, %c0_i32_0 : i32, i32
  }
  func.func @transform_3(%arg0: i32) -> (i32, i32, i32) {
    %c0_i32 = arith.constant 0 : i32
    %c0_i32_0 = arith.constant 0 : i32
    %c0_i32_1 = arith.constant 0 : i32
    %c0_i32_2 = arith.constant 0 : i32
    return %c0_i32, %c0_i32_0, %c0_i32_1 : i32, i32, i32
  }
  func.func @transform_4(%arg0: i32) -> (i32, i32, i32) {
    %c0_i32 = arith.constant 0 : i32
    %c0_i32_0 = arith.constant 0 : i32
    %c0_i32_1 = arith.constant 0 : i32
    return %arg0, %c0_i32, %c0_i32_0 : i32, i32, i32
  }
}

module attributes {stable_mosaic.version = 11 : i64} {
  func.func @_cross_attn_kernel(%arg0: i32, %arg1: memref<1x8x32xbf16, #tpu.memory_space<vmem>>, %arg2: memref<1x8x32xbf16, #tpu.memory_space<vmem>>, %arg3: memref<32x32xbf16, #tpu.memory_space<vmem>>, %arg4: memref<1x32xf32, #tpu.memory_space<vmem>>, %arg5: memref<32x64xbf16, #tpu.memory_space<vmem>>, %arg6: memref<1x64xf32, #tpu.memory_space<vmem>>, %arg7: memref<1x1x8xf32, #tpu.memory_space<vmem>>, %arg8: memref<1x8x32xbf16, #tpu.memory_space<vmem>>) attributes {dimension_semantics = [#tpu.dimension_semantics<parallel>], iteration_bounds = array<i64: 2>, scalar_prefetch = 0 : i64, scratch_operands = 0 : i64, tpu.core_type = #tpu.core_type<tc>, window_params = [{transform_indices = @transform_0, window_bounds = array<i64: 1, 8, 32>}, {transform_indices = @transform_1, window_bounds = array<i64: 1, 8, 32>}, {pipeline_mode = #tpu.pipeline_mode<synchronous>, transform_indices = @transform_2, window_bounds = array<i64: 32, 32>}, {pipeline_mode = #tpu.pipeline_mode<synchronous>, transform_indices = @transform_3, window_bounds = array<i64: 1, 32>}, {pipeline_mode = #tpu.pipeline_mode<synchronous>, transform_indices = @transform_4, window_bounds = array<i64: 32, 64>}, {pipeline_mode = #tpu.pipeline_mode<synchronous>, transform_indices = @transform_5, window_bounds = array<i64: 1, 64>}, {transform_indices = @transform_6, window_bounds = array<i64: 1, 1, 8>}, {transform_indices = @transform_7, window_bounds = array<i64: 1, 8, 32>}]} {
    %c0 = arith.constant 0 : index
    %c0_0 = arith.constant 0 : index
    %c0_1 = arith.constant 0 : index
    %0 = vector.load %arg1[%c0, %c0_0, %c0_1] : memref<1x8x32xbf16, #tpu.memory_space<vmem>>, vector<1x8x32xbf16>
    %1 = vector.shape_cast %0 : vector<1x8x32xbf16> to vector<8x32xbf16>
    %c0_2 = arith.constant 0 : index
    %c0_3 = arith.constant 0 : index
    %2 = vector.load %arg3[%c0_2, %c0_3] : memref<32x32xbf16, #tpu.memory_space<vmem>>, vector<32x32xbf16>
    %cst = arith.constant dense<0.000000e+00> : vector<8x32xf32>
    %3 = tpu.matmul %1, %2, %cst {dimension_numbers = #tpu.dot_dimension_numbers<[1], [0], [0], [1], [0, 0, 1, 1], [], []>} : vector<8x32xbf16>, vector<32x32xbf16>, vector<8x32xf32> -> vector<8x32xf32>
    %c0_4 = arith.constant 0 : index
    %c0_5 = arith.constant 0 : index
    %4 = vector.load %arg4[%c0_4, %c0_5] : memref<1x32xf32, #tpu.memory_space<vmem>>, vector<1x32xf32>
    %5 = vector.broadcast %4 : vector<1x32xf32> to vector<8x32xf32>
    %6 = arith.addf %3, %5 : vector<8x32xf32>
    %7 = arith.truncf %6 : vector<8x32xf32> to vector<8x32xbf16>
    %c0_6 = arith.constant 0 : index
    %c0_7 = arith.constant 0 : index
    %c0_8 = arith.constant 0 : index
    %8 = vector.load %arg2[%c0_6, %c0_7, %c0_8] : memref<1x8x32xbf16, #tpu.memory_space<vmem>>, vector<1x8x32xbf16>
    %9 = vector.shape_cast %8 : vector<1x8x32xbf16> to vector<8x32xbf16>
    %c0_9 = arith.constant 0 : index
    %c0_10 = arith.constant 0 : index
    %10 = vector.load %arg5[%c0_9, %c0_10] : memref<32x64xbf16, #tpu.memory_space<vmem>>, vector<32x64xbf16>
    %cst_11 = arith.constant dense<0.000000e+00> : vector<8x64xf32>
    %11 = tpu.matmul %9, %10, %cst_11 {dimension_numbers = #tpu.dot_dimension_numbers<[1], [0], [0], [1], [0, 0, 1, 1], [], []>} : vector<8x32xbf16>, vector<32x64xbf16>, vector<8x64xf32> -> vector<8x64xf32>
    %c0_12 = arith.constant 0 : index
    %c0_13 = arith.constant 0 : index
    %12 = vector.load %arg6[%c0_12, %c0_13] : memref<1x64xf32, #tpu.memory_space<vmem>>, vector<1x64xf32>
    %13 = vector.broadcast %12 : vector<1x64xf32> to vector<8x64xf32>
    %14 = arith.addf %11, %13 : vector<8x64xf32>
    %15 = arith.truncf %14 : vector<8x64xf32> to vector<8x64xbf16>
    %16 = vector.extract_strided_slice %15 {offsets = [0, 0], sizes = [8, 32], strides = [1, 1]} : vector<8x64xbf16> to vector<8x32xbf16>
    %17 = vector.extract_strided_slice %15 {offsets = [0, 32], sizes = [8, 32], strides = [1, 1]} : vector<8x64xbf16> to vector<8x32xbf16>
    %c0_14 = arith.constant 0 : index
    %c0_15 = arith.constant 0 : index
    %c0_16 = arith.constant 0 : index
    %18 = vector.load %arg7[%c0_14, %c0_15, %c0_16] : memref<1x1x8xf32, #tpu.memory_space<vmem>>, vector<1x1x8xf32>
    %19 = vector.shape_cast %18 : vector<1x1x8xf32> to vector<1x8xf32>
    %20 = vector.extract_strided_slice %7 {offsets = [0, 0], sizes = [8, 8], strides = [1, 1]} : vector<8x32xbf16> to vector<8x8xbf16>
    %21 = vector.extract_strided_slice %16 {offsets = [0, 0], sizes = [8, 8], strides = [1, 1]} : vector<8x32xbf16> to vector<8x8xbf16>
    %cst_17 = arith.constant dense<0.000000e+00> : vector<8x8xf32>
    %22 = tpu.matmul %20, %21, %cst_17 {dimension_numbers = #tpu.dot_dimension_numbers<[1], [1], [0], [0], [0, 0, 1, 0], [], []>} : vector<8x8xbf16>, vector<8x8xbf16>, vector<8x8xf32> -> vector<8x8xf32>
    %cst_18 = arith.constant 0.353553385 : f32
    %23 = vector.broadcast %cst_18 : f32 to vector<8x8xf32>
    %24 = arith.mulf %22, %23 : vector<8x8xf32>
    %25 = vector.broadcast %19 : vector<1x8xf32> to vector<8x8xf32>
    %26 = arith.addf %24, %25 : vector<8x8xf32>
    %cst_19 = arith.constant dense<0xFF800000> : vector<8xf32>
    %27 = vector.multi_reduction <maximumf>, %26, %cst_19 [1] : vector<8x8xf32> to vector<8xf32>
    %28 = vector.shape_cast %27 : vector<8xf32> to vector<8x1xf32>
    %29 = vector.broadcast %28 : vector<8x1xf32> to vector<8x8xf32>
    %30 = arith.subf %26, %29 : vector<8x8xf32>
    %31 = math.exp %30 : vector<8x8xf32>
    %cst_20 = arith.constant dense<0.000000e+00> : vector<8xf32>
    %32 = vector.multi_reduction <add>, %31, %cst_20 [1] : vector<8x8xf32> to vector<8xf32>
    %33 = vector.shape_cast %32 : vector<8xf32> to vector<8x1xf32>
    %34 = tpu.reciprocal %33 {approx = true} : vector<8x1xf32> -> vector<8x1xf32>
    %35 = vector.broadcast %34 : vector<8x1xf32> to vector<8x8xf32>
    %36 = arith.mulf %31, %35 : vector<8x8xf32>
    %37 = arith.truncf %36 : vector<8x8xf32> to vector<8x8xbf16>
    %38 = vector.extract_strided_slice %17 {offsets = [0, 0], sizes = [8, 8], strides = [1, 1]} : vector<8x32xbf16> to vector<8x8xbf16>
    %cst_21 = arith.constant dense<0.000000e+00> : vector<8x8xf32>
    %39 = tpu.matmul %37, %38, %cst_21 {dimension_numbers = #tpu.dot_dimension_numbers<[1], [0], [0], [1], [0, 0, 1, 1], [], []>} : vector<8x8xbf16>, vector<8x8xbf16>, vector<8x8xf32> -> vector<8x8xf32>
    %40 = vector.extract_strided_slice %7 {offsets = [0, 8], sizes = [8, 8], strides = [1, 1]} : vector<8x32xbf16> to vector<8x8xbf16>
    %41 = vector.extract_strided_slice %16 {offsets = [0, 8], sizes = [8, 8], strides = [1, 1]} : vector<8x32xbf16> to vector<8x8xbf16>
    %cst_22 = arith.constant dense<0.000000e+00> : vector<8x8xf32>
    %42 = tpu.matmul %40, %41, %cst_22 {dimension_numbers = #tpu.dot_dimension_numbers<[1], [1], [0], [0], [0, 0, 1, 0], [], []>} : vector<8x8xbf16>, vector<8x8xbf16>, vector<8x8xf32> -> vector<8x8xf32>
    %cst_23 = arith.constant 0.353553385 : f32
    %43 = vector.broadcast %cst_23 : f32 to vector<8x8xf32>
    %44 = arith.mulf %42, %43 : vector<8x8xf32>
    %45 = vector.broadcast %19 : vector<1x8xf32> to vector<8x8xf32>
    %46 = arith.addf %44, %45 : vector<8x8xf32>
    %cst_24 = arith.constant dense<0xFF800000> : vector<8xf32>
    %47 = vector.multi_reduction <maximumf>, %46, %cst_24 [1] : vector<8x8xf32> to vector<8xf32>
    %48 = vector.shape_cast %47 : vector<8xf32> to vector<8x1xf32>
    %49 = vector.broadcast %48 : vector<8x1xf32> to vector<8x8xf32>
    %50 = arith.subf %46, %49 : vector<8x8xf32>
    %51 = math.exp %50 : vector<8x8xf32>
    %cst_25 = arith.constant dense<0.000000e+00> : vector<8xf32>
    %52 = vector.multi_reduction <add>, %51, %cst_25 [1] : vector<8x8xf32> to vector<8xf32>
    %53 = vector.shape_cast %52 : vector<8xf32> to vector<8x1xf32>
    %54 = tpu.reciprocal %53 {approx = true} : vector<8x1xf32> -> vector<8x1xf32>
    %55 = vector.broadcast %54 : vector<8x1xf32> to vector<8x8xf32>
    %56 = arith.mulf %51, %55 : vector<8x8xf32>
    %57 = arith.truncf %56 : vector<8x8xf32> to vector<8x8xbf16>
    %58 = vector.extract_strided_slice %17 {offsets = [0, 8], sizes = [8, 8], strides = [1, 1]} : vector<8x32xbf16> to vector<8x8xbf16>
    %cst_26 = arith.constant dense<0.000000e+00> : vector<8x8xf32>
    %59 = tpu.matmul %57, %58, %cst_26 {dimension_numbers = #tpu.dot_dimension_numbers<[1], [0], [0], [1], [0, 0, 1, 1], [], []>} : vector<8x8xbf16>, vector<8x8xbf16>, vector<8x8xf32> -> vector<8x8xf32>
    %60 = vector.extract_strided_slice %7 {offsets = [0, 16], sizes = [8, 8], strides = [1, 1]} : vector<8x32xbf16> to vector<8x8xbf16>
    %61 = vector.extract_strided_slice %16 {offsets = [0, 16], sizes = [8, 8], strides = [1, 1]} : vector<8x32xbf16> to vector<8x8xbf16>
    %cst_27 = arith.constant dense<0.000000e+00> : vector<8x8xf32>
    %62 = tpu.matmul %60, %61, %cst_27 {dimension_numbers = #tpu.dot_dimension_numbers<[1], [1], [0], [0], [0, 0, 1, 0], [], []>} : vector<8x8xbf16>, vector<8x8xbf16>, vector<8x8xf32> -> vector<8x8xf32>
    %cst_28 = arith.constant 0.353553385 : f32
    %63 = vector.broadcast %cst_28 : f32 to vector<8x8xf32>
    %64 = arith.mulf %62, %63 : vector<8x8xf32>
    %65 = vector.broadcast %19 : vector<1x8xf32> to vector<8x8xf32>
    %66 = arith.addf %64, %65 : vector<8x8xf32>
    %cst_29 = arith.constant dense<0xFF800000> : vector<8xf32>
    %67 = vector.multi_reduction <maximumf>, %66, %cst_29 [1] : vector<8x8xf32> to vector<8xf32>
    %68 = vector.shape_cast %67 : vector<8xf32> to vector<8x1xf32>
    %69 = vector.broadcast %68 : vector<8x1xf32> to vector<8x8xf32>
    %70 = arith.subf %66, %69 : vector<8x8xf32>
    %71 = math.exp %70 : vector<8x8xf32>
    %cst_30 = arith.constant dense<0.000000e+00> : vector<8xf32>
    %72 = vector.multi_reduction <add>, %71, %cst_30 [1] : vector<8x8xf32> to vector<8xf32>
    %73 = vector.shape_cast %72 : vector<8xf32> to vector<8x1xf32>
    %74 = tpu.reciprocal %73 {approx = true} : vector<8x1xf32> -> vector<8x1xf32>
    %75 = vector.broadcast %74 : vector<8x1xf32> to vector<8x8xf32>
    %76 = arith.mulf %71, %75 : vector<8x8xf32>
    %77 = arith.truncf %76 : vector<8x8xf32> to vector<8x8xbf16>
    %78 = vector.extract_strided_slice %17 {offsets = [0, 16], sizes = [8, 8], strides = [1, 1]} : vector<8x32xbf16> to vector<8x8xbf16>
    %cst_31 = arith.constant dense<0.000000e+00> : vector<8x8xf32>
    %79 = tpu.matmul %77, %78, %cst_31 {dimension_numbers = #tpu.dot_dimension_numbers<[1], [0], [0], [1], [0, 0, 1, 1], [], []>} : vector<8x8xbf16>, vector<8x8xbf16>, vector<8x8xf32> -> vector<8x8xf32>
    %80 = vector.extract_strided_slice %7 {offsets = [0, 24], sizes = [8, 8], strides = [1, 1]} : vector<8x32xbf16> to vector<8x8xbf16>
    %81 = vector.extract_strided_slice %16 {offsets = [0, 24], sizes = [8, 8], strides = [1, 1]} : vector<8x32xbf16> to vector<8x8xbf16>
    %cst_32 = arith.constant dense<0.000000e+00> : vector<8x8xf32>
    %82 = tpu.matmul %80, %81, %cst_32 {dimension_numbers = #tpu.dot_dimension_numbers<[1], [1], [0], [0], [0, 0, 1, 0], [], []>} : vector<8x8xbf16>, vector<8x8xbf16>, vector<8x8xf32> -> vector<8x8xf32>
    %cst_33 = arith.constant 0.353553385 : f32
    %83 = vector.broadcast %cst_33 : f32 to vector<8x8xf32>
    %84 = arith.mulf %82, %83 : vector<8x8xf32>
    %85 = vector.broadcast %19 : vector<1x8xf32> to vector<8x8xf32>
    %86 = arith.addf %84, %85 : vector<8x8xf32>
    %cst_34 = arith.constant dense<0xFF800000> : vector<8xf32>
    %87 = vector.multi_reduction <maximumf>, %86, %cst_34 [1] : vector<8x8xf32> to vector<8xf32>
    %88 = vector.shape_cast %87 : vector<8xf32> to vector<8x1xf32>
    %89 = vector.broadcast %88 : vector<8x1xf32> to vector<8x8xf32>
    %90 = arith.subf %86, %89 : vector<8x8xf32>
    %91 = math.exp %90 : vector<8x8xf32>
    %cst_35 = arith.constant dense<0.000000e+00> : vector<8xf32>
    %92 = vector.multi_reduction <add>, %91, %cst_35 [1] : vector<8x8xf32> to vector<8xf32>
    %93 = vector.shape_cast %92 : vector<8xf32> to vector<8x1xf32>
    %94 = tpu.reciprocal %93 {approx = true} : vector<8x1xf32> -> vector<8x1xf32>
    %95 = vector.broadcast %94 : vector<8x1xf32> to vector<8x8xf32>
    %96 = arith.mulf %91, %95 : vector<8x8xf32>
    %97 = arith.truncf %96 : vector<8x8xf32> to vector<8x8xbf16>
    %98 = vector.extract_strided_slice %17 {offsets = [0, 24], sizes = [8, 8], strides = [1, 1]} : vector<8x32xbf16> to vector<8x8xbf16>
    %cst_36 = arith.constant dense<0.000000e+00> : vector<8x8xf32>
    %99 = tpu.matmul %97, %98, %cst_36 {dimension_numbers = #tpu.dot_dimension_numbers<[1], [0], [0], [1], [0, 0, 1, 1], [], []>} : vector<8x8xbf16>, vector<8x8xbf16>, vector<8x8xf32> -> vector<8x8xf32>
    %100 = tpu.concatenate %39, %59, %79, %99 in 1 : vector<8x8xf32>, vector<8x8xf32>, vector<8x8xf32>, vector<8x8xf32> -> vector<8x32xf32>
    %101 = arith.truncf %100 : vector<8x32xf32> to vector<8x32xbf16>
    %c0_37 = arith.constant 0 : index
    %c0_38 = arith.constant 0 : index
    %c0_39 = arith.constant 0 : index
    %102 = vector.load %arg8[%c0_37, %c0_38, %c0_39] : memref<1x8x32xbf16, #tpu.memory_space<vmem>>, vector<1x8x32xbf16>
    %103 = vector.shape_cast %102 : vector<1x8x32xbf16> to vector<8x32xbf16>
    %104 = vector.shape_cast %101 : vector<8x32xbf16> to vector<1x8x32xbf16>
    tpu.vector_store %arg8[%c0_37, %c0_38, %c0_39], %104 {strides = array<i32>} : memref<1x8x32xbf16, #tpu.memory_space<vmem>>, vector<1x8x32xbf16>,
    return
  }
  func.func @transform_0(%arg0: i32) -> (i32, i32, i32) {
    %c0_i32 = arith.constant 0 : i32
    %c0_i32_0 = arith.constant 0 : i32
    %c0_i32_1 = arith.constant 0 : i32
    return %arg0, %c0_i32, %c0_i32_0 : i32, i32, i32
  }
  func.func @transform_1(%arg0: i32) -> (i32, i32, i32) {
    %c0_i32 = arith.constant 0 : i32
    %c0_i32_0 = arith.constant 0 : i32
    %c0_i32_1 = arith.constant 0 : i32
    return %arg0, %c0_i32, %c0_i32_0 : i32, i32, i32
  }
  func.func @transform_2(%arg0: i32) -> (i32, i32) {
    %c0_i32 = arith.constant 0 : i32
    %c0_i32_0 = arith.constant 0 : i32
    %c0_i32_1 = arith.constant 0 : i32
    return %c0_i32, %c0_i32_0 : i32, i32
  }
  func.func @transform_3(%arg0: i32) -> (i32, i32) {
    %c0_i32 = arith.constant 0 : i32
    %c0_i32_0 = arith.constant 0 : i32
    %c0_i32_1 = arith.constant 0 : i32
    return %c0_i32, %c0_i32_0 : i32, i32
  }
  func.func @transform_4(%arg0: i32) -> (i32, i32) {
    %c0_i32 = arith.constant 0 : i32
    %c0_i32_0 = arith.constant 0 : i32
    %c0_i32_1 = arith.constant 0 : i32
    return %c0_i32, %c0_i32_0 : i32, i32
  }
  func.func @transform_5(%arg0: i32) -> (i32, i32) {
    %c0_i32 = arith.constant 0 : i32
    %c0_i32_0 = arith.constant 0 : i32
    %c0_i32_1 = arith.constant 0 : i32
    return %c0_i32, %c0_i32_0 : i32, i32
  }
  func.func @transform_6(%arg0: i32) -> (i32, i32, i32) {
    %c0_i32 = arith.constant 0 : i32
    %c0_i32_0 = arith.constant 0 : i32
    %c0_i32_1 = arith.constant 0 : i32
    return %arg0, %c0_i32, %c0_i32_0 : i32, i32, i32
  }
  func.func @transform_7(%arg0: i32) -> (i32, i32, i32) {
    %c0_i32 = arith.constant 0 : i32
    %c0_i32_0 = arith.constant 0 : i32
    %c0_i32_1 = arith.constant 0 : i32
    return %arg0, %c0_i32, %c0_i32_0 : i32, i32, i32
  }
}

module attributes {stable_mosaic.version = 11 : i64} {
  func.func @_cross_attn_kernel(%arg0: i32, %arg1: memref<1x8x32xbf16, #tpu.memory_space<vmem>>, %arg2: memref<1x8x32xbf16, #tpu.memory_space<vmem>>, %arg3: memref<32x32xbf16, #tpu.memory_space<vmem>>, %arg4: memref<1x32xf32, #tpu.memory_space<vmem>>, %arg5: memref<32x64xbf16, #tpu.memory_space<vmem>>, %arg6: memref<1x64xf32, #tpu.memory_space<vmem>>, %arg7: memref<1x1x8xf32, #tpu.memory_space<vmem>>, %arg8: memref<1x8x32xbf16, #tpu.memory_space<vmem>>, %arg9: memref<1x4x8x8xf32, #tpu.memory_space<vmem>>) attributes {dimension_semantics = [#tpu.dimension_semantics<parallel>], iteration_bounds = array<i64: 2>, scalar_prefetch = 0 : i64, scratch_operands = 0 : i64, tpu.core_type = #tpu.core_type<tc>, window_params = [{transform_indices = @transform_0, window_bounds = array<i64: 1, 8, 32>}, {transform_indices = @transform_1, window_bounds = array<i64: 1, 8, 32>}, {pipeline_mode = #tpu.pipeline_mode<synchronous>, transform_indices = @transform_2, window_bounds = array<i64: 32, 32>}, {pipeline_mode = #tpu.pipeline_mode<synchronous>, transform_indices = @transform_3, window_bounds = array<i64: 1, 32>}, {pipeline_mode = #tpu.pipeline_mode<synchronous>, transform_indices = @transform_4, window_bounds = array<i64: 32, 64>}, {pipeline_mode = #tpu.pipeline_mode<synchronous>, transform_indices = @transform_5, window_bounds = array<i64: 1, 64>}, {transform_indices = @transform_6, window_bounds = array<i64: 1, 1, 8>}, {transform_indices = @transform_7, window_bounds = array<i64: 1, 8, 32>}, {transform_indices = @transform_8, window_bounds = array<i64: 1, 4, 8, 8>}]} {
    %c0 = arith.constant 0 : index
    %c0_0 = arith.constant 0 : index
    %c0_1 = arith.constant 0 : index
    %0 = vector.load %arg1[%c0, %c0_0, %c0_1] : memref<1x8x32xbf16, #tpu.memory_space<vmem>>, vector<1x8x32xbf16>
    %1 = vector.shape_cast %0 : vector<1x8x32xbf16> to vector<8x32xbf16>
    %c0_2 = arith.constant 0 : index
    %c0_3 = arith.constant 0 : index
    %2 = vector.load %arg3[%c0_2, %c0_3] : memref<32x32xbf16, #tpu.memory_space<vmem>>, vector<32x32xbf16>
    %cst = arith.constant dense<0.000000e+00> : vector<8x32xf32>
    %3 = tpu.matmul %1, %2, %cst {dimension_numbers = #tpu.dot_dimension_numbers<[1], [0], [0], [1], [0, 0, 1, 1], [], []>} : vector<8x32xbf16>, vector<32x32xbf16>, vector<8x32xf32> -> vector<8x32xf32>
    %c0_4 = arith.constant 0 : index
    %c0_5 = arith.constant 0 : index
    %4 = vector.load %arg4[%c0_4, %c0_5] : memref<1x32xf32, #tpu.memory_space<vmem>>, vector<1x32xf32>
    %5 = vector.broadcast %4 : vector<1x32xf32> to vector<8x32xf32>
    %6 = arith.addf %3, %5 : vector<8x32xf32>
    %7 = arith.truncf %6 : vector<8x32xf32> to vector<8x32xbf16>
    %c0_6 = arith.constant 0 : index
    %c0_7 = arith.constant 0 : index
    %c0_8 = arith.constant 0 : index
    %8 = vector.load %arg2[%c0_6, %c0_7, %c0_8] : memref<1x8x32xbf16, #tpu.memory_space<vmem>>, vector<1x8x32xbf16>
    %9 = vector.shape_cast %8 : vector<1x8x32xbf16> to vector<8x32xbf16>
    %c0_9 = arith.constant 0 : index
    %c0_10 = arith.constant 0 : index
    %10 = vector.load %arg5[%c0_9, %c0_10] : memref<32x64xbf16, #tpu.memory_space<vmem>>, vector<32x64xbf16>
    %cst_11 = arith.constant dense<0.000000e+00> : vector<8x64xf32>
    %11 = tpu.matmul %9, %10, %cst_11 {dimension_numbers = #tpu.dot_dimension_numbers<[1], [0], [0], [1], [0, 0, 1, 1], [], []>} : vector<8x32xbf16>, vector<32x64xbf16>, vector<8x64xf32> -> vector<8x64xf32>
    %c0_12 = arith.constant 0 : index
    %c0_13 = arith.constant 0 : index
    %12 = vector.load %arg6[%c0_12, %c0_13] : memref<1x64xf32, #tpu.memory_space<vmem>>, vector<1x64xf32>
    %13 = vector.broadcast %12 : vector<1x64xf32> to vector<8x64xf32>
    %14 = arith.addf %11, %13 : vector<8x64xf32>
    %15 = arith.truncf %14 : vector<8x64xf32> to vector<8x64xbf16>
    %16 = vector.extract_strided_slice %15 {offsets = [0, 0], sizes = [8, 32], strides = [1, 1]} : vector<8x64xbf16> to vector<8x32xbf16>
    %17 = vector.extract_strided_slice %15 {offsets = [0, 32], sizes = [8, 32], strides = [1, 1]} : vector<8x64xbf16> to vector<8x32xbf16>
    %c0_14 = arith.constant 0 : index
    %c0_15 = arith.constant 0 : index
    %c0_16 = arith.constant 0 : index
    %18 = vector.load %arg7[%c0_14, %c0_15, %c0_16] : memref<1x1x8xf32, #tpu.memory_space<vmem>>, vector<1x1x8xf32>
    %19 = vector.shape_cast %18 : vector<1x1x8xf32> to vector<1x8xf32>
    %20 = vector.extract_strided_slice %7 {offsets = [0, 0], sizes = [8, 8], strides = [1, 1]} : vector<8x32xbf16> to vector<8x8xbf16>
    %21 = vector.extract_strided_slice %16 {offsets = [0, 0], sizes = [8, 8], strides = [1, 1]} : vector<8x32xbf16> to vector<8x8xbf16>
    %cst_17 = arith.constant dense<0.000000e+00> : vector<8x8xf32>
    %22 = tpu.matmul %20, %21, %cst_17 {dimension_numbers = #tpu.dot_dimension_numbers<[1], [1], [0], [0], [0, 0, 1, 0], [], []>} : vector<8x8xbf16>, vector<8x8xbf16>, vector<8x8xf32> -> vector<8x8xf32>
    %cst_18 = arith.constant 0.353553385 : f32
    %23 = vector.broadcast %cst_18 : f32 to vector<8x8xf32>
    %24 = arith.mulf %22, %23 : vector<8x8xf32>
    %25 = vector.broadcast %19 : vector<1x8xf32> to vector<8x8xf32>
    %26 = arith.addf %24, %25 : vector<8x8xf32>
    %cst_19 = arith.constant dense<0xFF800000> : vector<8xf32>
    %27 = vector.multi_reduction <maximumf>, %26, %cst_19 [1] : vector<8x8xf32> to vector<8xf32>
    %28 = vector.shape_cast %27 : vector<8xf32> to vector<8x1xf32>
    %29 = vector.broadcast %28 : vector<8x1xf32> to vector<8x8xf32>
    %30 = arith.subf %26, %29 : vector<8x8xf32>
    %31 = math.exp %30 : vector<8x8xf32>
    %cst_20 = arith.constant dense<0.000000e+00> : vector<8xf32>
    %32 = vector.multi_reduction <add>, %31, %cst_20 [1] : vector<8x8xf32> to vector<8xf32>
    %33 = vector.shape_cast %32 : vector<8xf32> to vector<8x1xf32>
    %34 = vector.broadcast %33 : vector<8x1xf32> to vector<8x8xf32>
    %35 = arith.divf %31, %34 : vector<8x8xf32>
    %36 = arith.truncf %35 : vector<8x8xf32> to vector<8x8xbf16>
    %37 = vector.extract_strided_slice %17 {offsets = [0, 0], sizes = [8, 8], strides = [1, 1]} : vector<8x32xbf16> to vector<8x8xbf16>
    %cst_21 = arith.constant dense<0.000000e+00> : vector<8x8xf32>
    %38 = tpu.matmul %36, %37, %cst_21 {dimension_numbers = #tpu.dot_dimension_numbers<[1], [0], [0], [1], [0, 0, 1, 1], [], []>} : vector<8x8xbf16>, vector<8x8xbf16>, vector<8x8xf32> -> vector<8x8xf32>
    %39 = vector.shape_cast %35 : vector<8x8xf32> to vector<1x8x8xf32>
    %40 = vector.extract_strided_slice %7 {offsets = [0, 8], sizes = [8, 8], strides = [1, 1]} : vector<8x32xbf16> to vector<8x8xbf16>
    %41 = vector.extract_strided_slice %16 {offsets = [0, 8], sizes = [8, 8], strides = [1, 1]} : vector<8x32xbf16> to vector<8x8xbf16>
    %cst_22 = arith.constant dense<0.000000e+00> : vector<8x8xf32>
    %42 = tpu.matmul %40, %41, %cst_22 {dimension_numbers = #tpu.dot_dimension_numbers<[1], [1], [0], [0], [0, 0, 1, 0], [], []>} : vector<8x8xbf16>, vector<8x8xbf16>, vector<8x8xf32> -> vector<8x8xf32>
    %cst_23 = arith.constant 0.353553385 : f32
    %43 = vector.broadcast %cst_23 : f32 to vector<8x8xf32>
    %44 = arith.mulf %42, %43 : vector<8x8xf32>
    %45 = vector.broadcast %19 : vector<1x8xf32> to vector<8x8xf32>
    %46 = arith.addf %44, %45 : vector<8x8xf32>
    %cst_24 = arith.constant dense<0xFF800000> : vector<8xf32>
    %47 = vector.multi_reduction <maximumf>, %46, %cst_24 [1] : vector<8x8xf32> to vector<8xf32>
    %48 = vector.shape_cast %47 : vector<8xf32> to vector<8x1xf32>
    %49 = vector.broadcast %48 : vector<8x1xf32> to vector<8x8xf32>
    %50 = arith.subf %46, %49 : vector<8x8xf32>
    %51 = math.exp %50 : vector<8x8xf32>
    %cst_25 = arith.constant dense<0.000000e+00> : vector<8xf32>
    %52 = vector.multi_reduction <add>, %51, %cst_25 [1] : vector<8x8xf32> to vector<8xf32>
    %53 = vector.shape_cast %52 : vector<8xf32> to vector<8x1xf32>
    %54 = vector.broadcast %53 : vector<8x1xf32> to vector<8x8xf32>
    %55 = arith.divf %51, %54 : vector<8x8xf32>
    %56 = arith.truncf %55 : vector<8x8xf32> to vector<8x8xbf16>
    %57 = vector.extract_strided_slice %17 {offsets = [0, 8], sizes = [8, 8], strides = [1, 1]} : vector<8x32xbf16> to vector<8x8xbf16>
    %cst_26 = arith.constant dense<0.000000e+00> : vector<8x8xf32>
    %58 = tpu.matmul %56, %57, %cst_26 {dimension_numbers = #tpu.dot_dimension_numbers<[1], [0], [0], [1], [0, 0, 1, 1], [], []>} : vector<8x8xbf16>, vector<8x8xbf16>, vector<8x8xf32> -> vector<8x8xf32>
    %59 = vector.shape_cast %55 : vector<8x8xf32> to vector<1x8x8xf32>
    %60 = vector.extract_strided_slice %7 {offsets = [0, 16], sizes = [8, 8], strides = [1, 1]} : vector<8x32xbf16> to vector<8x8xbf16>
    %61 = vector.extract_strided_slice %16 {offsets = [0, 16], sizes = [8, 8], strides = [1, 1]} : vector<8x32xbf16> to vector<8x8xbf16>
    %cst_27 = arith.constant dense<0.000000e+00> : vector<8x8xf32>
    %62 = tpu.matmul %60, %61, %cst_27 {dimension_numbers = #tpu.dot_dimension_numbers<[1], [1], [0], [0], [0, 0, 1, 0], [], []>} : vector<8x8xbf16>, vector<8x8xbf16>, vector<8x8xf32> -> vector<8x8xf32>
    %cst_28 = arith.constant 0.353553385 : f32
    %63 = vector.broadcast %cst_28 : f32 to vector<8x8xf32>
    %64 = arith.mulf %62, %63 : vector<8x8xf32>
    %65 = vector.broadcast %19 : vector<1x8xf32> to vector<8x8xf32>
    %66 = arith.addf %64, %65 : vector<8x8xf32>
    %cst_29 = arith.constant dense<0xFF800000> : vector<8xf32>
    %67 = vector.multi_reduction <maximumf>, %66, %cst_29 [1] : vector<8x8xf32> to vector<8xf32>
    %68 = vector.shape_cast %67 : vector<8xf32> to vector<8x1xf32>
    %69 = vector.broadcast %68 : vector<8x1xf32> to vector<8x8xf32>
    %70 = arith.subf %66, %69 : vector<8x8xf32>
    %71 = math.exp %70 : vector<8x8xf32>
    %cst_30 = arith.constant dense<0.000000e+00> : vector<8xf32>
    %72 = vector.multi_reduction <add>, %71, %cst_30 [1] : vector<8x8xf32> to vector<8xf32>
    %73 = vector.shape_cast %72 : vector<8xf32> to vector<8x1xf32>
    %74 = vector.broadcast %73 : vector<8x1xf32> to vector<8x8xf32>
    %75 = arith.divf %71, %74 : vector<8x8xf32>
    %76 = arith.truncf %75 : vector<8x8xf32> to vector<8x8xbf16>
    %77 = vector.extract_strided_slice %17 {offsets = [0, 16], sizes = [8, 8], strides = [1, 1]} : vector<8x32xbf16> to vector<8x8xbf16>
    %cst_31 = arith.constant dense<0.000000e+00> : vector<8x8xf32>
    %78 = tpu.matmul %76, %77, %cst_31 {dimension_numbers = #tpu.dot_dimension_numbers<[1], [0], [0], [1], [0, 0, 1, 1], [], []>} : vector<8x8xbf16>, vector<8x8xbf16>, vector<8x8xf32> -> vector<8x8xf32>
    %79 = vector.shape_cast %75 : vector<8x8xf32> to vector<1x8x8xf32>
    %80 = vector.extract_strided_slice %7 {offsets = [0, 24], sizes = [8, 8], strides = [1, 1]} : vector<8x32xbf16> to vector<8x8xbf16>
    %81 = vector.extract_strided_slice %16 {offsets = [0, 24], sizes = [8, 8], strides = [1, 1]} : vector<8x32xbf16> to vector<8x8xbf16>
    %cst_32 = arith.constant dense<0.000000e+00> : vector<8x8xf32>
    %82 = tpu.matmul %80, %81, %cst_32 {dimension_numbers = #tpu.dot_dimension_numbers<[1], [1], [0], [0], [0, 0, 1, 0], [], []>} : vector<8x8xbf16>, vector<8x8xbf16>, vector<8x8xf32> -> vector<8x8xf32>
    %cst_33 = arith.constant 0.353553385 : f32
    %83 = vector.broadcast %cst_33 : f32 to vector<8x8xf32>
    %84 = arith.mulf %82, %83 : vector<8x8xf32>
    %85 = vector.broadcast %19 : vector<1x8xf32> to vector<8x8xf32>
    %86 = arith.addf %84, %85 : vector<8x8xf32>
    %cst_34 = arith.constant dense<0xFF800000> : vector<8xf32>
    %87 = vector.multi_reduction <maximumf>, %86, %cst_34 [1] : vector<8x8xf32> to vector<8xf32>
    %88 = vector.shape_cast %87 : vector<8xf32> to vector<8x1xf32>
    %89 = vector.broadcast %88 : vector<8x1xf32> to vector<8x8xf32>
    %90 = arith.subf %86, %89 : vector<8x8xf32>
    %91 = math.exp %90 : vector<8x8xf32>
    %cst_35 = arith.constant dense<0.000000e+00> : vector<8xf32>
    %92 = vector.multi_reduction <add>, %91, %cst_35 [1] : vector<8x8xf32> to vector<8xf32>
    %93 = vector.shape_cast %92 : vector<8xf32> to vector<8x1xf32>
    %94 = vector.broadcast %93 : vector<8x1xf32> to vector<8x8xf32>
    %95 = arith.divf %91, %94 : vector<8x8xf32>
    %96 = arith.truncf %95 : vector<8x8xf32> to vector<8x8xbf16>
    %97 = vector.extract_strided_slice %17 {offsets = [0, 24], sizes = [8, 8], strides = [1, 1]} : vector<8x32xbf16> to vector<8x8xbf16>
    %cst_36 = arith.constant dense<0.000000e+00> : vector<8x8xf32>
    %98 = tpu.matmul %96, %97, %cst_36 {dimension_numbers = #tpu.dot_dimension_numbers<[1], [0], [0], [1], [0, 0, 1, 1], [], []>} : vector<8x8xbf16>, vector<8x8xbf16>, vector<8x8xf32> -> vector<8x8xf32>
    %99 = vector.shape_cast %95 : vector<8x8xf32> to vector<1x8x8xf32>
    %100 = tpu.concatenate %38, %58, %78, %98 in 1 : vector<8x8xf32>, vector<8x8xf32>, vector<8x8xf32>, vector<8x8xf32> -> vector<8x32xf32>
    %101 = tpu.concatenate %39, %59, %79, %99 in 0 : vector<1x8x8xf32>, vector<1x8x8xf32>, vector<1x8x8xf32>, vector<1x8x8xf32> -> vector<4x8x8xf32>
    %102 = arith.truncf %100 : vector<8x32xf32> to vector<8x32xbf16>
    %c0_37 = arith.constant 0 : index
    %c0_38 = arith.constant 0 : index
    %c0_39 = arith.constant 0 : index
    %103 = vector.load %arg8[%c0_37, %c0_38, %c0_39] : memref<1x8x32xbf16, #tpu.memory_space<vmem>>, vector<1x8x32xbf16>
    %104 = vector.shape_cast %103 : vector<1x8x32xbf16> to vector<8x32xbf16>
    %105 = vector.shape_cast %102 : vector<8x32xbf16> to vector<1x8x32xbf16>
    tpu.vector_store %arg8[%c0_37, %c0_38, %c0_39], %105 {strides = array<i32>} : memref<1x8x32xbf16, #tpu.memory_space<vmem>>, vector<1x8x32xbf16>,
    %c0_40 = arith.constant 0 : index
    %c0_41 = arith.constant 0 : index
    %c0_42 = arith.constant 0 : index
    %c0_43 = arith.constant 0 : index
    %106 = vector.load %arg9[%c0_40, %c0_41, %c0_42, %c0_43] : memref<1x4x8x8xf32, #tpu.memory_space<vmem>>, vector<1x4x8x8xf32>
    %107 = vector.shape_cast %106 : vector<1x4x8x8xf32> to vector<4x8x8xf32>
    %108 = vector.shape_cast %101 : vector<4x8x8xf32> to vector<1x4x8x8xf32>
    tpu.vector_store %arg9[%c0_40, %c0_41, %c0_42, %c0_43], %108 {strides = array<i32>} : memref<1x4x8x8xf32, #tpu.memory_space<vmem>>, vector<1x4x8x8xf32>,
    return
  }
  func.func @transform_0(%arg0: i32) -> (i32, i32, i32) {
    %c0_i32 = arith.constant 0 : i32
    %c0_i32_0 = arith.constant 0 : i32
    %c0_i32_1 = arith.constant 0 : i32
    return %arg0, %c0_i32, %c0_i32_0 : i32, i32, i32
  }
  func.func @transform_1(%arg0: i32) -> (i32, i32, i32) {
    %c0_i32 = arith.constant 0 : i32
    %c0_i32_0 = arith.constant 0 : i32
    %c0_i32_1 = arith.constant 0 : i32
    return %arg0, %c0_i32, %c0_i32_0 : i32, i32, i32
  }
  func.func @transform_2(%arg0: i32) -> (i32, i32) {
    %c0_i32 = arith.constant 0 : i32
    %c0_i32_0 = arith.constant 0 : i32
    %c0_i32_1 = arith.constant 0 : i32
    return %c0_i32, %c0_i32_0 : i32, i32
  }
  func.func @transform_3(%arg0: i32) -> (i32, i32) {
    %c0_i32 = arith.constant 0 : i32
    %c0_i32_0 = arith.constant 0 : i32
    %c0_i32_1 = arith.constant 0 : i32
    return %c0_i32, %c0_i32_0 : i32, i32
  }
  func.func @transform_4(%arg0: i32) -> (i32, i32) {
    %c0_i32 = arith.constant 0 : i32
    %c0_i32_0 = arith.constant 0 : i32
    %c0_i32_1 = arith.constant 0 : i32
    return %c0_i32, %c0_i32_0 : i32, i32
  }
  func.func @transform_5(%arg0: i32) -> (i32, i32) {
    %c0_i32 = arith.constant 0 : i32
    %c0_i32_0 = arith.constant 0 : i32
    %c0_i32_1 = arith.constant 0 : i32
    return %c0_i32, %c0_i32_0 : i32, i32
  }
  func.func @transform_6(%arg0: i32) -> (i32, i32, i32) {
    %c0_i32 = arith.constant 0 : i32
    %c0_i32_0 = arith.constant 0 : i32
    %c0_i32_1 = arith.constant 0 : i32
    return %arg0, %c0_i32, %c0_i32_0 : i32, i32, i32
  }
  func.func @transform_7(%arg0: i32) -> (i32, i32, i32) {
    %c0_i32 = arith.constant 0 : i32
    %c0_i32_0 = arith.constant 0 : i32
    %c0_i32_1 = arith.constant 0 : i32
    return %arg0, %c0_i32, %c0_i32_0 : i32, i32, i32
  }
  func.func @transform_8(%arg0: i32) -> (i32, i32, i32, i32) {
    %c0_i32 = arith.constant 0 : i32
    %c0_i32_0 = arith.constant 0 : i32
    %c0_i32_1 = arith.constant 0 : i32
    %c0_i32_2 = arith.constant 0 : i32
    return %arg0, %c0_i32, %c0_i32_0, %c0_i32_1 : i32, i32, i32, i32
  }
}

module attributes {stable_mosaic.version = 11 : i64} {
  func.func @_fc_logsoftmax_kernel(%arg0: i32, %arg1: memref<16x32xbf16, #tpu.memory_space<vmem>>, %arg2: memref<32x64xbf16, #tpu.memory_space<vmem>>, %arg3: memref<1x64xf32, #tpu.memory_space<vmem>>, %arg4: memref<16x64xf32, #tpu.memory_space<vmem>>) attributes {dimension_semantics = [#tpu.dimension_semantics<parallel>], iteration_bounds = array<i64: 1>, scalar_prefetch = 0 : i64, scratch_operands = 0 : i64, tpu.core_type = #tpu.core_type<tc>, window_params = [{transform_indices = @transform_0, window_bounds = array<i64: 16, 32>}, {pipeline_mode = #tpu.pipeline_mode<synchronous>, transform_indices = @transform_1, window_bounds = array<i64: 32, 64>}, {pipeline_mode = #tpu.pipeline_mode<synchronous>, transform_indices = @transform_2, window_bounds = array<i64: 1, 64>}, {transform_indices = @transform_3, window_bounds = array<i64: 16, 64>}]} {
    %c0 = arith.constant 0 : index
    %c0_0 = arith.constant 0 : index
    %0 = vector.load %arg1[%c0, %c0_0] : memref<16x32xbf16, #tpu.memory_space<vmem>>, vector<16x32xbf16>
    %c0_1 = arith.constant 0 : index
    %c0_2 = arith.constant 0 : index
    %1 = vector.load %arg2[%c0_1, %c0_2] : memref<32x64xbf16, #tpu.memory_space<vmem>>, vector<32x64xbf16>
    %cst = arith.constant dense<0.000000e+00> : vector<16x64xf32>
    %2 = tpu.matmul %0, %1, %cst {dimension_numbers = #tpu.dot_dimension_numbers<[1], [0], [0], [1], [0, 0, 1, 1], [], []>} : vector<16x32xbf16>, vector<32x64xbf16>, vector<16x64xf32> -> vector<16x64xf32>
    %c0_3 = arith.constant 0 : index
    %c0_4 = arith.constant 0 : index
    %3 = vector.load %arg3[%c0_3, %c0_4] : memref<1x64xf32, #tpu.memory_space<vmem>>, vector<1x64xf32>
    %4 = vector.broadcast %3 : vector<1x64xf32> to vector<16x64xf32>
    %5 = arith.addf %2, %4 : vector<16x64xf32>
    %cst_5 = arith.constant dense<0xFF800000> : vector<16xf32>
    %6 = vector.multi_reduction <maximumf>, %5, %cst_5 [1] : vector<16x64xf32> to vector<16xf32>
    %7 = vector.shape_cast %6 : vector<16xf32> to vector<16x1xf32>
    %8 = vector.broadcast %7 : vector<16x1xf32> to vector<16x64xf32>
    %9 = arith.subf %5, %8 : vector<16x64xf32>
    %10 = math.exp %9 : vector<16x64xf32>
    %cst_6 = arith.constant dense<0.000000e+00> : vector<16xf32>
    %11 = vector.multi_reduction <add>, %10, %cst_6 [1] : vector<16x64xf32> to vector<16xf32>
    %12 = vector.shape_cast %11 : vector<16xf32> to vector<16x1xf32>
    %13 = math.log %12 : vector<16x1xf32>
    %14 = vector.broadcast %13 : vector<16x1xf32> to vector<16x64xf32>
    %15 = arith.subf %9, %14 : vector<16x64xf32>
    %c0_7 = arith.constant 0 : index
    %c0_8 = arith.constant 0 : index
    %16 = vector.load %arg4[%c0_7, %c0_8] : memref<16x64xf32, #tpu.memory_space<vmem>>, vector<16x64xf32>
    tpu.vector_store %arg4[%c0_7, %c0_8], %15 {strides = array<i32>} : memref<16x64xf32, #tpu.memory_space<vmem>>, vector<16x64xf32>,
    return
  }
  func.func @transform_0(%arg0: i32) -> (i32, i32) {
    %c0_i32 = arith.constant 0 : i32
    %c0_i32_0 = arith.constant 0 : i32
    return %arg0, %c0_i32 : i32, i32
  }
  func.func @transform_1(%arg0: i32) -> (i32, i32) {
    %c0_i32 = arith.constant 0 : i32
    %c0_i32_0 = arith.constant 0 : i32
    %c0_i32_1 = arith.constant 0 : i32
    return %c0_i32, %c0_i32_0 : i32, i32
  }
  func.func @transform_2(%arg0: i32) -> (i32, i32) {
    %c0_i32 = arith.constant 0 : i32
    %c0_i32_0 = arith.constant 0 : i32
    %c0_i32_1 = arith.constant 0 : i32
    return %c0_i32, %c0_i32_0 : i32, i32
  }
  func.func @transform_3(%arg0: i32) -> (i32, i32) {
    %c0_i32 = arith.constant 0 : i32
    %c0_i32_0 = arith.constant 0 : i32
    return %arg0, %c0_i32 : i32, i32
  }
}

</mosaic_0001>

<bundles_post_ra>
// kernel: tpu_custom_call.1
= control target key start
LH: loop header
LB: loop body
LE: loop exit
PB: predicated region body
PF: predicated region fallthrough
CT: control target
= control target key end

     0   :  { %7 = vsyncpa [#allocation3], 0  ;;  %s690_s0 = inlined_call_operand.hbm [shape: f32[16,128], index: 0, kind: input, shape index: {}]   ;;  %s691_s1 = inlined_call_operand.hbm [shape: f32[8,128], index: 1, kind: input, shape index: {}]   ;;  %s692_s2 = inlined_call_operand.hbm [shape: f32[16,128], index: 2, kind: output, shape index: {}]  }
   0x1   :  { %9 = vsyncpa [#allocation3 + $0x1], 0 }
   0x2   :  { %10 = vsyncpa [#allocation6], 0 }
   0x3   :  { %11 = vsyncpa [#allocation4], 0 }
   0x4   :  { %13 = vsyncpa [#allocation4 + $0x1], 0  ;;  %s489_s9 = smov 0   ;;  %s491_s10 = smov 0  }
   0x5   :  { %s493_s11 = smov 0   ;;  %s495_s12 = smov 0  }
   0x6 LB: > { %s510_s13 = sadd.s32 4294967295, %s469_s12   ;;  %s270_s14 = sadd.s32 4294967294, %s469_s12   ;;  %s469_s12 = sphi %s495_s12, %s716_s12   ;;  %s465_s11 = sphi %s493_s11, %s715_s11   ;;  %s461_s10 = sphi %s491_s10, %s714_s10   ;;  %s457_s9 = sphi %s489_s9, %s713_s9  }
   0x7   : > { %p39_p0 = scmp.ne.s32.totalorder %s461_s10, %s457_s9  ;;  %p693_p1 = scmp.eq.s32.totalorder %s510_s13, 0 }
   0x8   : > { %p90_p3 = scmp.eq.s32.totalorder %s270_s14, 1  ;;  %p271_p5 = scmp.ge.s32.totalorder %s469_s12, 1 }
   0x9   : > { %p519_p4 = por %p693_p1, %p39_p0  ;;  %p97_p7 = scmp.lt.s32.totalorder %s469_s12, 3 }
   0xa   : > { %p524_p6 = por %p90_p3, %p39_p0  ;;  %s471_s18 = smov [#allocation5]  }
   0xb   : > { %s696_s15 = scalar_select %p519_p4, 1, 0 }
   0xc   : > { %s697_s16 = scalar_select %p524_p6, 1, 0 }
   0xd   : > { %p529_p8 = pnand %p271_p5, %p97_p7  ;;  %s110_s19 = sshll.u32 %s471_s18, 4  ;;  %s111_s19 = int_to_ptr.vmem [resolvable:$true] %s110_s19 }
   0xe   : > { %s537_s20 = sadd.s32 1, %s469_s12   ;;  %s26_s24 = sadd.s32 1, %s465_s11 }
   0xf   : > { %s698_s17 = scalar_select %p529_p8, 1, 0 }
  0x10   : > { %p292_p10 = pneg %p529_p8  ;;  %s23_s22 = ssub.s32 %s469_s12, %s537_s20 }
  0x11   : > { %p547_p12 = scmp.eq.s32.totalorder %s23_s22, 0  ;;  %s341_s27 = scalar_lea.hbm %s691_s1, 128 }
  0x12   : > { %p541_p11 = pnand %p292_p10, %p693_p1  ;;  %p342_p0 = scmp.ne.s32.totalorder %s691_s1, %s341_s27 }
  0x13   : > { %s700_s23 = scalar_select %p547_p12, 1, 0 }
  0x14   : > { %p343_p3 = pneg %p541_p11  ;;  %p348_p10 = scmp.lt.u32.totalorder %s341_s27, %s691_s1 }
  0x16   : > { %p344_p5 = pnand %p343_p3, %p342_p0 }
  0x18   : > { %p345_p7 = pneg %p344_p5 }
  0x1a   : > { %p350_p9 = pnand %p348_p10, %p345_p7 }
  0x1c   : > { %353 = shalt.err (!%p350_p9)
}
  0x1d   : > { %s354_s4 = scalar_lea.vmem %s111_s19, 128  ;;  %p362_p6 = scmp.lt.s32.totalorder %s111_s19, %s111_s19 }
  0x1e   : > { %p355_p1 = scmp.ne.s32.totalorder %s111_s19, %s354_s4  ;;  %p363_p4 = scmp.lt.s32.totalorder %s354_s4, %s354_s4 }
  0x20   : > { %p357_p2 = pnand %p355_p1, %p343_p3  ;;  %p364_p8 = por %p363_p4, %p362_p6 }
  0x22   : > { %p358_p13 = pneg %p357_p2 }
  0x24   : > { %p365_p12 = pnand %p364_p8, %p358_p13 }
  0x26   : > { %368 = shalt.err (!%p365_p12)
}
  0x27   : > { %295 = dma.hbm_to_vmem [thread:$0]  (!%p541_p11), %s691_s1, 128, %s111_s19, [#allocation6]  }
  0x28   : > { %p701_p1 = scmp.ne.s32.totalorder %s700_s23, 0  ;;  %p34_p2 = scmp.eq.s32.totalorder %s469_s12, 0 }
  0x29   : > { %p702_p4 = scmp.ne.s32.totalorder %s465_s11, %s461_s10  ;;  %p703_p6 = scmp.eq.s32.totalorder %s510_s13, 1 }
  0x2a   : > { %s573_s7 = scalar_select %p701_p1, %s465_s11, %s26_s24  }
  0x2b   : > { %p581_p8 = por %p703_p6, %p702_p4  ;;  %p305_p9 = scmp.lt.s32.totalorder %s469_s12, 2 }
  0x2c   : > { %s121_s14 = sand.u32 1, %s465_s11   ;;  %p705_p12 = pmov %p702_p4 }
  0x2d   : > { %s274_s18 = sshll.u32 %s121_s14, 3  ;;  %s275_s21 = sshll.u32 %s469_s12, 7 }
  0x2e   : > { %p35_p13 = por %p34_p2, %p705_p12  ;;  %s594_s19 = scalar_lea.hbm %s690_s0, %s275_s21 }
  0x2f   : > { %s125_s23 = scalar_lea.vmem [#allocation2], %s274_s18  ;;  %s122_s27 = scalar_lea.sflag [#allocation3], %s121_s14 }
  0x30   : > { %s132_s24 = sshll.u32 %s125_s23, 4  ;;  %p596_p11 = pnand %p305_p9, %p35_p13  ;;  %s600_s24 = int_to_ptr.vmem [resolvable:$true] %s132_s24 }
  0x31   : > { %s369_s28 = scalar_lea.hbm %s594_s19, 128  ;;  %s374_s3 = scalar_lea.hbm %s690_s0, 256 }
  0x32   : > { %p370_p0 = scmp.ne.s32.totalorder %s594_s19, %s369_s28  ;;  %p371_p3 = pneg %p596_p11 }
  0x33   : > { %p375_p10 = scmp.lt.u32.totalorder %s594_s19, %s690_s0  ;;  %p376_p1 = scmp.lt.u32.totalorder %s374_s3, %s369_s28 }
  0x34   : > { %p372_p5 = pnand %p371_p3, %p370_p0  ;;  %p378_p4 = scmp.lt.u32.totalorder %s369_s28, %s594_s19 }
  0x35   : > { %p377_p2 = por %p376_p1, %p375_p10 }
  0x36   : > { %p373_p7 = pneg %p372_p5 }
  0x37   : > { %p379_p6 = por %p378_p4, %p377_p2 }
  0x39   : > { %p380_p9 = pnand %p379_p6, %p373_p7 }
  0x3b   : > { %383 = shalt.err (!%p380_p9)
}
  0x3c   : > { %s384_s6 = scalar_lea.vmem %s600_s24, 128  ;;  %s472_s14 = smov [#allocation2]  }
  0x3d   : > { %p385_p12 = scmp.ne.s32.totalorder %s600_s24, %s384_s6  ;;  %s389_s18 = sshll.u32 %s472_s14, 4  ;;  %s390_s18 = int_to_ptr.vmem [resolvable:$false] %s389_s18 }
  0x3e   : > { %s391_s21 = scalar_lea.vmem %s390_s18, 256  ;;  %p392_p5 = scmp.lt.s32.totalorder %s600_s24, %s390_s18 }
  0x3f   : > { %p387_p13 = pnand %p385_p12, %p371_p3  ;;  %p393_p10 = scmp.lt.s32.totalorder %s391_s21, %s384_s6 }
  0x41   : > { %p388_p0 = pneg %p387_p13  ;;  %p394_p1 = por %p393_p10, %p392_p5 }
  0x43   : > { %p395_p2 = pnand %p394_p1, %p388_p0 }
  0x45   : > { %398 = shalt.err (!%p395_p2)
}
  0x46   : > { %299 = dma.hbm_to_vmem [thread:$0]  (!%p596_p11), %s594_s19, 128, %s600_s24, %s122_s27  }
  0x47   : > { %p707_p7 = scmp.ne.s32.totalorder %s698_s17, 0 }
  0x48   : > { %s630_s22 = sand.u32 (!%p707_p7), 1, %s461_s10   ;;  %p708_p3 = scmp.ne.s32.totalorder (!%p707_p7), %s696_s15, 0 }
  0x49   : > { %141 = sbr.rel (%p707_p7) target bundleno = 109 (0x6d), region = 28  ;;  %s277_s25 = sshll.u32 (!%p707_p7), %s630_s22, 3 }
  0x4a   : > { %s144_s23 = scalar_lea.sflag (!%p707_p7), [#allocation3], %s630_s22  ;;  %s147_s28 = scalar_lea.vmem (!%p707_p7), [#allocation2], %s277_s25 }
  0x50   : > { %444 = dma.done.wait (%p708_p3), %s144_s23, 128  }
  0x51   : > { %446 = vsyncadd (%p708_p3), %s144_s23, 4294967168  ;;  %p709_p4 = scmp.eq.s32.totalorder %s510_s13, 0 }
  0x53   : > { %448 = dma.done.wait (%p709_p4), [#allocation6], 128   ;;  %p710_p11 = pmov %p709_p4 }
  0x54   : > { %s171_s17 = scalar_lea.vmem [#allocation7], %s277_s25  ;;  %s281_s24 = sshll.u32 %s510_s13, 7  ;;  %v172_v0 = vld [vmem:[%s147_s28] sm:$0xff]  ;;  %v173_v1 = vld [vmem:[#allocation5] sm:$0xff] }
  0x55   : > { %450 = vsyncadd (%p710_p11), [#allocation6], 4294967168  ;;  %s190_s19 = sshll.u32 %s171_s17, 4  ;;  %v174_v2 = vadd.f32 %v173_v1, %v172_v0  ;;  %s648_s27 = scalar_lea.hbm %s692_s2, %s281_s24  ;;  %s643_s19 = int_to_ptr.vmem [resolvable:$true] %s190_s19 }
  0x56   : > { %s177_s29 = scalar_lea.sflag [#allocation4], %s630_s22  ;;  %s399_s30 = scalar_lea.vmem %s643_s19, 128 }
  0x57   : > { %175 = vst [vmem:[%s171_s17] sm:$0xff] %v174_v2  ;;  %p400_p6 = scmp.ne.s32.totalorder %s643_s19, %s399_s30  ;;  %s473_s13 = smov [#allocation7]  }
  0x58   : > { %s403_s3 = sshll.u32 %s473_s13, 4  ;;  %s404_s3 = int_to_ptr.vmem [resolvable:$false] %s403_s3 }
  0x59   : > { %p401_p9 = pnand %p400_p6, %p581_p8  ;;  %s405_s4 = scalar_lea.vmem %s404_s3, 256 }
  0x5a   : > { %p406_p13 = scmp.lt.s32.totalorder %s643_s19, %s404_s3  ;;  %p407_p0 = scmp.lt.s32.totalorder %s405_s4, %s399_s30 }
  0x5b   : > { %p402_p12 = pneg %p401_p9 }
  0x5c   : > { %p408_p5 = por %p407_p0, %p406_p13 }
  0x5e   : > { %p409_p10 = pnand %p408_p5, %p402_p12 }
  0x60   : > { %412 = shalt.err (!%p409_p10)
}
  0x61   : > { %s413_s5 = scalar_lea.hbm %s648_s27, 128  ;;  %s417_s18 = scalar_lea.hbm %s692_s2, 256 }
  0x62   : > { %p414_p1 = scmp.ne.s32.totalorder %s648_s27, %s413_s5  ;;  %p418_p3 = scmp.lt.u32.totalorder %s648_s27, %s692_s2 }
  0x63   : > { %p419_p4 = scmp.lt.u32.totalorder %s417_s18, %s413_s5  ;;  %p421_p6 = scmp.lt.u32.totalorder %s413_s5, %s648_s27 }
  0x64   : > { %p415_p2 = pnand %p414_p1, %p581_p8 }
  0x65   : > { %p420_p11 = por %p419_p4, %p418_p3 }
  0x66   : > { %p416_p7 = pneg %p415_p2 }
  0x67   : > { %p422_p9 = por %p421_p6, %p420_p11 }
  0x69   : > { %p423_p12 = pnand %p422_p9, %p416_p7 }
  0x6b   : > { %426 = shalt.err (!%p423_p12)
}
  0x6c   : > { %290 = dma.vmem_to_hbm [thread:$0]  (%p581_p8), %s643_s19, 128, %s648_s27, %s177_s29  }
  0x6d PF: > { %s202_s25 = sand.u32 1, %s457_s9   ;;  %p711_p13 = scmp.ne.s32.totalorder %s697_s16, 0 }
  0x6e   : > { %p712_p0 = scmp.ge.s32.totalorder %s469_s12, 2  ;;  %s203_s23 = scalar_lea.sflag [#allocation4], %s202_s25 }
  0x70   : > { %p301_p5 = pnand %p712_p0, %p711_p13 }
  0x72   : > { %452 = dma.done.wait (!%p301_p5), %s203_s23, 128  }
  0x73   : > { %454 = vsyncadd (!%p301_p5), %s203_s23, 4294967168  ;;  %p16_p10 = scmp.ge.s32.totalorder %s537_s20, 4   ;;  %s713_s9 = smov %s461_s10 }
  0x74   : > { %s714_s10 = smov %s465_s11  ;;  %s715_s11 = smov %s573_s7 }
  0x75   : > { %s716_s12 = smov %s537_s20  ;;  %18 = sbr.rel (!%p16_p10) target bundleno = 6 (0x6), region = 77 }
  0x7c   :  { %208 = vsyncpa [#allocation3], 1 }
  0x7d   :  { %210 = vsyncpa [#allocation3 + $0x1], 1 }
  0x7e   :  { %211 = vsyncpa [#allocation6], 1 }
  0x7f   :  { %212 = vsyncpa [#allocation4], 1 }
  0x80   :  { %214 = vsyncpa [#allocation4 + $0x1], 1 }

// kernel: tpu_custom_call.1
= control target key start
LH: loop header
LB: loop body
LE: loop exit
PB: predicated region body
PF: predicated region fallthrough
CT: control target
= control target key end

     0   :  { %7 = vsyncpa [#allocation3], 0  ;;  %s1433_s0 = inlined_call_operand.hbm [shape: bf16[8,32], index: 0, kind: input, shape index: {}]   ;;  %s1434_s1 = inlined_call_operand.hbm [shape: bf16[8,64], index: 1, kind: input, shape index: {}]   ;;  %s1435_s2 = inlined_call_operand.hbm [shape: bf16[8,32], index: 2, kind: output, shape index: {}]  }
   0x1   :  { %8 = vsyncpa [#allocation6], 0 }
   0x2   :  { %9 = vsyncpa [#allocation4], 0  ;;  %s1232_s9 = smov [#allocation2]   ;;  %s1233_s11 = smov [#allocation5]  }
   0x3   :  { %s16_s10 = sshll.u32 %s1232_s9, 4  ;;  %s26_s12 = sshll.u32 %s1233_s11, 4  ;;  %s17_s10 = int_to_ptr.vmem [resolvable:$true] %s16_s10  ;;  %s27_s12 = int_to_ptr.vmem [resolvable:$true] %s26_s12 }
   0x4   :  { %s1160_s15 = scalar_lea.hbm %s1433_s0, 64 }
   0x5   :  { %p1161_p0 = scmp.ne.s32.totalorder %s1433_s0, %s1160_s15  ;;  %p1164_p1 = scmp.lt.u32.totalorder %s1160_s15, %s1433_s0 }
   0x7   :  { %p1166_p2 = pnand %p1164_p1, %p1161_p0 }
   0x9   :  { %1169 = shalt.err (!%p1166_p2)
}
   0xa   :  { %s1170_s20 = scalar_lea.vmem %s17_s10, 64  ;;  %p1175_p4 = scmp.lt.s32.totalorder %s17_s10, %s17_s10 }
   0xb   :  { %p1171_p3 = scmp.ne.s32.totalorder %s17_s10, %s1170_s20  ;;  %p1176_p5 = scmp.lt.s32.totalorder %s1170_s20, %s1170_s20 }
   0xd   :  { %p1177_p6 = por %p1176_p5, %p1175_p4 }
   0xf   :  { %p1178_p7 = pnand %p1177_p6, %p1171_p3 }
  0x11   :  { %1181 = shalt.err (!%p1178_p7)
}
  0x12   :  { %19 = dma.hbm_to_vmem [thread:$0]  %s1433_s0, 64, %s17_s10, [#allocation3]  }
  0x13   :  { %s1182_s25 = scalar_lea.hbm %s1434_s1, 64 }
  0x14   :  { %p1183_p8 = scmp.ne.s32.totalorder %s1434_s1, %s1182_s25  ;;  %p1186_p9 = scmp.lt.u32.totalorder %s1182_s25, %s1434_s1 }
  0x16   :  { %p1188_p10 = pnand %p1186_p9, %p1183_p8 }
  0x18   :  { %1191 = shalt.err (!%p1188_p10)
}
  0x19   :  { %s1192_s30 = scalar_lea.vmem %s27_s12, 64  ;;  %p1197_p12 = scmp.lt.s32.totalorder %s27_s12, %s27_s12 }
  0x1a   :  { %p1193_p11 = scmp.ne.s32.totalorder %s27_s12, %s1192_s30  ;;  %p1198_p13 = scmp.lt.s32.totalorder %s1192_s30, %s1192_s30 }
  0x1c   :  { %p1199_p0 = por %p1198_p13, %p1197_p12 }
  0x1e   :  { %p1200_p1 = pnand %p1199_p0, %p1193_p11 }
  0x20   :  { %1203 = shalt.err (!%p1200_p1)
}
  0x21   :  { %29 = dma.hbm_to_vmem [thread:$0]  %s1434_s1, 64, %s27_s12, [#allocation6]  }
  0x22   :  { %1226 = dma.done.wait [#allocation3], 64  }
  0x23   :  { %1227 = vsyncadd [#allocation3], 4294967232 }
  0x24   :  { %1228 = dma.done.wait [#allocation6], 64  }
  0x25   :  { %1229 = vsyncadd [#allocation6], 4294967232  ;;  %v37_v0 = vld [vmem:[#allocation5] sm:$0xf]  ;;  %s1234_s4 = smov 104   ;;  %s1235_s5 = smov 120   ;;  %v62_v5 = vlaneseq }
  0x26   :  { %193 = vrot.lane.b32.xlu1 %v37_v0, %s1234_s4  ;;  %189 = vrot.lane.b32.xlu0 %v37_v0, %s1235_s5  ;;  %v38_v1 = vld [vmem:[#allocation2] sm:$0xf]  ;;  %s1236_s6 = smov 112   ;;  %v1237_v2 = vmov 0.0   ;;  %s1238_s1 = smov 96   ;;  %vm1239_vm0 = vmmov 0  }
  0x27   :  { %1089 = vmatprep.subr.bf16.mxu0 %v1237_v2  ;;  %1095 = vmatprep.subr.bf16.mxu1 %v1237_v2  ;;  %v1240_v3 = vmov 1983009808   ;;  %v63_v7 = vshrl.u32 %v62_v5, 7  ;;  %v1241_v8 = vmov 1934713408   ;;  %v198_v12 = vshrl.u32 %v37_v0, 16 }
  0x28   :  { %1091 = vmatprep.mubr.msk.bf16.mxu0 %vm1239_vm0, %v1237_v2  ;;  %1097 = vmatprep.mubr.msk.bf16.mxu1 %vm1239_vm0, %v1237_v2  ;;  %v60_v4 = vunpack.c.l.s4 %v1240_v3  ;;  %v77_v9 = vunpack.c.l.s4 %v1241_v8  ;;  %v49_v21 = vshrl.u32 %v38_v1, 16  ;;  %vm487_vm1 = vcmask 64512   ;;  %s1243_s7 = smov 16   ;;  %s1244_s8 = smov 8  }
  0x29   :  { %vm703_vm2 = vcmask 1043456   ;;  %s1245_s9 = smov 24   ;;  %vm1034_vm3 = vcmask 130048   ;;  %vm1036_vm4 = vcmask 195584   ;;  %s1246_s10 = smov [#allocation7]   ;;  %vm1039_vm5 = vcmask 257024  }
  0x2a   :  { %40 = vrot.lane.b32.xlu1 %v38_v1, %s1235_s5  ;;  %191 = vrot.lane.b32.xlu0 %v37_v0, %s1236_s6  ;;  %v61_v6 = vunpack.c.0.s8 %v60_v4  ;;  %v78_v16 = vunpack.c.0.s8 %v77_v9  ;;  %s1047_s11 = sshll.u32 %s1246_s10, 4  ;;  %s1048_s11 = int_to_ptr.vmem [resolvable:$true] %s1047_s11 }
  0x2b   :  { %s1204_s12 = scalar_lea.vmem %s1048_s11, 64  ;;  %p1209_p3 = scmp.lt.s32.totalorder %s1048_s11, %s1048_s11 }
  0x2c   :  { %v1296_v14 = vsub.s32 %v61_v6, %v63_v7  ;;  %v1305_v27 = vsub.s32 %v78_v16, %v63_v7  ;;  %p1205_p2 = scmp.ne.s32.totalorder %s1048_s11, %s1204_s12  ;;  %p1210_p4 = scmp.lt.s32.totalorder %s1204_s12, %s1204_s12 }
  0x2e   :  { %44 = vrot.lane.b32.xlu1 %v38_v1, %s1234_s4  ;;  %42 = vrot.lane.b32.xlu0 %v38_v1, %s1236_s6  ;;  %p1211_p5 = por %p1210_p4, %p1209_p3 }
  0x30   :  { %p1212_p6 = pnand %p1211_p5, %p1205_p2 }
  0x32   :  { %337 = vrot.lane.b32.xlu0 %v37_v0, %s1238_s1 }
  0x98   :  { %v1293_v10 = vpop.permute.xlu1 %193  ;;  %v190_v11 = vpop.permute.xlu0 %189 }
  0x99   :  { %v199_v13 = vshrl.u32 %v190_v11, 16  ;;  %339 = vrot.lane.b32.xlu1 %v190_v11, %s1238_s1  ;;  %v197_v15 = vpack.i.b16 %v190_v11, %v37_v0  ;;  %v205_v17 = vshrl.u32 %v1293_v10, 16 }
  0x9b   :  { %v200_v18 = vpack.i.b16 %v199_v13, %v198_v12  ;;  %v214_v26 = vrot.slane %v197_v15, %v1296_v14 }
  0x9c   :  { %v41_v19 = vpop.permute.xlu1 %40  ;;  %v1299_v20 = vpop.permute.xlu0 %191 }
  0x9d   :  { %v50_v22 = vshrl.u32 %v41_v19, 16  ;;  %v203_v23 = vpack.i.b16 %v1293_v10, %v1299_v20  ;;  %v48_v24 = vpack.i.b16 %v41_v19, %v38_v1  ;;  %v204_v25 = vshrl.u32 %v1299_v20, 16 }
  0x9e   :  { %v248_v29 = vrot.slane %v200_v18, %v1296_v14 }
  0x9f   :  { %v222_v28 = vrot.slane %v203_v23, %v1296_v14  ;;  %v206_v30 = vpack.i.b16 %v205_v17, %v204_v25  ;;  %v51_v33 = vpack.i.b16 %v50_v22, %v49_v21  ;;  %v65_v37 = vrot.slane %v48_v24, %v1296_v14 }
  0xa0   :  { %v45_v31 = vpop.permute.xlu1 %44  ;;  %v43_v32 = vpop.permute.xlu0 %42  ;;  %v1242_v23 = vmov 0  }
  0xa1   :  { %v223_v34 = vcombine.low %v214_v26, %v222_v28  ;;  %v224_v35 = vcombine.high %v214_v26, %v222_v28  ;;  %v56_v36 = vshrl.u32 %v45_v31, 16  ;;  %v256_v38 = vrot.slane %v206_v30, %v1296_v14 }
  0xa2   :  { %v54_v39 = vpack.i.b16 %v45_v31, %v43_v32  ;;  %v55_v40 = vshrl.u32 %v43_v32, 16  ;;  %v99_v47 = vrot.slane %v51_v33, %v1296_v14 }
  0xa3   :  { %v231_v41 = vrot.slane %v223_v34, %v1305_v27  ;;  %v238_v42 = vrot.slane %v224_v35, %v1305_v27  ;;  %v257_v43 = vcombine.low %v248_v29, %v256_v38  ;;  %v258_v44 = vcombine.high %v248_v29, %v256_v38 }
  0xa4   :  { %v57_v45 = vpack.i.b16 %v56_v36, %v55_v40  ;;  %v73_v46 = vrot.slane %v54_v39, %v1296_v14 }
  0xa5   :  { %v275_v48 = vcombine.low %v231_v41, %v238_v42  ;;  %v1059_v49 = vcombine.high %v231_v41, %v238_v42  ;;  %v265_v50 = vrot.slane %v257_v43, %v1305_v27  ;;  %v272_v51 = vrot.slane %v258_v44, %v1305_v27 }
  0xa6   :  { %v74_v52 = vcombine.low %v65_v37, %v73_v46  ;;  %v75_v53 = vcombine.high %v65_v37, %v73_v46  ;;  %v107_v54 = vrot.slane %v57_v45, %v1296_v14 }
  0xa7   :  { %v282_v55 = vrot.slane %v275_v48, %v1296_v14  ;;  %v290_v56 = vrot.slane %v1059_v49, %v1296_v14  ;;  %v300_v59 = vcombine.low %v265_v50, %v272_v51  ;;  %v1060_v60 = vcombine.high %v265_v50, %v272_v51 }
  0xa8   :  { %v82_v57 = vrot.slane %v74_v52, %v1305_v27  ;;  %v89_v58 = vrot.slane %v75_v53, %v1305_v27  ;;  %v108_v61 = vcombine.low %v99_v47, %v107_v54  ;;  %v109_v62 = vcombine.high %v99_v47, %v107_v54 }
  0xa9   :  { %v291_v63 = vcombine.low %v282_v55, %v290_v56  ;;  %v307_v3 = vrot.slane %v300_v59, %v1296_v14  ;;  %v315_v4 = vrot.slane %v1060_v60, %v1296_v14 }
  0xaa   :  { %v126_v0 = vcombine.low %v82_v57, %v89_v58  ;;  %v1057_v1 = vcombine.high %v82_v57, %v89_v58  ;;  %v116_v5 = vrot.slane %v108_v61, %v1305_v27  ;;  %v123_v6 = vrot.slane %v109_v62, %v1305_v27 }
  0xab   :  { %v298_v7 = vrot.slane %v291_v63, %v1305_v27  ;;  %v316_v11 = vcombine.low %v307_v3, %v315_v4 }
  0xac   :  { %v133_v8 = vrot.slane %v126_v0, %v1296_v14  ;;  %v141_v9 = vrot.slane %v1057_v1, %v1296_v14  ;;  %v151_v12 = vcombine.low %v116_v5, %v123_v6  ;;  %v1058_v13 = vcombine.high %v116_v5, %v123_v6  ;;  %v338_v6 = vpop.permute.xlu0 %337 }
  0xad   :  { %v323_v15 = vrot.slane %v316_v11, %v1305_v27  ;;  %v328_v18 = vshrl.u32 %v298_v7, 16  ;;  %v299_v29 = vcombine.high %v298_v7, %v1242_v23 }
  0xae   :  { %v158_v16 = vrot.slane %v151_v12, %v1296_v14  ;;  %v166_v17 = vrot.slane %v1058_v13, %v1296_v14  ;;  %v142_v19 = vcombine.low %v133_v8, %v141_v9  ;;  %v348_v12 = vshrl.u32 %v338_v6, 16 }
  0xaf   :  { %v327_v21 = vpack.i.b16 %v323_v15, %v298_v7  ;;  %v329_v22 = vshrl.u32 %v323_v15, 16  ;;  %v324_v24 = vcombine.high %v323_v15, %v1242_v23  ;;  %v334_v36 = vshrl.u32 %v299_v29, 16 }
  0xb0   :  { %v167_v25 = vcombine.low %v158_v16, %v166_v17  ;;  %v149_v32 = vrot.slane %v142_v19, %v1305_v27 }
  0xb1   :  { %v492_v26 = vsel %vm487_vm1, %v327_v21, 0  ;;  %v330_v28 = vpack.i.b16 %v329_v22, %v328_v18  ;;  %v335_v33 = vshrl.u32 %v324_v24, 16  ;;  %v333_v34 = vpack.i.b16 %v324_v24, %v299_v29 }
  0xb2   :  { %1090 = vmatpush3.bf16.xpose.msra.mxu0 %v492_v26  ;;  %v174_v30 = vrot.slane %v167_v25, %v1305_v27  ;;  %v179_v38 = vshrl.u32 %v149_v32, 16  ;;  %v150_v44 = vcombine.high %v149_v32, %v1242_v23 }
  0xb3   :  { %v538_v31 = vsel %vm487_vm1, %v330_v28, 0  ;;  %1101 = vmatprep.subr.bf16.mxu0 %v1237_v2  ;;  %v336_v39 = vpack.i.b16 %v335_v33, %v334_v36  ;;  %v584_v40 = vsel %vm487_vm1, %v333_v34, 0 }
  0xb4   :  { %1096 = vmatpush3.bf16.xpose.msra.mxu1 %v538_v31  ;;  %v180_v35 = vshrl.u32 %v174_v30, 16  ;;  %v178_v37 = vpack.i.b16 %v174_v30, %v149_v32  ;;  %v175_v42 = vcombine.high %v174_v30, %v1242_v23  ;;  %v185_v47 = vshrl.u32 %v150_v44, 16 }
  0xb5   :  { %1107 = vmatprep.subr.bf16.mxu1 %v1237_v2  ;;  %v630_v43 = vsel %vm487_vm1, %v336_v39, 0 }
  0xb6   :  { %v181_v41 = vpack.i.b16 %v180_v35, %v179_v38  ;;  %v186_v45 = vshrl.u32 %v175_v42, 16  ;;  %v184_v46 = vpack.i.b16 %v175_v42, %v150_v44 }
  0xb8   :  { %v187_v48 = vpack.i.b16 %v186_v45, %v185_v47 }
  0xb9   :  { %1092 = vmatmul.mubr.msk.bf16.vlgmr.msra.gmra.mrb[0].mxu0 %vm487_vm1, %v178_v37 }
  0xba   :  { %1102 = vmatpush3.bf16.xpose.msra.mxu0 %v584_v40  ;;  %1103 = vmatprep.mubr.msk.bf16.mxu0 %vm1239_vm0, %v1237_v2 }
  0xbb   :  { %1098 = vmatmul.mubr.msk.bf16.vlgmr.msra.gmra.mrb[0].mxu1 %vm487_vm1, %v181_v41  ;;  %1113 = vmatprep.subr.bf16.mxu0 %v1237_v2 }
  0xbc   :  { %1108 = vmatpush3.bf16.xpose.msra.mxu1 %v630_v43  ;;  %1109 = vmatprep.mubr.msk.bf16.mxu1 %vm1239_vm0, %v1237_v2 }
  0xbd   :  { %1119 = vmatprep.subr.bf16.mxu1 %v1237_v2 }
  0xc1   :  { %1104 = vmatmul.mubr.msk.bf16.vlgmr.msra.gmra.mrb[4].mxu0 %vm487_vm1, %v184_v46 }
  0xc2   :  { %1115 = vmatprep.mubr.msk.bf16.mxu0 %vm1239_vm0, %v1237_v2 }
  0xc3   :  { %1110 = vmatmul.mubr.msk.bf16.vlgmr.msra.gmra.mrb[4].mxu1 %vm487_vm1, %v187_v48 }
  0xc4   :  { %1121 = vmatprep.mubr.msk.bf16.mxu1 %vm1239_vm0, %v1237_v2 }
 0x10b   :  { %v340_v7 = vpop.permute.xlu1 %339 }
 0x10c   :  { %v349_v11 = vshrl.u32 %v340_v7, 16  ;;  %v347_v15 = vpack.i.b16 %v340_v7, %v338_v6 }
 0x10e   :  { %v350_v16 = vpack.i.b16 %v349_v11, %v348_v12  ;;  %v364_v21 = vrot.slane %v347_v15, %v1296_v14 }
 0x110   :  { %v398_v26 = vrot.slane %v350_v16, %v1296_v14 }
 0x18c   :  { %v528_v49 = vpop.f32.mrb[0].mxu0 }
 0x18d   :  { %v1093_v50 = vpop.f32.mrb[1].mxu0  ;;  %v672_v51 = vsel %vm487_vm1, %v528_v49, -inf }
 0x18e   :  { %v574_v52 = vpop.f32.mrb[0].mxu1  ;;  %673 = vmax.xlane.f32.xlu0 %v672_v51  ;;  %v531_v53 = vpop.f32.mrb[2].mxu0 }
 0x18f   :  { %v1094_v54 = vpop.f32.mrb[3].mxu0  ;;  %v1099_v55 = vpop.f32.mrb[1].mxu1  ;;  %v675_v56 = vsel %vm487_vm1, %v574_v52, -inf }
 0x190   :  { %676 = vmax.xlane.f32.xlu1 %v675_v56  ;;  %v577_v57 = vpop.f32.mrb[2].mxu1 }
 0x191   :  { %v1100_v58 = vpop.f32.mrb[3].mxu1 }
 0x194   :  { %v1360_v59 = vpop.f32.mrb[4].mxu0 }
 0x195   :  { %v1105_v60 = vpop.f32.mrb[5].mxu0  ;;  %v678_v4 = vsel %vm487_vm1, %v1360_v59, -inf }
 0x196   :  { %v623_v61 = vpop.f32.mrb[6].mxu0  ;;  %v1362_v62 = vpop.f32.mrb[4].mxu1 }
 0x197   :  { %v1106_v63 = vpop.f32.mrb[7].mxu0  ;;  %v1111_v0 = vpop.f32.mrb[5].mxu1  ;;  %v681_v5 = vsel %vm487_vm1, %v1362_v62, -inf }
 0x198   :  { %v669_v1 = vpop.f32.mrb[6].mxu1 }
 0x199   :  { %v1112_v3 = vpop.f32.mrb[7].mxu1 }
 0x1a1   :  { %343 = vrot.lane.b32.xlu1 %v1293_v10, %s1238_s1 }
 0x1a4   :  { %341 = vrot.lane.b32.xlu0 %v1299_v20, %s1238_s1 }
 0x1c3   :  { %679 = vmax.xlane.f32.xlu0 %v678_v4 }
 0x1c5   :  { %682 = vmax.xlane.f32.xlu1 %v681_v5 }
 0x21b   :  { %v674_v8 = vpop.xlane.xlu0 %673 }
 0x21c   :  { %v684_v19 = vsub.f32 %v528_v49, %v674_v8 }
 0x21d   :  { %v677_v9 = vpop.xlane.xlu1 %676 }
 0x21e   :  { %v685_v25 = vsub.f32 %v574_v52, %v677_v9  ;;  %v688_v31 = vmul.f32 1.442695, %v684_v19 }
 0x21f   :  { %v342_v13 = vpop.permute.xlu0 %341 }
 0x220   :  { %v354_v17 = vshrl.u32 %v342_v13, 16  ;;  %v690_v36 = vmul.f32 1.442695, %v685_v25  ;;  %1152 = vpow2.f32 %v688_v31 }
 0x221   :  { %v344_v10 = vpop.permute.xlu1 %343 }
 0x222   :  { %v353_v20 = vpack.i.b16 %v344_v10, %v342_v13  ;;  %v355_v18 = vshrl.u32 %v344_v10, 16  ;;  %1154 = vpow2.f32 %v690_v36 }
 0x224   :  { %v356_v22 = vpack.i.b16 %v355_v18, %v354_v17  ;;  %v372_v24 = vrot.slane %v353_v20, %v1296_v14 }
 0x226   :  { %v373_v28 = vcombine.low %v364_v21, %v372_v24  ;;  %v374_v29 = vcombine.high %v364_v21, %v372_v24  ;;  %v406_v30 = vrot.slane %v356_v22, %v1296_v14 }
 0x228   :  { %v381_v32 = vrot.slane %v373_v28, %v1305_v27  ;;  %v388_v33 = vrot.slane %v374_v29, %v1305_v27  ;;  %v407_v34 = vcombine.low %v398_v26, %v406_v30  ;;  %v408_v35 = vcombine.high %v398_v26, %v406_v30 }
 0x22a   :  { %v415_v37 = vrot.slane %v407_v34, %v1305_v27  ;;  %v422_v38 = vrot.slane %v408_v35, %v1305_v27  ;;  %v425_v39 = vcombine.low %v381_v32, %v388_v33  ;;  %v1061_v40 = vcombine.high %v381_v32, %v388_v33  ;;  %v1153_v56 = vpop.eup %1152 }
 0x22b   :  { %v696_v1 = vpack.c.bf16 %v1153_v56, %v1153_v56 }
 0x22c   :  { %v432_v41 = vrot.slane %v425_v39, %v1296_v14  ;;  %v440_v42 = vrot.slane %v1061_v40, %v1296_v14  ;;  %v450_v43 = vcombine.low %v415_v37, %v422_v38  ;;  %v1062_v44 = vcombine.high %v415_v37, %v422_v38  ;;  %v1155_v0 = vpop.eup %1154 }
 0x22d   :  { %v697_v5 = vpack.c.bf16 %v1155_v0, %v1155_v0 }
 0x22e   :  { %v457_v45 = vrot.slane %v450_v43, %v1296_v14  ;;  %v465_v46 = vrot.slane %v1062_v44, %v1296_v14  ;;  %v441_v47 = vcombine.low %v432_v41, %v440_v42 }
 0x230   :  { %v448_v48 = vrot.slane %v441_v47, %v1305_v27  ;;  %v466_v49 = vcombine.low %v457_v45, %v465_v46 }
 0x232   :  { %v473_v50 = vrot.slane %v466_v49, %v1305_v27  ;;  %v449_v51 = vcombine.high %v448_v48, %v1242_v23  ;;  %v478_v53 = vshrl.u32 %v448_v48, 16 }
 0x234   :  { %v477_v52 = vpack.i.b16 %v473_v50, %v448_v48  ;;  %v479_v54 = vshrl.u32 %v473_v50, 16  ;;  %v474_v55 = vcombine.high %v473_v50, %v1242_v23  ;;  %v484_v57 = vshrl.u32 %v449_v51, 16 }
 0x236   :  { %v705_v58 = vsel %vm703_vm2, %v477_v52, 0  ;;  %v480_v60 = vpack.i.b16 %v479_v54, %v478_v53  ;;  %v483_v61 = vpack.i.b16 %v474_v55, %v449_v51  ;;  %v485_v63 = vshrl.u32 %v474_v55, 16 }
 0x237   :  { %1114 = vmatpush3.bf16.msra.mxu0 %v705_v58 }
 0x238   :  { %v751_v3 = vsel %vm703_vm2, %v480_v60, 0  ;;  %1125 = vmatprep.subr.bf16.mxu0 %v1237_v2  ;;  %v486_v4 = vpack.i.b16 %v485_v63, %v484_v57  ;;  %v797_v23 = vsel %vm703_vm2, %v483_v61, 0 }
 0x239   :  { %1120 = vmatpush3.bf16.msra.mxu1 %v751_v3 }
 0x23a   :  { %1116 = vmatmul.mubr.msk.bf16.vlgmr.msra.gmra.mrb[8].mxu0 %vm487_vm1, %v696_v1  ;;  %1131 = vmatprep.subr.bf16.mxu1 %v1237_v2  ;;  %v843_v6 = vsel %vm703_vm2, %v486_v4, 0 }
 0x23b   :  { %1126 = vmatpush3.bf16.msra.mxu0 %v797_v23  ;;  %1127 = vmatprep.mubr.msk.bf16.mxu0 %vm1239_vm0, %v1237_v2 }
 0x23c   :  { %1122 = vmatmul.mubr.msk.bf16.vlgmr.msra.gmra.mrb[8].mxu1 %vm487_vm1, %v697_v5 }
 0x23d   :  { %1132 = vmatpush3.bf16.msra.mxu1 %v843_v6  ;;  %1133 = vmatprep.mubr.msk.bf16.mxu1 %vm1239_vm0, %v1237_v2 }
 0x250   :  { %v680_v7 = vpop.xlane.xlu0 %679 }
 0x251   :  { %v686_v8 = vsub.f32 %v1360_v59, %v680_v7 }
 0x252   :  { %v683_v9 = vpop.xlane.xlu1 %682 }
 0x253   :  { %v692_v11 = vmul.f32 1.442695, %v686_v8  ;;  %v687_v12 = vsub.f32 %v1362_v62, %v683_v9 }
 0x255   :  { %1156 = vpow2.f32 %v692_v11  ;;  %v694_v13 = vmul.f32 1.442695, %v687_v12 }
 0x257   :  { %1158 = vpow2.f32 %v694_v13 }
 0x25f   :  { %v1157_v15 = vpop.eup %1156 }
 0x260   :  { %v698_v10 = vpack.c.bf16 %v1157_v15, %v1157_v15 }
 0x261   :  { %v1159_v16 = vpop.eup %1158 }
 0x262   :  { %v699_v17 = vpack.c.bf16 %v1159_v16, %v1159_v16  ;;  %1128 = vmatmul.mubr.msk.bf16.vlgmr.msra.gmra.mrb[12].mxu0 %vm487_vm1, %v698_v10 }
 0x264   :  { %1134 = vmatmul.mubr.msk.bf16.vlgmr.msra.gmra.mrb[12].mxu1 %vm487_vm1, %v699_v17 }
 0x30d   :  { %v741_v20 = vpop.f32.mrb[8].mxu0 }
 0x30e   :  { %v1117_v2 = vpop.f32.mrb[9].mxu0 }
 0x30f   :  { %v744_v18 = vpop.f32.mrb[10].mxu0  ;;  %v787_v19 = vpop.f32.mrb[8].mxu1 }
 0x310   :  { %v1118_v59 = vpop.f32.mrb[11].mxu0  ;;  %v1123_v21 = vpop.f32.mrb[9].mxu1 }
 0x311   :  { %v790_v22 = vpop.f32.mrb[10].mxu1 }
 0x312   :  { %v1124_v24 = vpop.f32.mrb[11].mxu1 }
 0x335   :  { %v833_v62 = vpop.f32.mrb[12].mxu0 }
 0x336   :  { %v885_v25 = vcombine.low %v741_v20, %v833_v62  ;;  %v886_v26 = vcombine.high %v741_v20, %v833_v62  ;;  %v1129_v28 = vpop.f32.mrb[13].mxu0 }
 0x337   :  { %v836_v29 = vpop.f32.mrb[14].mxu0  ;;  %v879_v30 = vpop.f32.mrb[12].mxu1 }
 0x338   :  { %v901_v31 = vcombine.low %v787_v19, %v879_v30  ;;  %v902_v32 = vcombine.high %v787_v19, %v879_v30  ;;  %v1130_v33 = vpop.f32.mrb[15].mxu0  ;;  %v1135_v34 = vpop.f32.mrb[13].mxu1  ;;  %v893_v36 = vrot.slane %v885_v25, %v1296_v14  ;;  %v900_v37 = vrot.slane %v886_v26, %v1296_v14 }
 0x339   :  { %v882_v35 = vpop.f32.mrb[14].mxu1 }
 0x33a   :  { %v909_v38 = vrot.slane %v901_v31, %v1296_v14  ;;  %v916_v39 = vrot.slane %v902_v32, %v1296_v14  ;;  %v1136_v40 = vpop.f32.mrb[15].mxu1 }
 0x33c   :  { %v917_v41 = vcombine.low %v893_v36, %v909_v38  ;;  %v918_v42 = vcombine.high %v893_v36, %v909_v38  ;;  %v933_v43 = vcombine.low %v900_v37, %v916_v39  ;;  %v934_v44 = vcombine.high %v900_v37, %v916_v39 }
 0x33e   :  { %v925_v45 = vrot.slane %v917_v41, %v1305_v27  ;;  %v932_v46 = vrot.slane %v918_v42, %v1305_v27  ;;  %v941_v47 = vrot.slane %v933_v43, %v1305_v27  ;;  %v948_v48 = vrot.slane %v934_v44, %v1305_v27 }
 0x340   :  { %v953_v49 = vcombine.low %v925_v45, %v932_v46  ;;  %v1071_v50 = vcombine.high %v925_v45, %v932_v46  ;;  %v969_v51 = vcombine.low %v941_v47, %v948_v48  ;;  %v1072_v52 = vcombine.high %v941_v47, %v948_v48 }
 0x342   :  { %v960_v53 = vrot.slane %v953_v49, %v1296_v14  ;;  %v968_v54 = vrot.slane %v1071_v50, %v1296_v14  ;;  %v976_v55 = vrot.slane %v969_v51, %v1296_v14  ;;  %v984_v56 = vrot.slane %v1072_v52, %v1296_v14 }
 0x344   :  { %v986_v57 = vcombine.high %v960_v53, %v968_v54  ;;  %v1002_v58 = vcombine.high %v976_v55, %v984_v56  ;;  %v985_v60 = vcombine.low %v960_v53, %v968_v54  ;;  %v1001_v61 = vcombine.low %v976_v55, %v984_v56 }
 0x346   :  { %v1000_v63 = vrot.slane %v986_v57, %v1305_v27  ;;  %v1016_v0 = vrot.slane %v1002_v58, %v1305_v27  ;;  %v993_v1 = vrot.slane %v985_v60, %v1305_v27  ;;  %v1009_v3 = vrot.slane %v1001_v61, %v1305_v27 }
 0x348   :  { %v1019_v4 = vcombine.low %v1000_v63, %v1016_v0  ;;  %v1018_v5 = vcombine.high %v993_v1, %v1009_v3  ;;  %v1020_v23 = vcombine.high %v1000_v63, %v1016_v0  ;;  %v1017_v6 = vcombine.low %v993_v1, %v1009_v3 }
 0x34a   :  { %1026 = vrot.lane.b32.xlu1 %v1019_v4, %s1243_s7  ;;  %1022 = vrot.lane.b32.xlu0 %v1018_v5, %s1244_s8 }
 0x34e   :  { %1030 = vrot.lane.b32.xlu0 %v1020_v23, %s1245_s9 }
 0x3bc   :  { %v1023_v14 = vpop.permute.xlu0 %1022  ;;  %v1027_v7 = vpop.permute.xlu1 %1026 }
 0x3bd   :  { %v1033_v8 = vsel %vm487_vm1, %v1017_v6, %v1023_v14 }
 0x3be   :  { %v1035_v27 = vsel %vm1034_vm3, %v1033_v8, %v1027_v7 }
 0x3c0   :  { %v1031_v9 = vpop.permute.xlu0 %1030 }
 0x3c1   :  { %v1037_v11 = vsel %vm1036_vm4, %v1035_v27, %v1031_v9 }
 0x3c2   :  { %v1038_v12 = vpack.c.bf16 %v1037_v11, %v1037_v11 }
 0x3c4   :  { %1040 = vst.msk [vmem:[#allocation7] sm:$0xf] %vm1039_vm5, %v1038_v12 }
 0x3c5   :  { %1215 = shalt.err (!%p1212_p6)
}
 0x3c6   :  { %s1216_s15 = scalar_lea.hbm %s1435_s2, 64 }
 0x3c7   :  { %p1217_p7 = scmp.ne.s32.totalorder %s1435_s2, %s1216_s15  ;;  %p1220_p8 = scmp.lt.u32.totalorder %s1216_s15, %s1435_s2 }
 0x3c9   :  { %p1222_p9 = pnand %p1220_p8, %p1217_p7 }
 0x3cb   :  { %1225 = shalt.err (!%p1222_p9)
}
 0x3cc   :  { %1050 = dma.vmem_to_hbm [thread:$0]  %s1048_s11, 64, %s1435_s2, [#allocation4]  }
 0x3cd   :  { %1230 = dma.done.wait [#allocation4], 64  }
 0x3ce   :  { %1231 = vsyncadd [#allocation4], 4294967232 }
 0x3cf   :  { %1054 = vsyncpa [#allocation3], 1 }
 0x3d0   :  { %1055 = vsyncpa [#allocation6], 1 }
 0x3d1   :  { %1056 = vsyncpa [#allocation4], 1 }

// kernel: transformer_forward.17
= control target key start
LH: loop header
LB: loop body
LE: loop exit
PB: predicated region body
PF: predicated region fallthrough
CT: control target
= control target key end

     0   :  { %s1003_s15 = smov 0   ;;  %s1107_s0 = inlined_call_operand.vmem [shape: bf16[2,8,32], index: 0, kind: input, shape index: {}]   ;;  %s1108_s1 = inlined_call_operand.vmem [shape: bf16[32,96], index: 1, kind: input, shape index: {}]   ;;  %s1109_s2 = inlined_call_operand.vmem [shape: f32[1,96], index: 2, kind: input, shape index: {}]   ;;  %s1110_s3 = inlined_call_operand.vmem [shape: f32[2,1,8], index: 3, kind: input, shape index: {}]   ;;  %s1111_s4 = inlined_call_operand.vmem [shape: bf16[2,8,32], index: 4, kind: output, shape index: {}]  }
   0x1 LB: > { %s815_s16 = sadd.s32 4294967295, %s960_s15   ;;  %p819_p0 = scmp.ge.s32.totalorder %s960_s15, 1  ;;  %s960_s15 = sphi %s1003_s15, %s14_s15  }
   0x2   : > { %p169_p1 = scmp.lt.s32.totalorder %s960_s15, 3 }
   0x4   : > { %p170_p2 = pnand %p819_p0, %p169_p1 }
   0x5   : > { %v936_v0 = vld [vmem:[%s1108_s1] sm:$0xff] (!%p170_p2)   ;;  %v962_v1 = vmov (!%p170_p2), 0.0   ;;  %v937_v2 = vld [vmem:[%s1108_s1 + $0x8] sm:$0xff] (!%p170_p2)   ;;  %vm963_vm0 = vmmov (!%p170_p2), 0   ;;  %p196_p3 = scmp.lt.s32.totalorder (!%p170_p2), %s815_s16, 1  ;;  %vm232_vm1 = vcmask (!%p170_p2), 261120  }
   0x6   : > { %173 = sbr.rel (%p170_p2) target bundleno = 1281 (0x501), region = 36  ;;  %856 = vmatprep.subr.bf16.mxu0 (!%p170_p2), %v962_v1  ;;  %864 = vmatprep.subr.bf16.mxu1 (!%p170_p2), %v962_v1  ;;  %v822_v4 = vld [vmem:[%s1109_s2] ss:$0 sm:$0xff] (!%p170_p2)  ;;  %s964_s27 = smov (!%p170_p2), 120   ;;  %vm281_vm2 = vcmask (!%p170_p2), 64512   ;;  %vm353_vm3 = vcmask (!%p170_p2), 1043456  }
   0x7   : > { %857 = vmatpush3.bf16.msra.mxu0 (!%p170_p2), %v936_v0  ;;  %860 = vmatprep.mubr.msk.bf16.mxu0 (!%p170_p2), %vm963_vm0, %v962_v1  ;;  %s965_s28 = smov (!%p170_p2), 96   ;;  %s966_s29 = smov (!%p170_p2), 80   ;;  %vm746_vm4 = vcmask (!%p170_p2), 130048   ;;  %vm748_vm5 = vcmask (!%p170_p2), 195584   ;;  %vm751_vm6 = vcmask (!%p170_p2), 257024  }
   0x8   : > { %858 = vmatprep.subr.bf16.mxu0 (!%p170_p2), %v962_v1  ;;  %866 = vmatprep.mubr.msk.bf16.mxu1 (!%p170_p2), %vm963_vm0, %v962_v1  ;;  %s967_s30 = smov (!%p170_p2), 88   ;;  %s968_s5 = smov (!%p170_p2), 72  }
   0x9   : > { %s969_s6 = smov (!%p170_p2), 112   ;;  %s970_s7 = smov (!%p170_p2), 104  }
   0xa   : > { %s971_s11 = smov (!%p170_p2), 56   ;;  %s972_s12 = smov (!%p170_p2), 64  }
   0xb   : > { %859 = vmatpush3.bf16.msra.mxu0 (!%p170_p2), %v937_v2  ;;  %s973_s13 = smov (!%p170_p2), 40   ;;  %s974_s14 = smov (!%p170_p2), 48  }
   0xc   : > { %870 = vmatprep.subr.bf16.mxu0 (!%p170_p2), %v962_v1  ;;  %s975_s17 = smov (!%p170_p2), 8   ;;  %s976_s18 = smov (!%p170_p2), 16  }
   0xd   : > { %s1113_s16 = smov (!%p196_p3, %s815_s16), 1  ;;  %s977_s19 = smov 24  }
   0xe   : > { %s820_s21 = sshll.u32 %s1113_s16, 2  ;;  %s202_s10 = scalar_lea.vmem %s1110_s3, %s1113_s16 }
   0xf   : > { %s199_s24 = scalar_lea.vmem %s1107_s0, %s820_s21  ;;  %v827_v23 = vld [vmem:[%s202_s10] ss:$0 sm:$0xff]  ;;  %s206_s23 = scalar_lea.vmem %s1111_s4, %s820_s21 }
  0x10   : > { %v208_v3 = vld [vmem:[%s199_s24] sm:$0xf] }
  0x11   : > { %861 = vmatmul.mubr.msk.bf16.vlgmr.msra.gmra.mrb[0].mxu0 %vm232_vm1, %v208_v3 }
  0x12   : > { %872 = vmatprep.mubr.msk.bf16.mxu0 %vm963_vm0, %v962_v1 }
  0xe4   : > { %v270_v5 = vpop.f32.mrb[0].mxu0 }
  0xe5   : > { %v271_v6 = vadd.f32 %v822_v4, %v270_v5  ;;  %v862_v7 = vpop.f32.mrb[1].mxu0 }
  0xe6   : > { %v273_v8 = vpop.f32.mrb[2].mxu0 }
  0xe7   : > { %v1038_v9 = vpack.c.bf16 %v271_v6, %v271_v6  ;;  %v863_v10 = vpop.f32.mrb[3].mxu0 }
  0xe9   : > { %397 = vrot.lane.b32.xlu1 %v1038_v9, %s964_s27  ;;  %279 = vrot.lane.b32.xlu0 %v1038_v9, %s965_s28 }
  0xed   : > { %511 = vrot.lane.b32.xlu1 %v1038_v9, %s966_s29  ;;  %399 = vrot.lane.b32.xlu0 %v1038_v9, %s967_s30 }
  0xf1   : > { %623 = vrot.lane.b32.xlu1 %v1038_v9, %s968_s5  ;;  %509 = vrot.lane.b32.xlu0 %v1038_v9, %s969_s6 }
  0xf5   : > { %621 = vrot.lane.b32.xlu0 %v1038_v9, %s970_s7 }
 0x15b   : > { %v280_v11 = vpop.permute.xlu0 %279  ;;  %v398_v14 = vpop.permute.xlu1 %397 }
 0x15c   : > { %v286_v12 = vsel %vm281_vm2, %v280_v11, 0 }
 0x15d   : > { %865 = vmatpush3.bf16.xpose.msra.mxu1 %v286_v12 }
 0x15e   : > { %876 = vmatprep.subr.bf16.mxu1 %v962_v1 }
 0x15f   : > { %v400_v13 = vpop.permute.xlu0 %399  ;;  %v512_v16 = vpop.permute.xlu1 %511 }
 0x160   : > { %v405_v15 = vsel %vm281_vm2, %v400_v13, 0  ;;  %v517_v17 = vsel %vm281_vm2, %v512_v16, 0 }
 0x163   : > { %v624_v18 = vpop.permute.xlu1 %623  ;;  %v510_v19 = vpop.permute.xlu0 %509 }
 0x164   : > { %867 = vmatmul.mubr.msk.bf16.vlgmr.msra.gmra.mrb[0].mxu1 %vm281_vm2, %v1038_v9  ;;  %v629_v20 = vsel %vm281_vm2, %v624_v18, 0 }
 0x165   : > { %877 = vmatpush3.bf16.xpose.msra.mxu1 %v405_v15  ;;  %878 = vmatprep.mubr.msk.bf16.mxu1 %vm963_vm0, %v962_v1 }
 0x166   : > { %888 = vmatprep.subr.bf16.mxu1 %v962_v1 }
 0x167   : > { %v622_v21 = vpop.permute.xlu0 %621 }
 0x16c   : > { %879 = vmatmul.mubr.msk.bf16.vlgmr.msra.gmra.mrb[4].mxu1 %vm281_vm2, %v398_v14 }
 0x16d   : > { %889 = vmatpush3.bf16.xpose.msra.mxu1 %v517_v17  ;;  %890 = vmatprep.mubr.msk.bf16.mxu1 %vm963_vm0, %v962_v1 }
 0x16e   : > { %900 = vmatprep.subr.bf16.mxu1 %v962_v1 }
 0x174   : > { %891 = vmatmul.mubr.msk.bf16.vlgmr.msra.gmra.mrb[8].mxu1 %vm281_vm2, %v510_v19 }
 0x175   : > { %901 = vmatpush3.bf16.xpose.msra.mxu1 %v629_v20  ;;  %902 = vmatprep.mubr.msk.bf16.mxu1 %vm963_vm0, %v962_v1 }
 0x17c   : > { %903 = vmatmul.mubr.msk.bf16.vlgmr.msra.gmra.mrb[12].mxu1 %vm281_vm2, %v622_v21 }
 0x237   : > { %v322_v22 = vpop.f32.mrb[0].mxu1 }
 0x238   : > { %v328_v24 = vmul.f32 0.35355338, %v322_v22  ;;  %v868_v25 = vpop.f32.mrb[1].mxu1 }
 0x239   : > { %v325_v26 = vpop.f32.mrb[2].mxu1 }
 0x23a   : > { %v869_v27 = vpop.f32.mrb[3].mxu1  ;;  %v335_v28 = vadd.f32 %v827_v23, %v328_v24 }
 0x23c   : > { %v336_v29 = vsel %vm281_vm2, %v335_v28, -inf }
 0x23d   : > { %337 = vmax.xlane.f32.xlu1 %v336_v29 }
 0x23f   : > { %v441_v30 = vpop.f32.mrb[4].mxu1 }
 0x240   : > { %v447_v31 = vmul.f32 0.35355338, %v441_v30  ;;  %v880_v32 = vpop.f32.mrb[5].mxu1 }
 0x241   : > { %v444_v33 = vpop.f32.mrb[6].mxu1 }
 0x242   : > { %v881_v34 = vpop.f32.mrb[7].mxu1  ;;  %v448_v35 = vadd.f32 %v827_v23, %v447_v31 }
 0x244   : > { %v449_v36 = vsel %vm281_vm2, %v448_v35, -inf }
 0x245   : > { %450 = vmax.xlane.f32.xlu0 %v449_v36 }
 0x247   : > { %v553_v37 = vpop.f32.mrb[8].mxu1 }
 0x248   : > { %v559_v38 = vmul.f32 0.35355338, %v553_v37  ;;  %v892_v39 = vpop.f32.mrb[9].mxu1 }
 0x249   : > { %v556_v40 = vpop.f32.mrb[10].mxu1 }
 0x24a   : > { %v893_v41 = vpop.f32.mrb[11].mxu1  ;;  %v560_v42 = vadd.f32 %v827_v23, %v559_v38 }
 0x24c   : > { %v561_v43 = vsel %vm281_vm2, %v560_v42, -inf }
 0x24d   : > { %562 = vmax.xlane.f32.xlu0 %v561_v43 }
 0x24f   : > { %v665_v44 = vpop.f32.mrb[12].mxu1 }
 0x250   : > { %v671_v45 = vmul.f32 0.35355338, %v665_v44  ;;  %v904_v46 = vpop.f32.mrb[13].mxu1 }
 0x251   : > { %v668_v47 = vpop.f32.mrb[14].mxu1 }
 0x252   : > { %v905_v48 = vpop.f32.mrb[15].mxu1  ;;  %v672_v49 = vadd.f32 %v827_v23, %v671_v45 }
 0x254   : > { %v673_v50 = vsel %vm281_vm2, %v672_v49, -inf }
 0x255   : > { %674 = vmax.xlane.f32.xlu1 %v673_v50 }
 0x2ca   : > { %v338_v51 = vpop.xlane.xlu1 %337 }
 0x2cb   : > { %v339_v52 = vsub.f32 %v335_v28, %v338_v51 }
 0x2cd   : > { %v340_v53 = vmul.f32 1.442695, %v339_v52 }
 0x2cf   : > { %938 = vpow2.f32 %v340_v53 }
 0x2d2   : > { %v451_v54 = vpop.xlane.xlu0 %450 }
 0x2d3   : > { %v452_v55 = vsub.f32 %v448_v35, %v451_v54 }
 0x2d5   : > { %v453_v56 = vmul.f32 1.442695, %v452_v55 }
 0x2d7   : > { %940 = vpow2.f32 %v453_v56 }
 0x2d9   : > { %v939_v57 = vpop.eup %938 }
 0x2da   : > { %v563_v58 = vpop.xlane.xlu0 %562  ;;  %v342_v59 = vsel %vm281_vm2, %v939_v57, 0.0 }
 0x2db   : > { %v564_v60 = vsub.f32 %v560_v42, %v563_v58  ;;  %343 = vadd.xlane.f32.xlu0 %v342_v59 }
 0x2dd   : > { %v565_v61 = vmul.f32 1.442695, %v564_v60 }
 0x2df   : > { %942 = vpow2.f32 %v565_v61 }
 0x2e1   : > { %v941_v62 = vpop.eup %940 }
 0x2e2   : > { %v455_v63 = vsel %vm281_vm2, %v941_v62, 0.0  ;;  %v675_v3 = vpop.xlane.xlu1 %674 }
 0x2e3   : > { %456 = vadd.xlane.f32.xlu1 %v455_v63  ;;  %v676_v4 = vsub.f32 %v672_v49, %v675_v3 }
 0x2e5   : > { %v677_v5 = vmul.f32 1.442695, %v676_v4 }
 0x2e7   : > { %944 = vpow2.f32 %v677_v5 }
 0x2e9   : > { %v943_v0 = vpop.eup %942 }
 0x2ea   : > { %v567_v2 = vsel %vm281_vm2, %v943_v0, 0.0 }
 0x2eb   : > { %568 = vadd.xlane.f32.xlu0 %v567_v2 }
 0x2f1   : > { %v945_v6 = vpop.eup %944 }
 0x2f2   : > { %v679_v7 = vsel %vm281_vm2, %v945_v6, 0.0 }
 0x2f4   : > { %461 = vrot.lane.b32.xlu1 %v1038_v9, %s971_s11 }
 0x301   : > { %348 = vrot.lane.b32.xlu0 %v1038_v9, %s972_s12 }
 0x305   : > { %685 = vrot.lane.b32.xlu0 %v1038_v9, %s973_s13 }
 0x318   : > { %680 = vadd.xlane.f32.xlu1 %v679_v7 }
 0x329   : > { %573 = vrot.lane.b32.xlu1 %v1038_v9, %s974_s14 }
 0x368   : > { %v344_v8 = vpop.xlane.xlu0 %343 }
 0x369   : > { %946 = vrcp.f32 %v344_v8 }
 0x370   : > { %v457_v10 = vpop.xlane.xlu1 %456 }
 0x371   : > { %948 = vrcp.f32 %v457_v10 }
 0x373   : > { %v947_v11 = vpop.eup %946 }
 0x374   : > { %v346_v13 = vmul.f32 %v947_v11, %v939_v57  ;;  %v462_v16 = vpop.permute.xlu1 %461 }
 0x375   : > { %v467_v19 = vsel %vm353_vm3, %v462_v16, 0 }
 0x376   : > { %v347_v17 = vpack.c.bf16 %v346_v13, %v346_v13 }
 0x378   : > { %v569_v12 = vpop.xlane.xlu0 %568 }
 0x379   : > { %950 = vrcp.f32 %v569_v12 }
 0x37b   : > { %v949_v18 = vpop.eup %948 }
 0x37c   : > { %v349_v14 = vpop.permute.xlu0 %348  ;;  %v459_v9 = vmul.f32 %v949_v18, %v941_v62 }
 0x37d   : > { %v355_v15 = vsel %vm353_vm3, %v349_v14, 0 }
 0x37e   : > { %871 = vmatpush3.bf16.msra.mxu0 %v355_v15  ;;  %v460_v20 = vpack.c.bf16 %v459_v9, %v459_v9 }
 0x37f   : > { %882 = vmatprep.subr.bf16.mxu0 %v962_v1 }
 0x380   : > { %v686_v26 = vpop.permute.xlu0 %685 }
 0x381   : > { %873 = vmatmul.mubr.msk.bf16.vlgmr.msra.gmra.mrb[4].mxu0 %vm281_vm2, %v347_v17  ;;  %v691_v28 = vsel %vm353_vm3, %v686_v26, 0 }
 0x382   : > { %883 = vmatpush3.bf16.msra.mxu0 %v467_v19  ;;  %884 = vmatprep.mubr.msk.bf16.mxu0 %vm963_vm0, %v962_v1 }
 0x383   : > { %894 = vmatprep.subr.bf16.mxu0 %v962_v1  ;;  %v951_v21 = vpop.eup %950 }
 0x384   : > { %v571_v23 = vmul.f32 %v951_v21, %v943_v0 }
 0x386   : > { %v572_v27 = vpack.c.bf16 %v571_v23, %v571_v23 }
 0x389   : > { %885 = vmatmul.mubr.msk.bf16.vlgmr.msra.gmra.mrb[8].mxu0 %vm281_vm2, %v460_v20 }
 0x38a   : > { %896 = vmatprep.mubr.msk.bf16.mxu0 %vm963_vm0, %v962_v1 }
 0x3a5   : > { %v681_v22 = vpop.xlane.xlu1 %680 }
 0x3a6   : > { %952 = vrcp.f32 %v681_v22 }
 0x3a9   : > { %v574_v24 = vpop.permute.xlu1 %573 }
 0x3aa   : > { %v579_v25 = vsel %vm353_vm3, %v574_v24, 0 }
 0x3ab   : > { %895 = vmatpush3.bf16.msra.mxu0 %v579_v25 }
 0x3ac   : > { %906 = vmatprep.subr.bf16.mxu0 %v962_v1 }
 0x3ae   : > { %897 = vmatmul.mubr.msk.bf16.vlgmr.msra.gmra.mrb[12].mxu0 %vm281_vm2, %v572_v27 }
 0x3af   : > { %907 = vmatpush3.bf16.msra.mxu0 %v691_v28  ;;  %908 = vmatprep.mubr.msk.bf16.mxu0 %vm963_vm0, %v962_v1 }
 0x3b0   : > { %v953_v29 = vpop.eup %952 }
 0x3b1   : > { %v683_v30 = vmul.f32 %v953_v29, %v945_v6 }
 0x3b3   : > { %v684_v31 = vpack.c.bf16 %v683_v30, %v683_v30 }
 0x3b6   : > { %909 = vmatmul.mubr.msk.bf16.vlgmr.msra.gmra.mrb[16].mxu0 %vm281_vm2, %v684_v31 }
 0x454   : > { %v391_v32 = vpop.f32.mrb[4].mxu0 }
 0x455   : > { %v874_v33 = vpop.f32.mrb[5].mxu0 }
 0x456   : > { %v394_v34 = vpop.f32.mrb[6].mxu0 }
 0x457   : > { %v875_v35 = vpop.f32.mrb[7].mxu0 }
 0x45c   : > { %v503_v36 = vpop.f32.mrb[8].mxu0 }
 0x45d   : > { %734 = vrot.lane.b32.xlu1 %v503_v36, %s975_s17  ;;  %v886_v37 = vpop.f32.mrb[9].mxu0 }
 0x45e   : > { %v506_v38 = vpop.f32.mrb[10].mxu0 }
 0x45f   : > { %v887_v39 = vpop.f32.mrb[11].mxu0 }
 0x481   : > { %v615_v40 = vpop.f32.mrb[12].mxu0 }
 0x482   : > { %738 = vrot.lane.b32.xlu0 %v615_v40, %s976_s18  ;;  %v898_v41 = vpop.f32.mrb[13].mxu0 }
 0x483   : > { %v618_v1 = vpop.f32.mrb[14].mxu0 }
 0x484   : > { %v899_v42 = vpop.f32.mrb[15].mxu0 }
 0x489   : > { %v727_v43 = vpop.f32.mrb[16].mxu0 }
 0x48a   : > { %742 = vrot.lane.b32.xlu1 %v727_v43, %s977_s19  ;;  %v910_v44 = vpop.f32.mrb[17].mxu0 }
 0x48b   : > { %v730_v45 = vpop.f32.mrb[18].mxu0 }
 0x48c   : > { %v911_v46 = vpop.f32.mrb[19].mxu0 }
 0x4cf   : > { %v735_v47 = vpop.permute.xlu1 %734 }
 0x4d0   : > { %v745_v49 = vsel %vm281_vm2, %v391_v32, %v735_v47 }
 0x4f4   : > { %v739_v48 = vpop.permute.xlu0 %738 }
 0x4f5   : > { %v747_v50 = vsel %vm746_vm4, %v745_v49, %v739_v48 }
 0x4fc   : > { %v743_v51 = vpop.permute.xlu1 %742 }
 0x4fd   : > { %v749_v52 = vsel %vm748_vm5, %v747_v50, %v743_v51 }
 0x4fe   : > { %v750_v53 = vpack.c.bf16 %v749_v52, %v749_v52 }
 0x500   : > { %752 = vst.msk [vmem:[%s206_s23] sm:$0xf] %vm751_vm6, %v750_v53 }
 0x501 PF: > { %s14_s15 = sadd.s32 1, %s960_s15  }
 0x502   : > { %p11_p4 = scmp.ge.s32.totalorder %s14_s15, 4  }
 0x504   :  { %13 = sbr.rel (!%p11_p4) target bundleno = 1 (0x1), region = 69 }

// kernel: transformer_forward.18
= control target key start
LH: loop header
LB: loop body
LE: loop exit
PB: predicated region body
PF: predicated region fallthrough
CT: control target
= control target key end

     0   :  { %v200_v0 = vmov 0.0   ;;  %vm201_vm0 = vmmov 0   ;;  %vm54_vm1 = vcmask 261120   ;;  %vm158_vm2 = vcmask 257024   ;;  %s269_s1 = inlined_call_operand.vmem [shape: bf16[32,32], index: 1, kind: input, shape index: {}]   ;;  %s270_s0 = inlined_call_operand.vmem [shape: bf16[16,32], index: 0, kind: input, shape index: {}]   ;;  %s271_s3 = inlined_call_operand.vmem [shape: bf16[16,32], index: 3, kind: input, shape index: {}]   ;;  %s272_s2 = inlined_call_operand.vmem [shape: f32[1,32], index: 2, kind: input, shape index: {}]   ;;  %s273_s4 = inlined_call_operand.vmem [shape: f32[1,32], index: 4, kind: input, shape index: {}]   ;;  %s274_s5 = inlined_call_operand.vmem [shape: f32[1,32], index: 5, kind: input, shape index: {}]   ;;  %s275_s6 = inlined_call_operand.vmem [shape: bf16[16,32], index: 6, kind: output, shape index: {}]  }
   0x1   :  { %183 = vmatprep.subr.bf16.mxu0 %v200_v0  ;;  %v193_v1 = vld [vmem:[%s269_s1] sm:$0xff]   ;;  %187 = vmatprep.mubr.msk.bf16.mxu0 %vm201_vm0, %v200_v0  ;;  %v194_v2 = vld [vmem:[%s269_s1 + $0x8] sm:$0xff]  }
   0x2   :  { %184 = vmatpush3.bf16.msra.mxu0 %v193_v1  ;;  %v195_v3 = vld [vmem:[%s270_s0] sm:$0xff]  }
   0x3   :  { %185 = vmatprep.subr.bf16.mxu0 %v200_v0  ;;  %v177_v4 = vld [vmem:[%s271_s3] sm:$0xff]  }
   0x4   :  { %v165_v5 = vld [vmem:[%s272_s2] ss:$0 sm:$0xff]  ;;  %v178_v6 = vunpack.c.l.bf16 %v177_v4  ;;  %v179_v10 = vunpack.c.h.bf16 %v177_v4 }
   0x5   :  { %v170_v35 = vld [vmem:[%s273_s4] ss:$0 sm:$0xff] }
   0x6   :  { %186 = vmatpush3.bf16.msra.mxu0 %v194_v2  ;;  %v171_v37 = vld [vmem:[%s274_s5] ss:$0 sm:$0xff] }
   0x9   :  { %188 = vmatmul.mubr.msk.bf16.vlgmr.msra.gmra.mrb[0].mxu0 %vm54_vm1, %v195_v3 }
  0xdc   :  { %v92_v7 = vpop.f32.mrb[0].mxu0 }
  0xdd   :  { %v93_v8 = vadd.f32 %v165_v5, %v92_v7  ;;  %v189_v9 = vpop.f32.mrb[1].mxu0 }
  0xde   :  { %v95_v11 = vpop.f32.mrb[2].mxu0 }
  0xdf   :  { %v96_v12 = vadd.f32 %v165_v5, %v95_v11  ;;  %v190_v13 = vpop.f32.mrb[3].mxu0  ;;  %v103_v14 = vadd.f32 %v178_v6, %v93_v8 }
  0xe1   :  { %v105_v15 = vsel %vm54_vm1, %v103_v14, 0.0  ;;  %v104_v16 = vadd.f32 %v179_v10, %v96_v12 }
  0xe2   :  { %106 = vadd.xlane.f32.xlu0 %v105_v15 }
  0xe3   :  { %v108_v17 = vsel %vm54_vm1, %v104_v16, 0.0 }
  0xe6   :  { %109 = vadd.xlane.f32.xlu0 %v108_v17 }
 0x16f   :  { %v107_v18 = vpop.xlane.xlu0 %106 }
 0x170   :  { %v112_v19 = vmul.f32 0.03125, %v107_v18 }
 0x172   :  { %v114_v20 = vsub.f32 %v103_v14, %v112_v19 }
 0x173   :  { %v110_v21 = vpop.xlane.xlu0 %109 }
 0x174   :  { %v113_v22 = vmul.f32 0.03125, %v110_v21  ;;  %v116_v23 = vmul.f32 %v114_v20, %v114_v20 }
 0x176   :  { %v115_v24 = vsub.f32 %v104_v16, %v113_v22  ;;  %v118_v25 = vsel %vm54_vm1, %v116_v23, 0.0 }
 0x177   :  { %119 = vadd.xlane.f32.xlu1 %v118_v25 }
 0x178   :  { %v117_v26 = vmul.f32 %v115_v24, %v115_v24 }
 0x17a   :  { %v121_v27 = vsel %vm54_vm1, %v117_v26, 0.0 }
 0x17b   :  { %122 = vadd.xlane.f32.xlu1 %v121_v27 }
 0x204   :  { %v120_v28 = vpop.xlane.xlu1 %119 }
 0x205   :  { %v124_v29 = vmul.f32 0.03125, %v120_v28 }
 0x207   :  { %v126_v30 = vadd.f32 1e-05, %v124_v29 }
 0x208   :  { %v123_v31 = vpop.xlane.xlu1 %122 }
 0x209   :  { %196 = vrsqrt.f32 %v126_v30  ;;  %v125_v32 = vmul.f32 0.03125, %v123_v31 }
 0x20b   :  { %v127_v33 = vadd.f32 1e-05, %v125_v32 }
 0x20d   :  { %198 = vrsqrt.f32 %v127_v33 }
 0x213   :  { %v197_v34 = vpop.eup %196 }
 0x214   :  { %v130_v36 = vmul.f32 %v197_v34, %v114_v20 }
 0x216   :  { %v139_v38 = vmul.f32 %v170_v35, %v130_v36 }
 0x217   :  { %v199_v39 = vpop.eup %198 }
 0x218   :  { %v148_v40 = vadd.f32 %v171_v37, %v139_v38  ;;  %v131_v41 = vmul.f32 %v199_v39, %v115_v24 }
 0x21a   :  { %v174_v42 = vpack.c.bf16 %v148_v40, %v148_v40  ;;  %v140_v43 = vmul.f32 %v170_v35, %v131_v41 }
 0x21c   :  { %159 = vst.msk [vmem:[%s275_s6] sm:$0xf] %vm158_vm2, %v174_v42  ;;  %v149_v44 = vadd.f32 %v171_v37, %v140_v43 }
 0x21e   :  { %v175_v45 = vpack.c.bf16 %v149_v44, %v149_v44 }
 0x220   :  { %160 = vst.msk [vmem:[%s275_s6 + $0x4] sm:$0xf] %vm158_vm2, %v175_v45 }

// kernel: transformer_forward.23
= control target key start
LH: loop header
LB: loop body
LE: loop exit
PB: predicated region body
PF: predicated region fallthrough
CT: control target
= control target key end

     0   :  { %s973_s15 = smov 0   ;;  %s1076_s0 = inlined_call_operand.vmem [shape: bf16[2,8,32], index: 0, kind: input, shape index: {}]   ;;  %s1077_s1 = inlined_call_operand.vmem [shape: bf16[32,96], index: 1, kind: input, shape index: {}]   ;;  %s1078_s2 = inlined_call_operand.vmem [shape: f32[1,96], index: 2, kind: input, shape index: {}]   ;;  %s1079_s3 = inlined_call_operand.vmem [shape: f32[1,8,8], index: 3, kind: input, shape index: {}]   ;;  %s1080_s4 = inlined_call_operand.vmem [shape: bf16[2,8,32], index: 4, kind: output, shape index: {}]  }
   0x1 LB: > { %s786_s16 = sadd.s32 4294967295, %s930_s15   ;;  %p790_p0 = scmp.ge.s32.totalorder %s930_s15, 1  ;;  %s930_s15 = sphi %s973_s15, %s14_s15  }
   0x2   : > { %p161_p1 = scmp.lt.s32.totalorder %s930_s15, 3 }
   0x4   : > { %p162_p2 = pnand %p790_p0, %p161_p1 }
   0x5   : > { %v906_v0 = vld [vmem:[%s1077_s1] sm:$0xff] (!%p162_p2)   ;;  %v932_v1 = vmov (!%p162_p2), 0.0   ;;  %v907_v2 = vld [vmem:[%s1077_s1 + $0x8] sm:$0xff] (!%p162_p2)   ;;  %vm933_vm0 = vmmov (!%p162_p2), 0   ;;  %p185_p3 = scmp.lt.s32.totalorder (!%p162_p2), %s786_s16, 1  ;;  %vm218_vm1 = vcmask (!%p162_p2), 261120  }
   0x6   : > { %165 = sbr.rel (%p162_p2) target bundleno = 1281 (0x501), region = 36  ;;  %826 = vmatprep.subr.bf16.mxu0 (!%p162_p2), %v932_v1  ;;  %834 = vmatprep.subr.bf16.mxu1 (!%p162_p2), %v932_v1  ;;  %v793_v4 = vld [vmem:[%s1078_s2] ss:$0 sm:$0xff] (!%p162_p2)  ;;  %s934_s27 = smov (!%p162_p2), 120   ;;  %vm267_vm2 = vcmask (!%p162_p2), 64512   ;;  %vm333_vm3 = vcmask (!%p162_p2), 1043456  }
   0x7   : > { %827 = vmatpush3.bf16.msra.mxu0 (!%p162_p2), %v906_v0  ;;  %830 = vmatprep.mubr.msk.bf16.mxu0 (!%p162_p2), %vm933_vm0, %v932_v1  ;;  %s935_s28 = smov (!%p162_p2), 96   ;;  %s936_s29 = smov (!%p162_p2), 80   ;;  %v263_v23 = vld [vmem:[%s1079_s3] sm:$0xff] (!%p162_p2)  ;;  %vm726_vm4 = vcmask (!%p162_p2), 130048   ;;  %vm728_vm5 = vcmask (!%p162_p2), 195584   ;;  %vm731_vm6 = vcmask (!%p162_p2), 257024  }
   0x8   : > { %828 = vmatprep.subr.bf16.mxu0 (!%p162_p2), %v932_v1  ;;  %836 = vmatprep.mubr.msk.bf16.mxu1 (!%p162_p2), %vm933_vm0, %v932_v1  ;;  %s937_s30 = smov (!%p162_p2), 88   ;;  %s938_s5 = smov (!%p162_p2), 72  }
   0x9   : > { %s939_s6 = smov (!%p162_p2), 112   ;;  %s940_s7 = smov (!%p162_p2), 104  }
   0xa   : > { %s941_s10 = smov (!%p162_p2), 56   ;;  %s942_s11 = smov (!%p162_p2), 64  }
   0xb   : > { %829 = vmatpush3.bf16.msra.mxu0 (!%p162_p2), %v907_v2  ;;  %s943_s12 = smov (!%p162_p2), 40   ;;  %s944_s13 = smov (!%p162_p2), 48  }
   0xc   : > { %840 = vmatprep.subr.bf16.mxu0 (!%p162_p2), %v932_v1  ;;  %s945_s14 = smov (!%p162_p2), 8   ;;  %s946_s17 = smov (!%p162_p2), 16  }
   0xd   : > { %s1082_s16 = smov (!%p185_p3, %s786_s16), 1  ;;  %s947_s18 = smov 24  }
   0xe   : > { %s791_s21 = sshll.u32 %s1082_s16, 2 }
   0xf   : > { %s188_s24 = scalar_lea.vmem %s1076_s0, %s791_s21  ;;  %s192_s22 = scalar_lea.vmem %s1080_s4, %s791_s21 }
  0x10   : > { %v194_v3 = vld [vmem:[%s188_s24] sm:$0xf] }
  0x11   : > { %831 = vmatmul.mubr.msk.bf16.vlgmr.msra.gmra.mrb[0].mxu0 %vm218_vm1, %v194_v3 }
  0x12   : > { %842 = vmatprep.mubr.msk.bf16.mxu0 %vm933_vm0, %v932_v1 }
  0xe4   : > { %v256_v5 = vpop.f32.mrb[0].mxu0 }
  0xe5   : > { %v257_v6 = vadd.f32 %v793_v4, %v256_v5  ;;  %v832_v7 = vpop.f32.mrb[1].mxu0 }
  0xe6   : > { %v259_v8 = vpop.f32.mrb[2].mxu0 }
  0xe7   : > { %v1008_v9 = vpack.c.bf16 %v257_v6, %v257_v6  ;;  %v833_v10 = vpop.f32.mrb[3].mxu0 }
  0xe9   : > { %377 = vrot.lane.b32.xlu1 %v1008_v9, %s934_s27  ;;  %265 = vrot.lane.b32.xlu0 %v1008_v9, %s935_s28 }
  0xed   : > { %491 = vrot.lane.b32.xlu1 %v1008_v9, %s936_s29  ;;  %379 = vrot.lane.b32.xlu0 %v1008_v9, %s937_s30 }
  0xf1   : > { %603 = vrot.lane.b32.xlu1 %v1008_v9, %s938_s5  ;;  %489 = vrot.lane.b32.xlu0 %v1008_v9, %s939_s6 }
  0xf5   : > { %601 = vrot.lane.b32.xlu0 %v1008_v9, %s940_s7 }
 0x15b   : > { %v266_v11 = vpop.permute.xlu0 %265  ;;  %v378_v14 = vpop.permute.xlu1 %377 }
 0x15c   : > { %v272_v12 = vsel %vm267_vm2, %v266_v11, 0 }
 0x15d   : > { %835 = vmatpush3.bf16.xpose.msra.mxu1 %v272_v12 }
 0x15e   : > { %846 = vmatprep.subr.bf16.mxu1 %v932_v1 }
 0x15f   : > { %v380_v13 = vpop.permute.xlu0 %379  ;;  %v492_v16 = vpop.permute.xlu1 %491 }
 0x160   : > { %v385_v15 = vsel %vm267_vm2, %v380_v13, 0  ;;  %v497_v17 = vsel %vm267_vm2, %v492_v16, 0 }
 0x163   : > { %v604_v18 = vpop.permute.xlu1 %603  ;;  %v490_v19 = vpop.permute.xlu0 %489 }
 0x164   : > { %837 = vmatmul.mubr.msk.bf16.vlgmr.msra.gmra.mrb[0].mxu1 %vm267_vm2, %v1008_v9  ;;  %v609_v20 = vsel %vm267_vm2, %v604_v18, 0 }
 0x165   : > { %847 = vmatpush3.bf16.xpose.msra.mxu1 %v385_v15  ;;  %848 = vmatprep.mubr.msk.bf16.mxu1 %vm933_vm0, %v932_v1 }
 0x166   : > { %858 = vmatprep.subr.bf16.mxu1 %v932_v1 }
 0x167   : > { %v602_v21 = vpop.permute.xlu0 %601 }
 0x16c   : > { %849 = vmatmul.mubr.msk.bf16.vlgmr.msra.gmra.mrb[4].mxu1 %vm267_vm2, %v378_v14 }
 0x16d   : > { %859 = vmatpush3.bf16.xpose.msra.mxu1 %v497_v17  ;;  %860 = vmatprep.mubr.msk.bf16.mxu1 %vm933_vm0, %v932_v1 }
 0x16e   : > { %870 = vmatprep.subr.bf16.mxu1 %v932_v1 }
 0x174   : > { %861 = vmatmul.mubr.msk.bf16.vlgmr.msra.gmra.mrb[8].mxu1 %vm267_vm2, %v490_v19 }
 0x175   : > { %871 = vmatpush3.bf16.xpose.msra.mxu1 %v609_v20  ;;  %872 = vmatprep.mubr.msk.bf16.mxu1 %vm933_vm0, %v932_v1 }
 0x17c   : > { %873 = vmatmul.mubr.msk.bf16.vlgmr.msra.gmra.mrb[12].mxu1 %vm267_vm2, %v602_v21 }
 0x237   : > { %v308_v22 = vpop.f32.mrb[0].mxu1 }
 0x238   : > { %v314_v24 = vmul.f32 0.35355338, %v308_v22  ;;  %v838_v25 = vpop.f32.mrb[1].mxu1 }
 0x239   : > { %v311_v26 = vpop.f32.mrb[2].mxu1 }
 0x23a   : > { %v839_v27 = vpop.f32.mrb[3].mxu1  ;;  %v315_v28 = vadd.f32 %v314_v24, %v263_v23 }
 0x23c   : > { %v316_v29 = vsel %vm267_vm2, %v315_v28, -inf }
 0x23d   : > { %317 = vmax.xlane.f32.xlu1 %v316_v29 }
 0x23f   : > { %v421_v30 = vpop.f32.mrb[4].mxu1 }
 0x240   : > { %v427_v31 = vmul.f32 0.35355338, %v421_v30  ;;  %v850_v32 = vpop.f32.mrb[5].mxu1 }
 0x241   : > { %v424_v33 = vpop.f32.mrb[6].mxu1 }
 0x242   : > { %v851_v34 = vpop.f32.mrb[7].mxu1  ;;  %v428_v35 = vadd.f32 %v427_v31, %v263_v23 }
 0x244   : > { %v429_v36 = vsel %vm267_vm2, %v428_v35, -inf }
 0x245   : > { %430 = vmax.xlane.f32.xlu0 %v429_v36 }
 0x247   : > { %v533_v37 = vpop.f32.mrb[8].mxu1 }
 0x248   : > { %v539_v38 = vmul.f32 0.35355338, %v533_v37  ;;  %v862_v39 = vpop.f32.mrb[9].mxu1 }
 0x249   : > { %v536_v40 = vpop.f32.mrb[10].mxu1 }
 0x24a   : > { %v863_v41 = vpop.f32.mrb[11].mxu1  ;;  %v540_v42 = vadd.f32 %v539_v38, %v263_v23 }
 0x24c   : > { %v541_v43 = vsel %vm267_vm2, %v540_v42, -inf }
 0x24d   : > { %542 = vmax.xlane.f32.xlu0 %v541_v43 }
 0x24f   : > { %v645_v44 = vpop.f32.mrb[12].mxu1 }
 0x250   : > { %v651_v45 = vmul.f32 0.35355338, %v645_v44  ;;  %v874_v46 = vpop.f32.mrb[13].mxu1 }
 0x251   : > { %v648_v47 = vpop.f32.mrb[14].mxu1 }
 0x252   : > { %v875_v48 = vpop.f32.mrb[15].mxu1  ;;  %v652_v49 = vadd.f32 %v651_v45, %v263_v23 }
 0x254   : > { %v653_v50 = vsel %vm267_vm2, %v652_v49, -inf }
 0x255   : > { %654 = vmax.xlane.f32.xlu1 %v653_v50 }
 0x2ca   : > { %v318_v51 = vpop.xlane.xlu1 %317 }
 0x2cb   : > { %v319_v52 = vsub.f32 %v315_v28, %v318_v51 }
 0x2cd   : > { %v320_v53 = vmul.f32 1.442695, %v319_v52 }
 0x2cf   : > { %908 = vpow2.f32 %v320_v53 }
 0x2d2   : > { %v431_v54 = vpop.xlane.xlu0 %430 }
 0x2d3   : > { %v432_v55 = vsub.f32 %v428_v35, %v431_v54 }
 0x2d5   : > { %v433_v56 = vmul.f32 1.442695, %v432_v55 }
 0x2d7   : > { %910 = vpow2.f32 %v433_v56 }
 0x2d9   : > { %v909_v57 = vpop.eup %908 }
 0x2da   : > { %v543_v58 = vpop.xlane.xlu0 %542  ;;  %v322_v59 = vsel %vm267_vm2, %v909_v57, 0.0 }
 0x2db   : > { %v544_v60 = vsub.f32 %v540_v42, %v543_v58  ;;  %323 = vadd.xlane.f32.xlu0 %v322_v59 }
 0x2dd   : > { %v545_v61 = vmul.f32 1.442695, %v544_v60 }
 0x2df   : > { %912 = vpow2.f32 %v545_v61 }
 0x2e1   : > { %v911_v62 = vpop.eup %910 }
 0x2e2   : > { %v435_v63 = vsel %vm267_vm2, %v911_v62, 0.0  ;;  %v655_v3 = vpop.xlane.xlu1 %654 }
 0x2e3   : > { %436 = vadd.xlane.f32.xlu1 %v435_v63  ;;  %v656_v4 = vsub.f32 %v652_v49, %v655_v3 }
 0x2e5   : > { %v657_v5 = vmul.f32 1.442695, %v656_v4 }
 0x2e7   : > { %914 = vpow2.f32 %v657_v5 }
 0x2e9   : > { %v913_v0 = vpop.eup %912 }
 0x2ea   : > { %v547_v2 = vsel %vm267_vm2, %v913_v0, 0.0 }
 0x2eb   : > { %548 = vadd.xlane.f32.xlu0 %v547_v2 }
 0x2f1   : > { %v915_v6 = vpop.eup %914 }
 0x2f2   : > { %v659_v7 = vsel %vm267_vm2, %v915_v6, 0.0 }
 0x2f4   : > { %441 = vrot.lane.b32.xlu1 %v1008_v9, %s941_s10 }
 0x301   : > { %328 = vrot.lane.b32.xlu0 %v1008_v9, %s942_s11 }
 0x305   : > { %665 = vrot.lane.b32.xlu0 %v1008_v9, %s943_s12 }
 0x318   : > { %660 = vadd.xlane.f32.xlu1 %v659_v7 }
 0x329   : > { %553 = vrot.lane.b32.xlu1 %v1008_v9, %s944_s13 }
 0x368   : > { %v324_v8 = vpop.xlane.xlu0 %323 }
 0x369   : > { %916 = vrcp.f32 %v324_v8 }
 0x370   : > { %v437_v10 = vpop.xlane.xlu1 %436 }
 0x371   : > { %918 = vrcp.f32 %v437_v10 }
 0x373   : > { %v917_v11 = vpop.eup %916 }
 0x374   : > { %v326_v13 = vmul.f32 %v917_v11, %v909_v57  ;;  %v442_v16 = vpop.permute.xlu1 %441 }
 0x375   : > { %v447_v19 = vsel %vm333_vm3, %v442_v16, 0 }
 0x376   : > { %v327_v17 = vpack.c.bf16 %v326_v13, %v326_v13 }
 0x378   : > { %v549_v12 = vpop.xlane.xlu0 %548 }
 0x379   : > { %920 = vrcp.f32 %v549_v12 }
 0x37b   : > { %v919_v18 = vpop.eup %918 }
 0x37c   : > { %v329_v14 = vpop.permute.xlu0 %328  ;;  %v439_v9 = vmul.f32 %v919_v18, %v911_v62 }
 0x37d   : > { %v335_v15 = vsel %vm333_vm3, %v329_v14, 0 }
 0x37e   : > { %841 = vmatpush3.bf16.msra.mxu0 %v335_v15  ;;  %v440_v20 = vpack.c.bf16 %v439_v9, %v439_v9 }
 0x37f   : > { %852 = vmatprep.subr.bf16.mxu0 %v932_v1 }
 0x380   : > { %v666_v26 = vpop.permute.xlu0 %665 }
 0x381   : > { %843 = vmatmul.mubr.msk.bf16.vlgmr.msra.gmra.mrb[4].mxu0 %vm267_vm2, %v327_v17  ;;  %v671_v28 = vsel %vm333_vm3, %v666_v26, 0 }
 0x382   : > { %853 = vmatpush3.bf16.msra.mxu0 %v447_v19  ;;  %854 = vmatprep.mubr.msk.bf16.mxu0 %vm933_vm0, %v932_v1 }
 0x383   : > { %864 = vmatprep.subr.bf16.mxu0 %v932_v1  ;;  %v921_v21 = vpop.eup %920 }
 0x384   : > { %v551_v23 = vmul.f32 %v921_v21, %v913_v0 }
 0x386   : > { %v552_v27 = vpack.c.bf16 %v551_v23, %v551_v23 }
 0x389   : > { %855 = vmatmul.mubr.msk.bf16.vlgmr.msra.gmra.mrb[8].mxu0 %vm267_vm2, %v440_v20 }
 0x38a   : > { %866 = vmatprep.mubr.msk.bf16.mxu0 %vm933_vm0, %v932_v1 }
 0x3a5   : > { %v661_v22 = vpop.xlane.xlu1 %660 }
 0x3a6   : > { %922 = vrcp.f32 %v661_v22 }
 0x3a9   : > { %v554_v24 = vpop.permute.xlu1 %553 }
 0x3aa   : > { %v559_v25 = vsel %vm333_vm3, %v554_v24, 0 }
 0x3ab   : > { %865 = vmatpush3.bf16.msra.mxu0 %v559_v25 }
 0x3ac   : > { %876 = vmatprep.subr.bf16.mxu0 %v932_v1 }
 0x3ae   : > { %867 = vmatmul.mubr.msk.bf16.vlgmr.msra.gmra.mrb[12].mxu0 %vm267_vm2, %v552_v27 }
 0x3af   : > { %877 = vmatpush3.bf16.msra.mxu0 %v671_v28  ;;  %878 = vmatprep.mubr.msk.bf16.mxu0 %vm933_vm0, %v932_v1 }
 0x3b0   : > { %v923_v29 = vpop.eup %922 }
 0x3b1   : > { %v663_v30 = vmul.f32 %v923_v29, %v915_v6 }
 0x3b3   : > { %v664_v31 = vpack.c.bf16 %v663_v30, %v663_v30 }
 0x3b6   : > { %879 = vmatmul.mubr.msk.bf16.vlgmr.msra.gmra.mrb[16].mxu0 %vm267_vm2, %v664_v31 }
 0x454   : > { %v371_v32 = vpop.f32.mrb[4].mxu0 }
 0x455   : > { %v844_v33 = vpop.f32.mrb[5].mxu0 }
 0x456   : > { %v374_v34 = vpop.f32.mrb[6].mxu0 }
 0x457   : > { %v845_v35 = vpop.f32.mrb[7].mxu0 }
 0x45c   : > { %v483_v36 = vpop.f32.mrb[8].mxu0 }
 0x45d   : > { %714 = vrot.lane.b32.xlu1 %v483_v36, %s945_s14  ;;  %v856_v37 = vpop.f32.mrb[9].mxu0 }
 0x45e   : > { %v486_v38 = vpop.f32.mrb[10].mxu0 }
 0x45f   : > { %v857_v39 = vpop.f32.mrb[11].mxu0 }
 0x481   : > { %v595_v40 = vpop.f32.mrb[12].mxu0 }
 0x482   : > { %718 = vrot.lane.b32.xlu0 %v595_v40, %s946_s17  ;;  %v868_v41 = vpop.f32.mrb[13].mxu0 }
 0x483   : > { %v598_v1 = vpop.f32.mrb[14].mxu0 }
 0x484   : > { %v869_v42 = vpop.f32.mrb[15].mxu0 }
 0x489   : > { %v707_v43 = vpop.f32.mrb[16].mxu0 }
 0x48a   : > { %722 = vrot.lane.b32.xlu1 %v707_v43, %s947_s18  ;;  %v880_v44 = vpop.f32.mrb[17].mxu0 }
 0x48b   : > { %v710_v45 = vpop.f32.mrb[18].mxu0 }
 0x48c   : > { %v881_v46 = vpop.f32.mrb[19].mxu0 }
 0x4cf   : > { %v715_v47 = vpop.permute.xlu1 %714 }
 0x4d0   : > { %v725_v49 = vsel %vm267_vm2, %v371_v32, %v715_v47 }
 0x4f4   : > { %v719_v48 = vpop.permute.xlu0 %718 }
 0x4f5   : > { %v727_v50 = vsel %vm726_vm4, %v725_v49, %v719_v48 }
 0x4fc   : > { %v723_v51 = vpop.permute.xlu1 %722 }
 0x4fd   : > { %v729_v52 = vsel %vm728_vm5, %v727_v50, %v723_v51 }
 0x4fe   : > { %v730_v53 = vpack.c.bf16 %v729_v52, %v729_v52 }
 0x500   : > { %732 = vst.msk [vmem:[%s192_s22] sm:$0xf] %vm731_vm6, %v730_v53 }
 0x501 PF: > { %s14_s15 = sadd.s32 1, %s930_s15  }
 0x502   : > { %p11_p4 = scmp.ge.s32.totalorder %s14_s15, 4  }
 0x504   :  { %13 = sbr.rel (!%p11_p4) target bundleno = 1 (0x1), region = 66 }

// kernel: transformer_forward.19
= control target key start
LH: loop header
LB: loop body
LE: loop exit
PB: predicated region body
PF: predicated region fallthrough
CT: control target
= control target key end

     0   :  { %v312_v0 = vmov 0.0   ;;  %vm313_vm0 = vmmov 0   ;;  %vm57_vm1 = vcmask 261120   ;;  %vm144_vm2 = vcmask 523264   ;;  %s398_s1 = inlined_call_operand.vmem [shape: bf16[32,64], index: 1, kind: input, shape index: {}]   ;;  %s399_s0 = inlined_call_operand.vmem [shape: bf16[16,32], index: 0, kind: input, shape index: {}]   ;;  %s400_s3 = inlined_call_operand.vmem [shape: bf16[64,32], index: 3, kind: input, shape index: {}]   ;;  %s401_s2 = inlined_call_operand.vmem [shape: f32[1,64], index: 2, kind: input, shape index: {}]   ;;  %s402_s4 = inlined_call_operand.vmem [shape: f32[1,32], index: 4, kind: input, shape index: {}]   ;;  %s403_s5 = inlined_call_operand.vmem [shape: f32[1,32], index: 5, kind: input, shape index: {}]   ;;  %s404_s6 = inlined_call_operand.vmem [shape: f32[1,32], index: 6, kind: input, shape index: {}]   ;;  %s405_s7 = inlined_call_operand.vmem [shape: bf16[16,32], index: 7, kind: output, shape index: {}]  }
   0x1   :  { %278 = vmatprep.subr.bf16.mxu0 %v312_v0  ;;  %v300_v1 = vld [vmem:[%s398_s1] sm:$0xff]   ;;  %282 = vmatprep.mubr.msk.bf16.mxu0 %vm313_vm0, %v312_v0  ;;  %v301_v2 = vld [vmem:[%s398_s1 + $0x8] sm:$0xff]   ;;  %v305_v6 = vld [vmem:[%s400_s3 + $0x10] sm:$0xff]   ;;  %vm246_vm3 = vcmask 257024  }
   0x2   :  { %286 = vmatprep.subr.bf16.mxu1 %v312_v0  ;;  %294 = vmatprep.mubr.msk.bf16.mxu1 %vm313_vm0, %v312_v0  ;;  %v27_v3 = vld [vmem:[%s399_s0] sm:$0xff]   ;;  %v304_v5 = vld [vmem:[%s400_s3 + $0x8] sm:$0xff]   ;;  %v306_v7 = vld [vmem:[%s400_s3 + $0x18] sm:$0xff]  }
   0x3   :  { %279 = vmatpush3.bf16.msra.mxu0 %v300_v1  ;;  %v303_v4 = vld [vmem:[%s400_s3] sm:$0xff]   ;;  %v189_v19 = vunpack.c.l.bf16 %v27_v3  ;;  %v190_v23 = vunpack.c.h.bf16 %v27_v3 }
   0x4   :  { %280 = vmatprep.subr.bf16.mxu0 %v312_v0  ;;  %287 = vmatpush3.bf16.msra.mxu1 %v303_v4  ;;  %v253_v8 = vld [vmem:[%s401_s2] ss:$0 sm:$0xff] }
   0x5   :  { %288 = vmatprep.subr.bf16.mxu1 %v312_v0  ;;  %v258_v18 = vld [vmem:[%s402_s4] ss:$0 sm:$0xff] }
   0x6   :  { %v264_v48 = vld [vmem:[%s403_s5] ss:$0 sm:$0xff] }
   0x7   :  { %281 = vmatpush3.bf16.msra.mxu0 %v301_v2  ;;  %v265_v50 = vld [vmem:[%s404_s6] ss:$0 sm:$0xff] }
   0x8   :  { %289 = vmatpush3.bf16.msra.mxu1 %v304_v5 }
   0x9   :  { %290 = vmatprep.subr.bf16.mxu1 %v312_v0 }
   0xa   :  { %283 = vmatmul.mubr.msk.bf16.vlgmr.msra.gmra.mrb[0].mxu0 %vm57_vm1, %v27_v3 }
   0xc   :  { %291 = vmatpush3.bf16.msra.mxu1 %v305_v6 }
   0xd   :  { %292 = vmatprep.subr.bf16.mxu1 %v312_v0 }
  0x10   :  { %293 = vmatpush3.bf16.msra.mxu1 %v306_v7 }
  0xdd   :  { %v95_v9 = vpop.f32.mrb[0].mxu0 }
  0xde   :  { %v96_v10 = vadd.f32 %v253_v8, %v95_v9  ;;  %v284_v11 = vpop.f32.mrb[1].mxu0 }
  0xdf   :  { %v98_v12 = vpop.f32.mrb[2].mxu0 }
  0xe0   :  { %v99_v13 = vadd.f32 %v253_v8, %v98_v12  ;;  %v285_v14 = vpop.f32.mrb[3].mxu0  ;;  %v102_v15 = vmax.f32 %v96_v10, 0.0 }
  0xe2   :  { %v103_v16 = vmax.f32 %v99_v13, 0.0 }
  0xe4   :  { %v104_v17 = vpack.c.bf16 %v103_v16, %v102_v15 }
  0xe6   :  { %295 = vmatmul.mubr.msk.bf16.vlgmr.msra.gmra.mrb[0].mxu1 %vm144_vm2, %v104_v17 }
 0x1b9   :  { %v182_v20 = vpop.f32.mrb[0].mxu1 }
 0x1ba   :  { %v183_v21 = vadd.f32 %v258_v18, %v182_v20  ;;  %v296_v22 = vpop.f32.mrb[1].mxu1 }
 0x1bb   :  { %v185_v24 = vpop.f32.mrb[2].mxu1 }
 0x1bc   :  { %v186_v25 = vadd.f32 %v258_v18, %v185_v24  ;;  %v297_v26 = vpop.f32.mrb[3].mxu1  ;;  %v191_v27 = vadd.f32 %v189_v19, %v183_v21 }
 0x1be   :  { %v193_v28 = vsel %vm57_vm1, %v191_v27, 0.0  ;;  %v192_v29 = vadd.f32 %v190_v23, %v186_v25 }
 0x1bf   :  { %194 = vadd.xlane.f32.xlu0 %v193_v28 }
 0x1c0   :  { %v196_v30 = vsel %vm57_vm1, %v192_v29, 0.0 }
 0x1c3   :  { %197 = vadd.xlane.f32.xlu0 %v196_v30 }
 0x24c   :  { %v195_v31 = vpop.xlane.xlu0 %194 }
 0x24d   :  { %v200_v32 = vmul.f32 0.03125, %v195_v31 }
 0x24f   :  { %v202_v33 = vsub.f32 %v191_v27, %v200_v32 }
 0x250   :  { %v198_v34 = vpop.xlane.xlu0 %197 }
 0x251   :  { %v201_v35 = vmul.f32 0.03125, %v198_v34  ;;  %v204_v36 = vmul.f32 %v202_v33, %v202_v33 }
 0x253   :  { %v203_v37 = vsub.f32 %v192_v29, %v201_v35  ;;  %v206_v38 = vsel %vm57_vm1, %v204_v36, 0.0 }
 0x254   :  { %207 = vadd.xlane.f32.xlu1 %v206_v38 }
 0x255   :  { %v205_v39 = vmul.f32 %v203_v37, %v203_v37 }
 0x257   :  { %v209_v40 = vsel %vm57_vm1, %v205_v39, 0.0 }
 0x258   :  { %210 = vadd.xlane.f32.xlu1 %v209_v40 }
 0x2e1   :  { %v208_v41 = vpop.xlane.xlu1 %207 }
 0x2e2   :  { %v212_v42 = vmul.f32 0.03125, %v208_v41 }
 0x2e4   :  { %v214_v43 = vadd.f32 1e-05, %v212_v42 }
 0x2e5   :  { %v211_v44 = vpop.xlane.xlu1 %210 }
 0x2e6   :  { %308 = vrsqrt.f32 %v214_v43  ;;  %v213_v45 = vmul.f32 0.03125, %v211_v44 }
 0x2e8   :  { %v215_v46 = vadd.f32 1e-05, %v213_v45 }
 0x2ea   :  { %310 = vrsqrt.f32 %v215_v46 }
 0x2f0   :  { %v309_v47 = vpop.eup %308 }
 0x2f1   :  { %v218_v49 = vmul.f32 %v309_v47, %v202_v33 }
 0x2f3   :  { %v227_v51 = vmul.f32 %v264_v48, %v218_v49 }
 0x2f4   :  { %v311_v52 = vpop.eup %310 }
 0x2f5   :  { %v236_v53 = vadd.f32 %v265_v50, %v227_v51  ;;  %v219_v54 = vmul.f32 %v311_v52, %v203_v37 }
 0x2f7   :  { %v268_v55 = vpack.c.bf16 %v236_v53, %v236_v53  ;;  %v228_v56 = vmul.f32 %v264_v48, %v219_v54 }
 0x2f9   :  { %247 = vst.msk [vmem:[%s405_s7] sm:$0xf] %vm246_vm3, %v268_v55  ;;  %v237_v57 = vadd.f32 %v265_v50, %v228_v56 }
 0x2fb   :  { %v269_v58 = vpack.c.bf16 %v237_v57, %v237_v57 }
 0x2fd   :  { %248 = vst.msk [vmem:[%s405_s7 + $0x4] sm:$0xf] %vm246_vm3, %v269_v58 }

// kernel: transformer_forward.25
= control target key start
LH: loop header
LB: loop body
LE: loop exit
PB: predicated region body
PF: predicated region fallthrough
CT: control target
= control target key end

     0   :  { %s1205_s24 = smov 0   ;;  %s1322_s0 = inlined_call_operand.vmem [shape: bf16[2,8,32], index: 0, kind: input, shape index: {}]   ;;  %s1323_s1 = inlined_call_operand.vmem [shape: bf16[2,8,32], index: 1, kind: input, shape index: {}]   ;;  %s1324_s2 = inlined_call_operand.vmem [shape: bf16[32,32], index: 2, kind: input, shape index: {}]   ;;  %s1325_s3 = inlined_call_operand.vmem [shape: f32[1,32], index: 3, kind: input, shape index: {}]   ;;  %s1326_s4 = inlined_call_operand.vmem [shape: bf16[32,64], index: 4, kind: input, shape index: {}]   ;;  %s1327_s5 = inlined_call_operand.vmem [shape: f32[1,64], index: 5, kind: input, shape index: {}]   ;;  %s1328_s6 = inlined_call_operand.vmem [shape: f32[2,1,8], index: 6, kind: input, shape index: {}]   ;;  %s1329_s7 = inlined_call_operand.vmem [shape: bf16[2,8,32], index: 7, kind: output, shape index: {}]  }
   0x1 LB: > { %s992_s25 = sadd.s32 4294967295, %s1151_s24   ;;  %p996_p0 = scmp.ge.s32.totalorder %s1151_s24, 1  ;;  %s1151_s24 = sphi %s1205_s24, %s17_s24  }
   0x2   : > { %p253_p1 = scmp.lt.s32.totalorder %s1151_s24, 3 }
   0x4   : > { %p254_p2 = pnand %p996_p0, %p253_p1 }
   0x5   : > { %v1125_v0 = vld [vmem:[%s1326_s4] sm:$0xff] (!%p254_p2)   ;;  %v1153_v1 = vmov (!%p254_p2), 0.0   ;;  %v1127_v3 = vld [vmem:[%s1326_s4 + $0x8] sm:$0xff] (!%p254_p2)   ;;  %vm1154_vm0 = vmmov (!%p254_p2), 0   ;;  %p290_p3 = scmp.lt.s32.totalorder (!%p254_p2), %s992_s25, 1  ;;  %vm330_vm1 = vcmask (!%p254_p2), 261120  }
   0x6   : > { %257 = sbr.rel (%p254_p2) target bundleno = 1244 (0x4dc), region = 48  ;;  %1049 = vmatprep.subr.bf16.mxu1 (!%p254_p2), %v1153_v1  ;;  %1041 = vmatprep.subr.bf16.mxu0 (!%p254_p2), %v1153_v1  ;;  %v1126_v2 = vld [vmem:[%s1324_s2] sm:$0xff] (!%p254_p2)   ;;  %v1128_v4 = vld [vmem:[%s1324_s2 + $0x8] sm:$0xff] (!%p254_p2)   ;;  %vm444_vm2 = vcmask (!%p254_p2), 64512   ;;  %s1155_s22 = smov (!%p254_p2), 112   ;;  %vm517_vm3 = vcmask (!%p254_p2), 1043456  }
   0x7   : > { %1050 = vmatpush3.bf16.msra.mxu1 (!%p254_p2), %v1125_v0  ;;  %1053 = vmatprep.mubr.msk.bf16.mxu1 (!%p254_p2), %vm1154_vm0, %v1153_v1  ;;  %v1004_v7 = vld [vmem:[%s1327_s5] ss:$0 sm:$0xff] (!%p254_p2)  ;;  %s1156_s23 = smov (!%p254_p2), 120   ;;  %s1157_s26 = smov (!%p254_p2), 104   ;;  %vm911_vm4 = vcmask (!%p254_p2), 130048   ;;  %vm913_vm5 = vcmask (!%p254_p2), 195584  }
   0x8   : > { %1051 = vmatprep.subr.bf16.mxu1 (!%p254_p2), %v1153_v1  ;;  %1042 = vmatpush3.bf16.msra.mxu0 (!%p254_p2), %v1126_v2  ;;  %v1000_v8 = vld [vmem:[%s1325_s3] ss:$0 sm:$0xff] (!%p254_p2)  ;;  %s1159_s30 = smov (!%p254_p2), 80   ;;  %s1160_s8 = smov (!%p254_p2), 72   ;;  %vm916_vm6 = vcmask (!%p254_p2), 257024  }
   0x9   : > { %1043 = vmatprep.subr.bf16.mxu0 (!%p254_p2), %v1153_v1  ;;  %1045 = vmatprep.mubr.msk.bf16.mxu0 (!%p254_p2), %vm1154_vm0, %v1153_v1  ;;  %s1161_s9 = smov (!%p254_p2), 88   ;;  %s1162_s10 = smov (!%p254_p2), 8  }
   0xa   : > { %s1163_s12 = smov (!%p254_p2), 16   ;;  %s1164_s13 = smov (!%p254_p2), 24  }
   0xb   : > { %1052 = vmatpush3.bf16.msra.mxu1 (!%p254_p2), %v1127_v3 }
   0xc   : > { %1044 = vmatpush3.bf16.msra.mxu0 (!%p254_p2), %v1128_v4  ;;  %1063 = vmatprep.subr.bf16.mxu1 (!%p254_p2), %v1153_v1 }
   0xd   : > { %s1331_s25 = smov (!%p290_p3, %s992_s25), 1  ;;  %1057 = vmatprep.subr.bf16.mxu0 %v1153_v1 }
   0xe   : > { %s1236_s11 = sshll.u32 %s1331_s25, 2  ;;  %s300_s29 = scalar_lea.vmem %s1328_s6, %s1331_s25 }
   0xf   : > { %s297_s14 = scalar_lea.vmem %s1323_s1, %s1236_s11  ;;  %s293_s17 = scalar_lea.vmem %s1322_s0, %s1236_s11  ;;  %v1009_v32 = vld [vmem:[%s300_s29] ss:$0 sm:$0xff] }
  0x10   : > { %v375_v5 = vld [vmem:[%s297_s14] sm:$0xf]  ;;  %s1158_s25 = smov 96   ;;  %s304_s16 = scalar_lea.vmem %s1329_s7, %s1236_s11 }
  0x11   : > { %1054 = vmatmul.mubr.msk.bf16.vlgmr.msra.gmra.mrb[0].mxu1 %vm330_vm1, %v375_v5  ;;  %v306_v6 = vld [vmem:[%s293_s17] sm:$0xf] }
  0x12   : > { %1046 = vmatmul.mubr.msk.bf16.vlgmr.msra.gmra.mrb[0].mxu0 %vm330_vm1, %v306_v6  ;;  %1065 = vmatprep.mubr.msk.bf16.mxu1 %vm1154_vm0, %v1153_v1 }
  0x13   : > { %1059 = vmatprep.mubr.msk.bf16.mxu0 %vm1154_vm0, %v1153_v1 }
  0xe4   : > { %v436_v9 = vpop.f32.mrb[0].mxu1 }
  0xe5   : > { %v437_v10 = vadd.f32 %v1004_v7, %v436_v9  ;;  %v1055_v11 = vpop.f32.mrb[1].mxu1  ;;  %v368_v12 = vpop.f32.mrb[0].mxu0 }
  0xe6   : > { %v439_v13 = vpop.f32.mrb[2].mxu1  ;;  %v369_v14 = vadd.f32 %v1000_v8, %v368_v12  ;;  %v1047_v15 = vpop.f32.mrb[1].mxu0 }
  0xe7   : > { %v1258_v16 = vpack.c.bf16 %v437_v10, %v437_v10  ;;  %v1056_v17 = vpop.f32.mrb[3].mxu1  ;;  %v371_v18 = vpop.f32.mrb[2].mxu0 }
  0xe8   : > { %v1048_v19 = vpop.f32.mrb[3].mxu0  ;;  %v374_v20 = vpack.c.bf16 %v369_v14, %v369_v14 }
  0xe9   : > { %676 = vrot.lane.b32.xlu1 %v1258_v16, %s1155_s22  ;;  %564 = vrot.lane.b32.xlu0 %v1258_v16, %s1156_s23  ;;  %v449_v21 = vsel %vm444_vm2, %v1258_v16, 0 }
  0xea   : > { %1058 = vmatpush3.bf16.xpose.msra.mxu0 %v449_v21 }
  0xeb   : > { %1069 = vmatprep.subr.bf16.mxu0 %v1153_v1 }
  0xed   : > { %674 = vrot.lane.b32.xlu1 %v374_v20, %s1155_s22  ;;  %562 = vrot.lane.b32.xlu0 %v374_v20, %s1156_s23 }
  0xf1   : > { %786 = vrot.lane.b32.xlu1 %v374_v20, %s1157_s26  ;;  %788 = vrot.lane.b32.xlu0 %v1258_v16, %s1157_s26 }
  0xf2   : > { %1060 = vmatmul.mubr.msk.bf16.vlgmr.msra.gmra.mrb[4].mxu0 %vm444_vm2, %v374_v20 }
  0xf3   : > { %1071 = vmatprep.mubr.msk.bf16.mxu0 %vm1154_vm0, %v1153_v1 }
 0x15b   : > { %v565_v22 = vpop.permute.xlu0 %564  ;;  %v677_v24 = vpop.permute.xlu1 %676 }
 0x15c   : > { %v570_v23 = vsel %vm444_vm2, %v565_v22, 0  ;;  %v682_v26 = vsel %vm444_vm2, %v677_v24, 0 }
 0x15d   : > { %1070 = vmatpush3.bf16.xpose.msra.mxu0 %v570_v23 }
 0x15e   : > { %1081 = vmatprep.subr.bf16.mxu0 %v1153_v1 }
 0x15f   : > { %v563_v25 = vpop.permute.xlu0 %562  ;;  %v675_v28 = vpop.permute.xlu1 %674 }
 0x163   : > { %v789_v27 = vpop.permute.xlu0 %788  ;;  %v787_v30 = vpop.permute.xlu1 %786 }
 0x164   : > { %1072 = vmatmul.mubr.msk.bf16.vlgmr.msra.gmra.mrb[8].mxu0 %vm444_vm2, %v563_v25  ;;  %v794_v29 = vsel %vm444_vm2, %v789_v27, 0 }
 0x165   : > { %1082 = vmatpush3.bf16.xpose.msra.mxu0 %v682_v26  ;;  %1083 = vmatprep.mubr.msk.bf16.mxu0 %vm1154_vm0, %v1153_v1 }
 0x166   : > { %1093 = vmatprep.subr.bf16.mxu0 %v1153_v1 }
 0x16c   : > { %1084 = vmatmul.mubr.msk.bf16.vlgmr.msra.gmra.mrb[12].mxu0 %vm444_vm2, %v675_v28 }
 0x16d   : > { %1094 = vmatpush3.bf16.xpose.msra.mxu0 %v794_v29  ;;  %1095 = vmatprep.mubr.msk.bf16.mxu0 %vm1154_vm0, %v1153_v1 }
 0x174   : > { %1096 = vmatmul.mubr.msk.bf16.vlgmr.msra.gmra.mrb[16].mxu0 %vm444_vm2, %v787_v30 }
 0x1c5   : > { %v485_v31 = vpop.f32.mrb[4].mxu0 }
 0x1c6   : > { %v491_v33 = vmul.f32 0.35355338, %v485_v31  ;;  %v1061_v34 = vpop.f32.mrb[5].mxu0 }
 0x1c7   : > { %v488_v35 = vpop.f32.mrb[6].mxu0 }
 0x1c8   : > { %v1062_v36 = vpop.f32.mrb[7].mxu0  ;;  %v498_v37 = vadd.f32 %v1009_v32, %v491_v33 }
 0x1ca   : > { %v499_v38 = vsel %vm444_vm2, %v498_v37, -inf }
 0x1cb   : > { %500 = vmax.xlane.f32.xlu0 %v499_v38 }
 0x237   : > { %v606_v39 = vpop.f32.mrb[8].mxu0 }
 0x238   : > { %v612_v40 = vmul.f32 0.35355338, %v606_v39  ;;  %v1073_v41 = vpop.f32.mrb[9].mxu0 }
 0x239   : > { %v609_v42 = vpop.f32.mrb[10].mxu0 }
 0x23a   : > { %v1074_v43 = vpop.f32.mrb[11].mxu0  ;;  %v613_v44 = vadd.f32 %v1009_v32, %v612_v40 }
 0x23c   : > { %v614_v45 = vsel %vm444_vm2, %v613_v44, -inf }
 0x23d   : > { %615 = vmax.xlane.f32.xlu1 %v614_v45 }
 0x23f   : > { %v718_v46 = vpop.f32.mrb[12].mxu0 }
 0x240   : > { %v724_v47 = vmul.f32 0.35355338, %v718_v46  ;;  %v1085_v48 = vpop.f32.mrb[13].mxu0 }
 0x241   : > { %v721_v49 = vpop.f32.mrb[14].mxu0 }
 0x242   : > { %v1086_v50 = vpop.f32.mrb[15].mxu0  ;;  %v725_v51 = vadd.f32 %v1009_v32, %v724_v47 }
 0x244   : > { %v726_v52 = vsel %vm444_vm2, %v725_v51, -inf }
 0x245   : > { %727 = vmax.xlane.f32.xlu0 %v726_v52 }
 0x247   : > { %v830_v53 = vpop.f32.mrb[16].mxu0 }
 0x248   : > { %v836_v54 = vmul.f32 0.35355338, %v830_v53  ;;  %v1097_v55 = vpop.f32.mrb[17].mxu0 }
 0x249   : > { %v833_v56 = vpop.f32.mrb[18].mxu0 }
 0x24a   : > { %v1098_v57 = vpop.f32.mrb[19].mxu0  ;;  %v837_v58 = vadd.f32 %v1009_v32, %v836_v54 }
 0x24c   : > { %v838_v59 = vsel %vm444_vm2, %v837_v58, -inf }
 0x24d   : > { %839 = vmax.xlane.f32.xlu0 %v838_v59 }
 0x258   : > { %v501_v60 = vpop.xlane.xlu0 %500 }
 0x259   : > { %v502_v61 = vsub.f32 %v498_v37, %v501_v60 }
 0x25b   : > { %v503_v62 = vmul.f32 1.442695, %v502_v61 }
 0x25d   : > { %1129 = vpow2.f32 %v503_v62 }
 0x267   : > { %v1130_v63 = vpop.eup %1129 }
 0x268   : > { %v505_v0 = vsel %vm444_vm2, %v1130_v63, 0.0 }
 0x269   : > { %506 = vadd.xlane.f32.xlu1 %v505_v0 }
 0x27a   : > { %512 = vrot.lane.b32.xlu1 %v1258_v16, %s1158_s25 }
 0x2ca   : > { %v616_v2 = vpop.xlane.xlu1 %615 }
 0x2cb   : > { %v617_v3 = vsub.f32 %v613_v44, %v616_v2 }
 0x2cd   : > { %v618_v4 = vmul.f32 1.442695, %v617_v3 }
 0x2cf   : > { %1131 = vpow2.f32 %v618_v4 }
 0x2d2   : > { %v728_v5 = vpop.xlane.xlu0 %727 }
 0x2d3   : > { %v729_v6 = vsub.f32 %v725_v51, %v728_v5 }
 0x2d5   : > { %v730_v7 = vmul.f32 1.442695, %v729_v6 }
 0x2d7   : > { %1133 = vpow2.f32 %v730_v7 }
 0x2d9   : > { %v1132_v8 = vpop.eup %1131 }
 0x2da   : > { %v840_v9 = vpop.xlane.xlu0 %839  ;;  %v620_v10 = vsel %vm444_vm2, %v1132_v8, 0.0 }
 0x2db   : > { %v841_v11 = vsub.f32 %v837_v58, %v840_v9  ;;  %621 = vadd.xlane.f32.xlu0 %v620_v10 }
 0x2dd   : > { %v842_v12 = vmul.f32 1.442695, %v841_v11 }
 0x2df   : > { %1135 = vpow2.f32 %v842_v12 }
 0x2e1   : > { %v1134_v13 = vpop.eup %1133 }
 0x2e2   : > { %v732_v14 = vsel %vm444_vm2, %v1134_v13, 0.0 }
 0x2e3   : > { %733 = vadd.xlane.f32.xlu1 %v732_v14 }
 0x2e9   : > { %v1136_v15 = vpop.eup %1135 }
 0x2ea   : > { %v844_v17 = vsel %vm444_vm2, %v1136_v15, 0.0 }
 0x2eb   : > { %845 = vadd.xlane.f32.xlu0 %v844_v17 }
 0x2f4   : > { %738 = vrot.lane.b32.xlu1 %v1258_v16, %s1159_s30 }
 0x2f6   : > { %v507_v18 = vpop.xlane.xlu1 %506 }
 0x2f7   : > { %1137 = vrcp.f32 %v507_v18 }
 0x2f8   : > { %850 = vrot.lane.b32.xlu1 %v1258_v16, %s1160_s8 }
 0x2fa   : > { %v513_v19 = vpop.permute.xlu1 %512 }
 0x2fb   : > { %v519_v20 = vsel %vm517_vm3, %v513_v19, 0 }
 0x2fc   : > { %1064 = vmatpush3.bf16.msra.mxu1 %v519_v20 }
 0x2fd   : > { %1075 = vmatprep.subr.bf16.mxu1 %v1153_v1 }
 0x301   : > { %v1138_v21 = vpop.eup %1137  ;;  %626 = vrot.lane.b32.xlu0 %v1258_v16, %s1161_s9 }
 0x302   : > { %v509_v22 = vmul.f32 %v1138_v21, %v1130_v63 }
 0x304   : > { %v510_v23 = vpack.c.bf16 %v509_v22, %v509_v22 }
 0x306   : > { %1066 = vmatmul.mubr.msk.bf16.vlgmr.msra.gmra.mrb[4].mxu1 %vm444_vm2, %v510_v23 }
 0x307   : > { %1077 = vmatprep.mubr.msk.bf16.mxu1 %vm1154_vm0, %v1153_v1 }
 0x368   : > { %v622_v24 = vpop.xlane.xlu0 %621 }
 0x369   : > { %1139 = vrcp.f32 %v622_v24 }
 0x370   : > { %v734_v25 = vpop.xlane.xlu1 %733 }
 0x371   : > { %1141 = vrcp.f32 %v734_v25 }
 0x373   : > { %v1140_v26 = vpop.eup %1139 }
 0x374   : > { %v624_v28 = vmul.f32 %v1140_v26, %v1132_v8  ;;  %v739_v31 = vpop.permute.xlu1 %738 }
 0x375   : > { %v744_v33 = vsel %vm517_vm3, %v739_v31, 0 }
 0x376   : > { %v625_v16 = vpack.c.bf16 %v624_v28, %v624_v28 }
 0x378   : > { %v846_v27 = vpop.xlane.xlu0 %845  ;;  %v851_v35 = vpop.permute.xlu1 %850 }
 0x379   : > { %1143 = vrcp.f32 %v846_v27  ;;  %v856_v38 = vsel %vm517_vm3, %v851_v35, 0 }
 0x37b   : > { %v1142_v32 = vpop.eup %1141 }
 0x37c   : > { %v627_v29 = vpop.permute.xlu0 %626  ;;  %v736_v34 = vmul.f32 %v1142_v32, %v1134_v13 }
 0x37d   : > { %v632_v30 = vsel %vm517_vm3, %v627_v29, 0 }
 0x37e   : > { %1076 = vmatpush3.bf16.msra.mxu1 %v632_v30  ;;  %v737_v36 = vpack.c.bf16 %v736_v34, %v736_v34 }
 0x37f   : > { %1087 = vmatprep.subr.bf16.mxu1 %v1153_v1 }
 0x381   : > { %1078 = vmatmul.mubr.msk.bf16.vlgmr.msra.gmra.mrb[8].mxu1 %vm444_vm2, %v625_v16 }
 0x382   : > { %1088 = vmatpush3.bf16.msra.mxu1 %v744_v33  ;;  %1089 = vmatprep.mubr.msk.bf16.mxu1 %vm1154_vm0, %v1153_v1 }
 0x383   : > { %1099 = vmatprep.subr.bf16.mxu1 %v1153_v1  ;;  %v1144_v37 = vpop.eup %1143 }
 0x384   : > { %v848_v39 = vmul.f32 %v1144_v37, %v1136_v15 }
 0x386   : > { %v849_v40 = vpack.c.bf16 %v848_v39, %v848_v39 }
 0x389   : > { %1090 = vmatmul.mubr.msk.bf16.vlgmr.msra.gmra.mrb[12].mxu1 %vm444_vm2, %v737_v36 }
 0x38a   : > { %1100 = vmatpush3.bf16.msra.mxu1 %v856_v38  ;;  %1101 = vmatprep.mubr.msk.bf16.mxu1 %vm1154_vm0, %v1153_v1 }
 0x391   : > { %1102 = vmatmul.mubr.msk.bf16.vlgmr.msra.gmra.mrb[16].mxu1 %vm444_vm2, %v849_v40 }
 0x3d9   : > { %v555_v41 = vpop.f32.mrb[4].mxu1 }
 0x3da   : > { %v1067_v42 = vpop.f32.mrb[5].mxu1 }
 0x3db   : > { %v558_v43 = vpop.f32.mrb[6].mxu1 }
 0x3dc   : > { %v1068_v44 = vpop.f32.mrb[7].mxu1 }
 0x454   : > { %v668_v45 = vpop.f32.mrb[8].mxu1 }
 0x455   : > { %899 = vrot.lane.b32.xlu0 %v668_v45, %s1162_s10  ;;  %v1079_v46 = vpop.f32.mrb[9].mxu1 }
 0x456   : > { %v671_v47 = vpop.f32.mrb[10].mxu1 }
 0x457   : > { %v1080_v48 = vpop.f32.mrb[11].mxu1 }
 0x45c   : > { %v780_v49 = vpop.f32.mrb[12].mxu1 }
 0x45d   : > { %903 = vrot.lane.b32.xlu1 %v780_v49, %s1163_s12  ;;  %v1091_v50 = vpop.f32.mrb[13].mxu1 }
 0x45e   : > { %v783_v1 = vpop.f32.mrb[14].mxu1 }
 0x45f   : > { %v1092_v51 = vpop.f32.mrb[15].mxu1 }
 0x464   : > { %v892_v52 = vpop.f32.mrb[16].mxu1 }
 0x465   : > { %907 = vrot.lane.b32.xlu0 %v892_v52, %s1164_s13  ;;  %v1103_v53 = vpop.f32.mrb[17].mxu1 }
 0x466   : > { %v895_v54 = vpop.f32.mrb[18].mxu1 }
 0x467   : > { %v1104_v55 = vpop.f32.mrb[19].mxu1 }
 0x4c7   : > { %v900_v56 = vpop.permute.xlu0 %899 }
 0x4c8   : > { %v910_v58 = vsel %vm444_vm2, %v555_v41, %v900_v56 }
 0x4cf   : > { %v904_v57 = vpop.permute.xlu1 %903 }
 0x4d0   : > { %v912_v59 = vsel %vm911_vm4, %v910_v58, %v904_v57 }
 0x4d7   : > { %v908_v60 = vpop.permute.xlu0 %907 }
 0x4d8   : > { %v914_v61 = vsel %vm913_vm5, %v912_v59, %v908_v60 }
 0x4d9   : > { %v915_v62 = vpack.c.bf16 %v914_v61, %v914_v61 }
 0x4db   : > { %917 = vst.msk [vmem:[%s304_s16] sm:$0xf] %vm916_vm6, %v915_v62 }
 0x4dc PF: > { %s17_s24 = sadd.s32 1, %s1151_s24  }
 0x4dd   : > { %p14_p4 = scmp.ge.s32.totalorder %s17_s24, 4  }
 0x4df   :  { %16 = sbr.rel (!%p14_p4) target bundleno = 1 (0x1), region = 84 }

// kernel: transformer_forward.30
= control target key start
LH: loop header
LB: loop body
LE: loop exit
PB: predicated region body
PF: predicated region fallthrough
CT: control target
= control target key end

     0   :  { %14 = vsyncpa [#allocation3], 0  ;;  %s1623_s0 = inlined_call_operand.vmem [shape: bf16[2,8,32], index: 0, kind: input, shape index: {}]   ;;  %s1624_s1 = inlined_call_operand.vmem [shape: bf16[2,8,32], index: 1, kind: input, shape index: {}]   ;;  %s1625_s2 = inlined_call_operand.vmem [shape: bf16[32,32], index: 2, kind: input, shape index: {}]   ;;  %s1626_s3 = inlined_call_operand.vmem [shape: f32[1,32], index: 3, kind: input, shape index: {}]   ;;  %s1627_s4 = inlined_call_operand.vmem [shape: bf16[32,64], index: 4, kind: input, shape index: {}]   ;;  %s1628_s5 = inlined_call_operand.vmem [shape: f32[1,64], index: 5, kind: input, shape index: {}]   ;;  %s1629_s6 = inlined_call_operand.vmem [shape: f32[2,1,8], index: 6, kind: input, shape index: {}]   ;;  %s1630_s7 = inlined_call_operand.vmem [shape: bf16[2,8,32], index: 7, kind: output, shape index: {0}]   ;;  %s1631_s8 = inlined_call_operand.hbm [shape: f32[2,4,8,8], index: 8, kind: output, shape index: {1}]  }
   0x1   :  { %16 = vsyncpa [#allocation3 + $0x1], 0  ;;  %s1400_s27 = smov 0   ;;  %s1402_s28 = smov 0  }
   0x2   :  { %s1404_s29 = smov 0   ;;  %s1406_s30 = smov 0  }
   0x3 LB: > { %s1421_s9 = sadd.s32 4294967295, %s1339_s30   ;;  %s1088_s10 = sadd.s32 4294967294, %s1339_s30   ;;  %s1339_s30 = sphi %s1406_s30, %s1637_s30   ;;  %s1335_s29 = sphi %s1404_s29, %s1636_s29   ;;  %s1331_s28 = sphi %s1402_s28, %s1635_s28   ;;  %s1327_s27 = sphi %s1400_s27, %s1634_s27  }
   0x4   : > { %s1425_s11 = sadd.s32 1, %s1339_s30   ;;  %s217_s12 = sadd.s32 1, %s1335_s29 }
   0x5   : > { %s214_s13 = ssub.s32 %s1339_s30, %s1425_s11  ;;  %p227_p0 = scmp.ne.s32.totalorder %s1335_s29, %s1331_s28 }
   0x6   : > { %p215_p1 = scmp.eq.s32.totalorder %s214_s13, 0  ;;  %p228_p2 = scmp.eq.s32.totalorder %s1421_s9, 1 }
   0x7   : > { %p233_p3 = scmp.ne.s32.totalorder %s1331_s28, %s1327_s27  ;;  %p234_p4 = scmp.eq.s32.totalorder %s1088_s10, 1 }
   0x8   : > { %s1436_s14 = scalar_select %p215_p1, %s1335_s29, %s217_s12  }
   0x9   : > { %p1438_p5 = por %p228_p2, %p227_p0  ;;  %p1442_p6 = por %p234_p4, %p233_p3 }
   0xa   : > { %p1091_p7 = scmp.ge.s32.totalorder %s1339_s30, 1  ;;  %p284_p8 = scmp.lt.s32.totalorder %s1339_s30, 3 }
   0xc   : > { %p285_p9 = pnand %p1091_p7, %p284_p8 }
   0xd   : > { %v1257_v0 = vld [vmem:[%s1627_s4] sm:$0xff] (!%p285_p9)   ;;  %v1341_v1 = vmov (!%p285_p9), 0.0   ;;  %v1259_v3 = vld [vmem:[%s1627_s4 + $0x8] sm:$0xff] (!%p285_p9)   ;;  %vm1342_vm0 = vmmov (!%p285_p9), 0   ;;  %p328_p10 = scmp.lt.s32.totalorder (!%p285_p9), %s1421_s9, 1  ;;  %vm368_vm1 = vcmask (!%p285_p9), 261120  }
   0xe   : > { %288 = sbr.rel (%p285_p9) target bundleno = 1261 (0x4ed), region = 48  ;;  %1149 = vmatprep.subr.bf16.mxu1 (!%p285_p9), %v1341_v1  ;;  %1141 = vmatprep.subr.bf16.mxu0 (!%p285_p9), %v1341_v1  ;;  %v1258_v2 = vld [vmem:[%s1625_s2] sm:$0xff] (!%p285_p9)   ;;  %v1260_v4 = vld [vmem:[%s1625_s2 + $0x8] sm:$0xff] (!%p285_p9)   ;;  %vm482_vm2 = vcmask (!%p285_p9), 64512   ;;  %s1343_s24 = smov (!%p285_p9), 112   ;;  %vm555_vm3 = vcmask (!%p285_p9), 1043456  }
   0xf   : > { %1150 = vmatpush3.bf16.msra.mxu1 (!%p285_p9), %v1257_v0  ;;  %1153 = vmatprep.mubr.msk.bf16.mxu1 (!%p285_p9), %vm1342_vm0, %v1341_v1  ;;  %v1100_v7 = vld [vmem:[%s1628_s5] ss:$0 sm:$0xff] (!%p285_p9)  ;;  %s1344_s10 = smov (!%p285_p9), 120   ;;  %s1345_s12 = smov (!%p285_p9), 104  }
  0x10   : > { %1151 = vmatprep.subr.bf16.mxu1 (!%p285_p9), %v1341_v1  ;;  %1142 = vmatpush3.bf16.msra.mxu0 (!%p285_p9), %v1258_v2  ;;  %v1096_v8 = vld [vmem:[%s1626_s3] ss:$0 sm:$0xff] (!%p285_p9)  ;;  %s1348_s20 = smov (!%p285_p9), 72   ;;  %s325_s21 = sand.u32 (!%p285_p9), 1, %s1331_s28  }
  0x11   : > { %1143 = vmatprep.subr.bf16.mxu0 (!%p285_p9), %v1341_v1  ;;  %1145 = vmatprep.mubr.msk.bf16.mxu0 (!%p285_p9), %vm1342_vm0, %v1341_v1  ;;  %s1092_s22 = sshll.u32 (!%p285_p9), %s325_s21, 5  ;;  %s1349_s23 = smov (!%p285_p9), 88  }
  0x13   : > { %1152 = vmatpush3.bf16.msra.mxu1 (!%p285_p9), %v1259_v3 }
  0x14   : > { %1144 = vmatpush3.bf16.msra.mxu0 (!%p285_p9), %v1260_v4  ;;  %1163 = vmatprep.subr.bf16.mxu1 (!%p285_p9), %v1341_v1 }
  0x15   : > { %s1468_s25 = scalar_select %p328_p10, %s1421_s9, 1  ;;  %1157 = vmatprep.subr.bf16.mxu0 %v1341_v1 }
  0x17   : > { %s1473_s26 = sshll.u32 %s1468_s25, 2  ;;  %s338_s18 = scalar_lea.vmem %s1629_s6, %s1468_s25 }
  0x18   : > { %s335_s13 = scalar_lea.vmem %s1624_s1, %s1473_s26  ;;  %s331_s19 = scalar_lea.vmem %s1623_s0, %s1473_s26  ;;  %v1105_v32 = vld [vmem:[%s338_s18] ss:$0 sm:$0xff] }
  0x19   : > { %v413_v5 = vld [vmem:[%s335_s13] sm:$0xf]  ;;  %s1346_s25 = smov 96  }
  0x1a   : > { %1154 = vmatmul.mubr.msk.bf16.vlgmr.msra.gmra.mrb[0].mxu1 %vm368_vm1, %v413_v5  ;;  %v344_v6 = vld [vmem:[%s331_s19] sm:$0xf]  ;;  %s1347_s19 = smov 80  }
  0x1b   : > { %1146 = vmatmul.mubr.msk.bf16.vlgmr.msra.gmra.mrb[0].mxu0 %vm368_vm1, %v344_v6  ;;  %1165 = vmatprep.mubr.msk.bf16.mxu1 %vm1342_vm0, %v1341_v1 }
  0x1c   : > { %1159 = vmatprep.mubr.msk.bf16.mxu0 %vm1342_vm0, %v1341_v1 }
  0xed   : > { %v474_v9 = vpop.f32.mrb[0].mxu1 }
  0xee   : > { %v475_v10 = vadd.f32 %v1100_v7, %v474_v9  ;;  %v1155_v11 = vpop.f32.mrb[1].mxu1  ;;  %v406_v12 = vpop.f32.mrb[0].mxu0 }
  0xef   : > { %v477_v13 = vpop.f32.mrb[2].mxu1  ;;  %v407_v14 = vadd.f32 %v1096_v8, %v406_v12  ;;  %v1147_v15 = vpop.f32.mrb[1].mxu0 }
  0xf0   : > { %v1495_v16 = vpack.c.bf16 %v475_v10, %v475_v10  ;;  %v1156_v17 = vpop.f32.mrb[3].mxu1  ;;  %v409_v18 = vpop.f32.mrb[2].mxu0 }
  0xf1   : > { %v1148_v19 = vpop.f32.mrb[3].mxu0  ;;  %v412_v20 = vpack.c.bf16 %v407_v14, %v407_v14 }
  0xf2   : > { %714 = vrot.lane.b32.xlu1 %v1495_v16, %s1343_s24  ;;  %602 = vrot.lane.b32.xlu0 %v1495_v16, %s1344_s10  ;;  %v487_v21 = vsel %vm482_vm2, %v1495_v16, 0 }
  0xf3   : > { %1158 = vmatpush3.bf16.xpose.msra.mxu0 %v487_v21 }
  0xf4   : > { %1169 = vmatprep.subr.bf16.mxu0 %v1341_v1 }
  0xf6   : > { %712 = vrot.lane.b32.xlu1 %v412_v20, %s1343_s24  ;;  %600 = vrot.lane.b32.xlu0 %v412_v20, %s1344_s10  ;;  %s1539_s24 = scalar_lea.vmem [#allocation2], %s1092_s22  ;;  %s1350_s10 = smov 8  }
  0xf7   : > { %s981_s13 = sshll.u32 %s1539_s24, 4  ;;  %s1352_s22 = smov [#allocation2]   ;;  %s1572_s13 = int_to_ptr.vmem [resolvable:$true] %s981_s13 }
  0xfa   : > { %824 = vrot.lane.b32.xlu1 %v412_v20, %s1345_s12  ;;  %826 = vrot.lane.b32.xlu0 %v1495_v16, %s1345_s12  ;;  %s1118_s12 = sshll.u32 %s1421_s9, 9  ;;  %s1277_s9 = scalar_lea.vmem %s1572_s13, 512 }
  0xfb   : > { %1160 = vmatmul.mubr.msk.bf16.vlgmr.msra.gmra.mrb[4].mxu0 %vm482_vm2, %v412_v20  ;;  %p1278_p11 = scmp.ne.s32.totalorder %s1572_s13, %s1277_s9 }
  0xfc   : > { %1171 = vmatprep.mubr.msk.bf16.mxu0 %vm1342_vm0, %v1341_v1 }
  0xfd   : > { %p1279_p12 = pnand %p1278_p11, %p1438_p5 }
  0xff   : > { %p1280_p13 = pneg %p1279_p12 }
 0x164   : > { %v603_v22 = vpop.permute.xlu0 %602  ;;  %v715_v24 = vpop.permute.xlu1 %714 }
 0x165   : > { %v608_v23 = vsel %vm482_vm2, %v603_v22, 0  ;;  %v720_v26 = vsel %vm482_vm2, %v715_v24, 0 }
 0x166   : > { %1170 = vmatpush3.bf16.xpose.msra.mxu0 %v608_v23 }
 0x167   : > { %1181 = vmatprep.subr.bf16.mxu0 %v1341_v1 }
 0x168   : > { %v601_v25 = vpop.permute.xlu0 %600  ;;  %v713_v28 = vpop.permute.xlu1 %712 }
 0x16c   : > { %v827_v27 = vpop.permute.xlu0 %826  ;;  %v825_v30 = vpop.permute.xlu1 %824 }
 0x16d   : > { %1172 = vmatmul.mubr.msk.bf16.vlgmr.msra.gmra.mrb[8].mxu0 %vm482_vm2, %v601_v25  ;;  %v832_v29 = vsel %vm482_vm2, %v827_v27, 0 }
 0x16e   : > { %1182 = vmatpush3.bf16.xpose.msra.mxu0 %v720_v26  ;;  %1183 = vmatprep.mubr.msk.bf16.mxu0 %vm1342_vm0, %v1341_v1 }
 0x16f   : > { %1193 = vmatprep.subr.bf16.mxu0 %v1341_v1 }
 0x175   : > { %1184 = vmatmul.mubr.msk.bf16.vlgmr.msra.gmra.mrb[12].mxu0 %vm482_vm2, %v713_v28 }
 0x176   : > { %1194 = vmatpush3.bf16.xpose.msra.mxu0 %v832_v29  ;;  %1195 = vmatprep.mubr.msk.bf16.mxu0 %vm1342_vm0, %v1341_v1 }
 0x17d   : > { %1196 = vmatmul.mubr.msk.bf16.vlgmr.msra.gmra.mrb[16].mxu0 %vm482_vm2, %v825_v30 }
 0x1ce   : > { %v523_v31 = vpop.f32.mrb[4].mxu0 }
 0x1cf   : > { %v529_v33 = vmul.f32 0.35355338, %v523_v31  ;;  %v1161_v34 = vpop.f32.mrb[5].mxu0 }
 0x1d0   : > { %v526_v35 = vpop.f32.mrb[6].mxu0 }
 0x1d1   : > { %v1162_v36 = vpop.f32.mrb[7].mxu0  ;;  %v536_v37 = vadd.f32 %v1105_v32, %v529_v33 }
 0x1d3   : > { %v537_v38 = vsel %vm482_vm2, %v536_v37, -inf }
 0x1d4   : > { %538 = vmax.xlane.f32.xlu0 %v537_v38 }
 0x240   : > { %v644_v39 = vpop.f32.mrb[8].mxu0 }
 0x241   : > { %v650_v40 = vmul.f32 0.35355338, %v644_v39  ;;  %v1173_v41 = vpop.f32.mrb[9].mxu0 }
 0x242   : > { %v647_v42 = vpop.f32.mrb[10].mxu0 }
 0x243   : > { %v1174_v43 = vpop.f32.mrb[11].mxu0  ;;  %v651_v44 = vadd.f32 %v1105_v32, %v650_v40 }
 0x245   : > { %v652_v45 = vsel %vm482_vm2, %v651_v44, -inf }
 0x246   : > { %653 = vmax.xlane.f32.xlu1 %v652_v45 }
 0x248   : > { %v756_v46 = vpop.f32.mrb[12].mxu0 }
 0x249   : > { %v762_v47 = vmul.f32 0.35355338, %v756_v46  ;;  %v1185_v48 = vpop.f32.mrb[13].mxu0 }
 0x24a   : > { %v759_v49 = vpop.f32.mrb[14].mxu0 }
 0x24b   : > { %v1186_v50 = vpop.f32.mrb[15].mxu0  ;;  %v763_v51 = vadd.f32 %v1105_v32, %v762_v47 }
 0x24d   : > { %v764_v52 = vsel %vm482_vm2, %v763_v51, -inf }
 0x24e   : > { %765 = vmax.xlane.f32.xlu0 %v764_v52 }
 0x250   : > { %v868_v53 = vpop.f32.mrb[16].mxu0 }
 0x251   : > { %v874_v54 = vmul.f32 0.35355338, %v868_v53  ;;  %v1197_v55 = vpop.f32.mrb[17].mxu0 }
 0x252   : > { %v871_v56 = vpop.f32.mrb[18].mxu0 }
 0x253   : > { %v1198_v57 = vpop.f32.mrb[19].mxu0  ;;  %v875_v58 = vadd.f32 %v1105_v32, %v874_v54 }
 0x255   : > { %v876_v59 = vsel %vm482_vm2, %v875_v58, -inf }
 0x256   : > { %877 = vmax.xlane.f32.xlu0 %v876_v59 }
 0x261   : > { %v539_v60 = vpop.xlane.xlu0 %538 }
 0x262   : > { %v540_v61 = vsub.f32 %v536_v37, %v539_v60 }
 0x264   : > { %v541_v62 = vmul.f32 1.442695, %v540_v61 }
 0x266   : > { %1261 = vpow2.f32 %v541_v62 }
 0x270   : > { %v1262_v63 = vpop.eup %1261 }
 0x271   : > { %v543_v0 = vsel %vm482_vm2, %v1262_v63, 0.0 }
 0x272   : > { %544 = vadd.xlane.f32.xlu1 %v543_v0 }
 0x283   : > { %550 = vrot.lane.b32.xlu1 %v1495_v16, %s1346_s25  ;;  %s1570_s25 = scalar_lea.hbm %s1631_s8, %s1118_s12 }
 0x2d3   : > { %v654_v2 = vpop.xlane.xlu1 %653 }
 0x2d4   : > { %v655_v3 = vsub.f32 %v651_v44, %v654_v2 }
 0x2d6   : > { %v656_v4 = vmul.f32 1.442695, %v655_v3 }
 0x2d8   : > { %1263 = vpow2.f32 %v656_v4 }
 0x2db   : > { %v766_v5 = vpop.xlane.xlu0 %765 }
 0x2dc   : > { %v767_v6 = vsub.f32 %v763_v51, %v766_v5 }
 0x2de   : > { %v768_v7 = vmul.f32 1.442695, %v767_v6 }
 0x2e0   : > { %1265 = vpow2.f32 %v768_v7 }
 0x2e2   : > { %v1264_v8 = vpop.eup %1263 }
 0x2e3   : > { %v878_v9 = vpop.xlane.xlu0 %877  ;;  %v658_v10 = vsel %vm482_vm2, %v1264_v8, 0.0 }
 0x2e4   : > { %v879_v11 = vsub.f32 %v875_v58, %v878_v9  ;;  %659 = vadd.xlane.f32.xlu0 %v658_v10 }
 0x2e6   : > { %v880_v12 = vmul.f32 1.442695, %v879_v11 }
 0x2e8   : > { %1267 = vpow2.f32 %v880_v12 }
 0x2ea   : > { %v1266_v13 = vpop.eup %1265 }
 0x2eb   : > { %v770_v14 = vsel %vm482_vm2, %v1266_v13, 0.0 }
 0x2ec   : > { %771 = vadd.xlane.f32.xlu1 %v770_v14 }
 0x2f2   : > { %v1268_v15 = vpop.eup %1267 }
 0x2f3   : > { %v882_v17 = vsel %vm482_vm2, %v1268_v15, 0.0 }
 0x2f4   : > { %883 = vadd.xlane.f32.xlu0 %v882_v17 }
 0x2fd   : > { %776 = vrot.lane.b32.xlu1 %v1495_v16, %s1347_s19  ;;  %s1351_s19 = smov 16  }
 0x2ff   : > { %v545_v18 = vpop.xlane.xlu1 %544 }
 0x300   : > { %1269 = vrcp.f32 %v545_v18 }
 0x301   : > { %888 = vrot.lane.b32.xlu1 %v1495_v16, %s1348_s20  ;;  %s1576_s20 = scalar_lea.sflag [#allocation3], %s325_s21 }
 0x303   : > { %v551_v19 = vpop.permute.xlu1 %550 }
 0x304   : > { %v557_v20 = vsel %vm555_vm3, %v551_v19, 0 }
 0x305   : > { %1164 = vmatpush3.bf16.msra.mxu1 %v557_v20 }
 0x306   : > { %1175 = vmatprep.subr.bf16.mxu1 %v1341_v1 }
 0x30a   : > { %v1270_v21 = vpop.eup %1269  ;;  %664 = vrot.lane.b32.xlu0 %v1495_v16, %s1349_s23  ;;  %s1281_s23 = sshll.u32 %s1352_s22, 4  ;;  %s1282_s23 = int_to_ptr.vmem [resolvable:$false] %s1281_s23 }
 0x30b   : > { %v547_v22 = vmul.f32 %v1270_v21, %v1262_v63  ;;  %p1284_p0 = scmp.lt.s32.totalorder %s1572_s13, %s1282_s23 }
 0x30d   : > { %956 = vst.msk [vmem:[%s1539_s24] sm:$0xff] %vm482_vm2, %v547_v22  ;;  %v548_v23 = vpack.c.bf16 %v547_v22, %v547_v22 }
 0x30f   : > { %1166 = vmatmul.mubr.msk.bf16.vlgmr.msra.gmra.mrb[4].mxu1 %vm482_vm2, %v548_v23 }
 0x310   : > { %1177 = vmatprep.mubr.msk.bf16.mxu1 %vm1342_vm0, %v1341_v1 }
 0x371   : > { %v660_v24 = vpop.xlane.xlu0 %659 }
 0x372   : > { %1271 = vrcp.f32 %v660_v24 }
 0x379   : > { %v772_v25 = vpop.xlane.xlu1 %771 }
 0x37a   : > { %1273 = vrcp.f32 %v772_v25 }
 0x37c   : > { %v1272_v26 = vpop.eup %1271 }
 0x37d   : > { %v662_v16 = vmul.f32 %v1272_v26, %v1264_v8  ;;  %v777_v32 = vpop.permute.xlu1 %776 }
 0x37e   : > { %v782_v34 = vsel %vm555_vm3, %v777_v32, 0 }
 0x37f   : > { %957 = vst.msk [vmem:[%s1539_s24 + $0x8] sm:$0xff] %vm482_vm2, %v662_v16  ;;  %v663_v33 = vpack.c.bf16 %v662_v16, %v662_v16 }
 0x381   : > { %v884_v27 = vpop.xlane.xlu0 %883  ;;  %v889_v37 = vpop.permute.xlu1 %888 }
 0x382   : > { %1275 = vrcp.f32 %v884_v27  ;;  %v894_v39 = vsel %vm555_vm3, %v889_v37, 0 }
 0x384   : > { %v1274_v28 = vpop.eup %1273 }
 0x385   : > { %v774_v29 = vmul.f32 %v1274_v28, %v1266_v13  ;;  %v665_v30 = vpop.permute.xlu0 %664 }
 0x386   : > { %v670_v31 = vsel %vm555_vm3, %v665_v30, 0 }
 0x387   : > { %958 = vst.msk [vmem:[%s1539_s24 + $0x10] sm:$0xff] %vm482_vm2, %v774_v29  ;;  %1176 = vmatpush3.bf16.msra.mxu1 %v670_v31  ;;  %v775_v38 = vpack.c.bf16 %v774_v29, %v774_v29 }
 0x388   : > { %1187 = vmatprep.subr.bf16.mxu1 %v1341_v1 }
 0x38a   : > { %1178 = vmatmul.mubr.msk.bf16.vlgmr.msra.gmra.mrb[8].mxu1 %vm482_vm2, %v663_v33 }
 0x38b   : > { %1188 = vmatpush3.bf16.msra.mxu1 %v782_v34  ;;  %1189 = vmatprep.mubr.msk.bf16.mxu1 %vm1342_vm0, %v1341_v1 }
 0x38c   : > { %v1276_v35 = vpop.eup %1275  ;;  %1199 = vmatprep.subr.bf16.mxu1 %v1341_v1 }
 0x38d   : > { %v886_v36 = vmul.f32 %v1276_v35, %v1268_v15 }
 0x38f   : > { %959 = vst.msk [vmem:[%s1539_s24 + $0x18] sm:$0xff] %vm482_vm2, %v886_v36  ;;  %v887_v40 = vpack.c.bf16 %v886_v36, %v886_v36  ;;  %s1283_s24 = scalar_lea.vmem %s1282_s23, 1024 }
 0x390   : > { %p1285_p1 = scmp.lt.s32.totalorder %s1283_s24, %s1277_s9 }
 0x392   : > { %1190 = vmatmul.mubr.msk.bf16.vlgmr.msra.gmra.mrb[12].mxu1 %vm482_vm2, %v775_v38  ;;  %p1286_p2 = por %p1285_p1, %p1284_p0 }
 0x393   : > { %1200 = vmatpush3.bf16.msra.mxu1 %v894_v39  ;;  %1201 = vmatprep.mubr.msk.bf16.mxu1 %vm1342_vm0, %v1341_v1 }
 0x394   : > { %p1287_p3 = pnand %p1286_p2, %p1280_p13 }
 0x39a   : > { %1202 = vmatmul.mubr.msk.bf16.vlgmr.msra.gmra.mrb[16].mxu1 %vm482_vm2, %v887_v40 }
 0x3e2   : > { %v593_v41 = vpop.f32.mrb[4].mxu1 }
 0x3e3   : > { %v1167_v42 = vpop.f32.mrb[5].mxu1 }
 0x3e4   : > { %v596_v43 = vpop.f32.mrb[6].mxu1 }
 0x3e5   : > { %v1168_v44 = vpop.f32.mrb[7].mxu1 }
 0x45d   : > { %v706_v45 = vpop.f32.mrb[8].mxu1 }
 0x45e   : > { %937 = vrot.lane.b32.xlu0 %v706_v45, %s1350_s10  ;;  %v1179_v46 = vpop.f32.mrb[9].mxu1 }
 0x45f   : > { %v709_v47 = vpop.f32.mrb[10].mxu1 }
 0x460   : > { %v1180_v48 = vpop.f32.mrb[11].mxu1 }
 0x465   : > { %v818_v1 = vpop.f32.mrb[12].mxu1 }
 0x466   : > { %941 = vrot.lane.b32.xlu1 %v818_v1, %s1351_s19  ;;  %v1191_v49 = vpop.f32.mrb[13].mxu1 }
 0x467   : > { %v821_v50 = vpop.f32.mrb[14].mxu1 }
 0x468   : > { %1290 = shalt.err (!%p1287_p3)
}
 0x469   : > { %s1291_s21 = scalar_lea.hbm %s1570_s25, 512  ;;  %s1295_s18 = scalar_lea.hbm %s1631_s8, 1024 }
 0x46a   : > { %p1292_p4 = scmp.ne.s32.totalorder %s1570_s25, %s1291_s21  ;;  %p1296_p9 = scmp.lt.u32.totalorder %s1570_s25, %s1631_s8 }
 0x46b   : > { %p1297_p10 = scmp.lt.u32.totalorder %s1295_s18, %s1291_s21  ;;  %p1299_p12 = scmp.lt.u32.totalorder %s1291_s21, %s1570_s25 }
 0x46c   : > { %p1293_p7 = pnand %p1292_p4, %p1438_p5 }
 0x46d   : > { %p1298_p11 = por %p1297_p10, %p1296_p9 }
 0x46e   : > { %p1294_p8 = pneg %p1293_p7 }
 0x46f   : > { %p1300_p13 = por %p1299_p12, %p1298_p11 }
 0x471   : > { %p1301_p0 = pnand %p1300_p13, %p1294_p8 }
 0x473   : > { %1304 = shalt.err (!%p1301_p0)
}
 0x474   : > { %s1353_s9 = smov 128   ;;  %v1192_v51 = vpop.f32.mrb[15].mxu1  ;;  %s1354_s23 = smov 24   ;;  %vm949_vm4 = vcmask 130048   ;;  %vm951_vm5 = vcmask 195584   ;;  %vm954_vm6 = vcmask 257024  }
 0x475   : > { %1205 = dma.vmem_to_hbm [thread:$0]  (%p1438_p5), %s1572_s13, 512, %s1570_s25, %s1576_s20, %s1353_s9, %s1353_s9, %s1350_s10   ;;  %v930_v52 = vpop.f32.mrb[16].mxu1 }
 0x476   : > { %945 = vrot.lane.b32.xlu0 %v930_v52, %s1354_s23  ;;  %v1203_v53 = vpop.f32.mrb[17].mxu1  ;;  %s342_s21 = scalar_lea.vmem %s1630_s7, %s1473_s26 }
 0x477   : > { %v933_v54 = vpop.f32.mrb[18].mxu1 }
 0x478   : > { %v1204_v55 = vpop.f32.mrb[19].mxu1 }
 0x4d0   : > { %v938_v56 = vpop.permute.xlu0 %937 }
 0x4d1   : > { %v948_v58 = vsel %vm482_vm2, %v593_v41, %v938_v56 }
 0x4d8   : > { %v942_v57 = vpop.permute.xlu1 %941 }
 0x4d9   : > { %v950_v59 = vsel %vm949_vm4, %v948_v58, %v942_v57 }
 0x4e8   : > { %v946_v60 = vpop.permute.xlu0 %945 }
 0x4e9   : > { %v952_v61 = vsel %vm951_vm5, %v950_v59, %v946_v60 }
 0x4ea   : > { %v953_v62 = vpack.c.bf16 %v952_v61, %v952_v61 }
 0x4ec   : > { %955 = vst.msk [vmem:[%s342_s21] sm:$0xf] %vm954_vm6, %v953_v62 }
 0x4ed PF: > { %p1211_p5 = scmp.ge.s32.totalorder %s1339_s30, 2  ;;  %s1003_s10 = sand.u32 1, %s1327_s27  }
 0x4ee   : > { %s1004_s13 = scalar_lea.sflag [#allocation3], %s1003_s10 }
 0x4ef   : > { %p1208_p1 = pnand %p1211_p5, %p1442_p6 }
 0x4f1   : > { %1322 = dma.done.wait (!%p1208_p1), %s1004_s13, 512  }
 0x4f2   : > { %1324 = vsyncadd (!%p1208_p1), %s1004_s13, 4294966784  ;;  %p19_p2 = scmp.ge.s32.totalorder %s1425_s11, 4   ;;  %s1634_s27 = smov %s1331_s28 }
 0x4f3   : > { %s1635_s28 = smov %s1335_s29  ;;  %s1636_s29 = smov %s1436_s14 }
 0x4f4   : > { %s1637_s30 = smov %s1425_s11  ;;  %21 = sbr.rel (!%p19_p2) target bundleno = 3 (0x3), region = 101 }
 0x4fb   :  { %1009 = vsyncpa [#allocation3], 1 }
 0x4fc   :  { %1011 = vsyncpa [#allocation3 + $0x1], 1 }

// kernel: transformer_forward.33
= control target key start
LH: loop header
LB: loop body
LE: loop exit
PB: predicated region body
PF: predicated region fallthrough
CT: control target
= control target key end

     0   :  { %v190_v1 = vmov 0.0   ;;  %vm191_vm0 = vmmov 0   ;;  %s245_s0 = inlined_call_operand.vmem [shape: bf16[16,32], index: 0, kind: input, shape index: {}]   ;;  %s246_s1 = inlined_call_operand.vmem [shape: bf16[32,64], index: 1, kind: input, shape index: {}]   ;;  %s247_s2 = inlined_call_operand.vmem [shape: f32[1,64], index: 2, kind: input, shape index: {}]   ;;  %s248_s3 = inlined_call_operand.hbm [shape: f32[16,64], index: 3, kind: output, shape index: {}]  }
   0x1   :  { %v155_v0 = vld [vmem:[%s246_s1] sm:$0xff]   ;;  %142 = vmatprep.subr.bf16.mxu0 %v190_v1  ;;  %v156_v2 = vld [vmem:[%s246_s1 + $0x8] sm:$0xff]   ;;  %146 = vmatprep.mubr.msk.bf16.mxu0 %vm191_vm0, %v190_v1 }
   0x2   :  { %143 = vmatpush3.bf16.msra.mxu0 %v155_v0 }
   0x3   :  { %144 = vmatprep.subr.bf16.mxu0 %v190_v1 }
   0x4   :  { %8 = vsyncpa [#allocation3], 0  ;;  %v157_v3 = vld [vmem:[%s245_s0] sm:$0xff]   ;;  %vm46_vm1 = vcmask 261120   ;;  %vm91_vm2 = vcmask 523264   ;;  %s192_s0 = smov [#allocation2]  }
   0x5   :  { %v134_v4 = vld [vmem:[%s247_s2] ss:$0 sm:$0xff]  ;;  %s123_s1 = sshll.u32 %s192_s0, 4  ;;  %s124_s1 = int_to_ptr.vmem [resolvable:$true] %s123_s1 }
   0x6   :  { %145 = vmatpush3.bf16.msra.mxu0 %v156_v2  ;;  %s166_s2 = scalar_lea.vmem %s124_s1, 256  ;;  %p171_p1 = scmp.lt.s32.totalorder %s124_s1, %s124_s1 }
   0x7   :  { %p167_p0 = scmp.ne.s32.totalorder %s124_s1, %s166_s2  ;;  %p172_p2 = scmp.lt.s32.totalorder %s166_s2, %s166_s2 }
   0x9   :  { %147 = vmatmul.mubr.msk.bf16.vlgmr.msra.gmra.mrb[0].mxu0 %vm46_vm1, %v157_v3  ;;  %p173_p3 = por %p172_p2, %p171_p1 }
   0xb   :  { %p174_p4 = pnand %p173_p3, %p167_p0 }
  0xdc   :  { %v84_v5 = vpop.f32.mrb[0].mxu0 }
  0xdd   :  { %v85_v6 = vadd.f32 %v134_v4, %v84_v5  ;;  %v148_v7 = vpop.f32.mrb[1].mxu0 }
  0xde   :  { %v87_v8 = vpop.f32.mrb[2].mxu0 }
  0xdf   :  { %v88_v9 = vadd.f32 %v134_v4, %v87_v8  ;;  %v149_v10 = vpop.f32.mrb[3].mxu0  ;;  %v92_v11 = vsel %vm91_vm2, %v85_v6, -inf }
  0xe0   :  { %93 = vmax.xlane.f32.xlu0 %v92_v11 }
  0xe1   :  { %v95_v12 = vsel %vm91_vm2, %v88_v9, -inf }
  0xe4   :  { %96 = vmax.xlane.f32.xlu0 %v95_v12 }
 0x16d   :  { %v94_v13 = vpop.xlane.xlu0 %93 }
 0x16e   :  { %v98_v14 = vsub.f32 %v85_v6, %v94_v13 }
 0x170   :  { %v100_v15 = vmul.f32 1.442695, %v98_v14 }
 0x171   :  { %v97_v16 = vpop.xlane.xlu0 %96 }
 0x172   :  { %158 = vpow2.f32 %v100_v15  ;;  %v99_v17 = vsub.f32 %v88_v9, %v97_v16 }
 0x174   :  { %v102_v18 = vmul.f32 1.442695, %v99_v17 }
 0x176   :  { %160 = vpow2.f32 %v102_v18 }
 0x17c   :  { %v159_v19 = vpop.eup %158 }
 0x17d   :  { %v104_v20 = vsel %vm91_vm2, %v159_v19, 0.0 }
 0x17e   :  { %105 = vadd.xlane.f32.xlu1 %v104_v20 }
 0x180   :  { %v161_v21 = vpop.eup %160 }
 0x181   :  { %v107_v22 = vsel %vm91_vm2, %v161_v21, 0.0 }
 0x182   :  { %108 = vadd.xlane.f32.xlu1 %v107_v22 }
 0x20b   :  { %v106_v23 = vpop.xlane.xlu1 %105 }
 0x20c   :  { %162 = vlog2.f32 %v106_v23 }
 0x20f   :  { %v109_v24 = vpop.xlane.xlu1 %108 }
 0x210   :  { %164 = vlog2.f32 %v109_v24 }
 0x216   :  { %v163_v25 = vpop.eup %162 }
 0x217   :  { %v111_v26 = vmul.f32 0.6931472, %v163_v25 }
 0x219   :  { %v114_v27 = vsub.f32 %v98_v14, %v111_v26 }
 0x21a   :  { %v165_v28 = vpop.eup %164 }
 0x21b   :  { %116 = vst.msk [vmem:[#allocation2] sm:$0xff] %vm91_vm2, %v114_v27  ;;  %v113_v29 = vmul.f32 0.6931472, %v165_v28 }
 0x21d   :  { %v115_v30 = vsub.f32 %v99_v17, %v113_v29 }
 0x21f   :  { %117 = vst.msk [vmem:[#allocation2 + $0x8] sm:$0xff] %vm91_vm2, %v115_v30 }
 0x220   :  { %177 = shalt.err (!%p174_p4)
}
 0x221   :  { %s178_s22 = scalar_lea.hbm %s248_s3, 256 }
 0x222   :  { %p179_p5 = scmp.ne.s32.totalorder %s248_s3, %s178_s22  ;;  %p182_p6 = scmp.lt.u32.totalorder %s178_s22, %s248_s3 }
 0x224   :  { %p184_p7 = pnand %p182_p6, %p179_p5 }
 0x226   :  { %187 = shalt.err (!%p184_p7)
}
 0x227   :  { %s193_s27 = smov 128   ;;  %s194_s28 = smov 8  }
 0x228   :  { %129 = dma.vmem_to_hbm [thread:$0]  %s124_s1, 256, %s248_s3, [#allocation3], %s193_s27, %s193_s27, %s194_s28  }
 0x229   :  { %188 = dma.done.wait [#allocation3], 256  }
 0x22a   :  { %189 = vsyncadd [#allocation3], 4294967040 }
 0x22b   :  { %133 = vsyncpa [#allocation3], 1 }

</bundles_post_ra>
